<compile_context>
chip_gen: v7x
topology: tpu7x:2x2x1
jax: 0.10.0
libtpu: 0.0.40
codegen_flags: <defaults>
</compile_context>

<pallas_src>
import jax
import jax.numpy as jnp
import numpy as np
from jax import lax
from jax.experimental import pallas as pl
from jax.experimental.pallas import tpu as pltpu


_MiB = 1024 * 1024
_TINY_INPUT_BYTES = 2 * _MiB        # below this, XLA's fused reduce wins
_TARGET_BLOCK_BYTES = 16 * _MiB     # per-input-block streaming target


def _tpu_params():
    """(physical VMEM bytes per TensorCore, TensorCores per device), best effort."""
    vmem_cap = 64 * _MiB            # conservative default: v7x physical VMEM
    num_tc = 1
    try:
        info = pltpu.get_tpu_info()
        for name in ("vmem_capacity_bytes", "vmem_size_bytes", "vmem_bytes"):
            v = getattr(info, name, None)
            if v:
                vmem_cap = int(v)
                break
        for name in ("num_cores", "tensorcores_per_chip", "core_count"):
            c = getattr(info, name, None)
            if c:
                num_tc = int(c)
                break
    except Exception:
        pass
    try:
        kind = jax.devices()[0].device_kind.lower()
        if any(s in kind for s in ("v4", "v5p", "v7")):   # megacore / dual-TC chips
            num_tc = max(num_tc, 2)
    except Exception:
        pass
    return vmem_cap, num_tc


def _choose_tiles(B, N, F, itemsize, *, max_block_bytes, num_tc):
    """Pick (b_tile, f_tile, n_tile) for the (B, N, F) -> (B, F) node sum.

    Policy for a memory-bound streaming reduction:
      * keep the lane axis F whole unless splitting it is the only way to give
        a second TensorCore work (never below 128 lanes);
      * prefer whole-N blocks (one contiguous HBM stretch, no reduction axis);
      * tile the batch in multiples of 8 to fill the block budget, keeping
        >= num_tc parallel grid points when the batch allows it;
      * tile N (multiples of 8, masked last tile) only when a minimal-batch
        whole-N slab still exceeds the budget.
    """
    # --- F (lane, parallel) axis ---
    f_tile = F
    if num_tc >= 2 and B <= 8 and F >= 256:
        per_core = -(-F // num_tc)                        # ceil(F / num_tc)
        f_tile = max(128, (-(-per_core // 128)) * 128)    # round up to 128

    # --- B (parallel) axis, whole-N blocks preferred ---
    row_bytes = N * f_tile * itemsize                     # one (1, N, f_tile) slab
    if B <= 8:
        b_tile = B
    else:
        b_cap = max(1, min(B, max_block_bytes // row_bytes))
        if num_tc >= 2:
            par_cap = max(8, ((-(-B // num_tc)) // 8) * 8)
            b_cap = min(b_cap, par_cap)
        b_tile = B if b_cap >= B else max(8, (b_cap // 8) * 8)

    # --- N (reduction) axis: only when a single whole-N block cannot fit ---
    n_tile = N
    if b_tile * N * f_tile * itemsize > max_block_bytes:
        n_cap = (max_block_bytes // (b_tile * f_tile * itemsize) // 8) * 8
        n_tile = int(min(N, max(8, n_cap)))

    return int(b_tile), int(f_tile), int(n_tile)


def _sum_whole_kernel(v_ref, o_ref):
    """n_grid == 1: whole node axis in one block, direct store (no accumulator)."""
    o_ref[...] = jnp.sum(v_ref[...].astype(jnp.float32), axis=1).astype(o_ref.dtype)


def _make_sum_acc_kernel(n_total, n_tile):
    """n_grid > 1: f32 VMEM accumulator; ragged last N tile masked explicitly."""
    needs_mask = (n_total % n_tile) != 0

    def kernel(v_ref, o_ref, acc_ref):
        n = pl.program_id(2)

        @pl.when(n == 0)
        def _():
            acc_ref[...] = jnp.zeros_like(acc_ref)

        v = v_ref[...].astype(jnp.float32)
        if needs_mask:
            row = n * n_tile + lax.broadcasted_iota(jnp.int32, v.shape, 1)
            v = jnp.where(row < n_total, v, 0.0)
        acc_ref[...] += jnp.sum(v, axis=1)

        @pl.when(n == pl.num_programs(2) - 1)
        def _():
            o_ref[...] = acc_ref[...].astype(o_ref.dtype)

    return kernel


def attention_layer_forward(vertex, w_omega, u_omega, *, max_block_bytes=None):
    """vertex: (B, N, F) -> feat: (B, F).  Matches _attention_layer.forward.

    w_omega / u_omega are accepted for API parity with the PyTorch module but
    (faithfully to its forward) cannot influence the output: the softmax over
    the size-1 last axis of `att` is identically 1.0.
    `max_block_bytes` optionally overrides the per-block budget (for testing).
    """
    del w_omega, u_omega                       # dead path -- see module comment
    B, N, F = vertex.shape
    dtype = vertex.dtype
    itemsize = jnp.dtype(dtype).itemsize

    forced = max_block_bytes is not None
    if not forced and B * N * F * itemsize < _TINY_INPUT_BYTES:
        return jnp.sum(vertex, axis=1)         # launch cost would dominate

    # Lane-densify small feature dims: fold `fold` node rows into the lane axis
    # (contiguous, zero-copy reshape) so output stores are full-128-lane vst.
    fold = 1
    if F < 128:
        k = 128 // F
        if 128 % F == 0 and N % k == 0:
            fold = k
        else:
            # TODO(synk): lane-sparse F with no clean fold; XLA reduce is the better tool.
            return jnp.sum(vertex, axis=1)
    x = vertex if fold == 1 else vertex.reshape(B, N // fold, fold * F)
    Bx, Nx, Fx = x.shape

    vmem_cap, num_tc = _tpu_params()
    if max_block_bytes is None:
        max_block_bytes = min(_TARGET_BLOCK_BYTES, (vmem_cap * 3) // 8)

    b_tile, f_tile, n_tile = _choose_tiles(
        Bx, Nx, Fx, itemsize, max_block_bytes=max_block_bytes, num_tc=num_tc)
    b_grid = pl.cdiv(Bx, b_tile)
    f_grid = pl.cdiv(Fx, f_tile)
    n_grid = pl.cdiv(Nx, n_tile)

    # VMEM budget: 2x double-buffered input block + 2x output block (+ f32 acc).
    in_blk = b_tile * n_tile * f_tile * itemsize
    out_blk = b_tile * f_tile * itemsize
    acc_blk = b_tile * f_tile * 4 if n_grid > 1 else 0
    vmem_limit = int(min(int(vmem_cap * 0.9),
                         max(32 * _MiB, 2 * in_blk + 2 * out_blk + acc_blk + 4 * _MiB)))

    if n_grid == 1:
        kernel = _sum_whole_kernel
        scratch = []
    else:
        kernel = _make_sum_acc_kernel(Nx, n_tile)
        scratch = [pltpu.VMEM((b_tile, f_tile), jnp.float32)]

    out = pl.pallas_call(
        kernel,
        out_shape=jax.ShapeDtypeStruct((Bx, Fx), dtype),
        grid_spec=pltpu.PrefetchScalarGridSpec(
            num_scalar_prefetch=0,
            grid=(b_grid, f_grid, n_grid),               # reduction axis (N) last
            in_specs=[
                pl.BlockSpec((b_tile, n_tile, f_tile), lambda b, f, n: (b, n, f)),
            ],
            # Same output block across the n axis -> VMEM-resident accumulator;
            # lane-dense 2-D (B, F) slab, no in-kernel reshape.
            out_specs=pl.BlockSpec((b_tile, f_tile), lambda b, f, n: (b, f)),
            scratch_shapes=scratch,
        ),
        compiler_params=pltpu.CompilerParams(
            dimension_semantics=("parallel", "parallel", "arbitrary"),
            vmem_limit_bytes=vmem_limit,
        ),
    )(x)

    if fold != 1:
        out = jnp.sum(out.reshape(B, fold, F).astype(jnp.float32),
                      axis=1).astype(dtype)
    return out


def _reference(vertex, w_omega, u_omega):
    """Full-math JAX port of the PyTorch forward (including the dead path)."""
    u = jnp.tanh(jnp.matmul(vertex, w_omega))
    att = jnp.matmul(u, u_omega)
    att_score = jax.nn.softmax(att, axis=-1)
    scored = vertex * att_score
    return jnp.sum(scored, axis=1)


if __name__ == "__main__":
    key = jax.random.PRNGKey(0)

    # (B, N, F), forced block budget (None = production policy)
    cases = [
        ((2, 8, 32), None),            # module-scale shape: tiny-input path
        ((16, 256, 256), None),        # streaming Pallas path, n_grid == 1
        ((12, 200, 128), 64 * 1024),   # forced tiny budget: ragged B blocks,
                                       # N-tiled accumulator + masked last tile
    ]

    for (B, N, F), budget in cases:
        key, k_v, k_w, k_u = jax.random.split(key, 4)
        vertex = jax.random.normal(k_v, (B, N, F), dtype=jnp.float32)
        # nn.init.uniform_(-0.1, 0.1) equivalents, deterministic
        w_omega = jax.random.uniform(k_w, (F, F), dtype=jnp.float32,
                                     minval=-0.1, maxval=0.1)
        u_omega = jax.random.uniform(k_u, (F, 1), dtype=jnp.float32,
                                     minval=-0.1, maxval=0.1)

        feat = attention_layer_forward(vertex, w_omega, u_omega,
                                       max_block_bytes=budget)
        feat = jax.block_until_ready(feat)

        ref = _reference(vertex, w_omega, u_omega)
        np.testing.assert_allclose(np.asarray(feat), np.asarray(ref),
                                   rtol=1e-5, atol=1e-5)

    print("KERNEL_OK")
</pallas_src>

<mosaic_0001>
module attributes {stable_mosaic.version = 11 : i64} {
  func.func @_sum_whole_kernel(%arg0: i32, %arg1: i32, %arg2: i32, %arg3: memref<16x256x256xf32, #tpu.memory_space<vmem>>, %arg4: memref<16x256xf32, #tpu.memory_space<vmem>>) attributes {dimension_semantics = [#tpu.dimension_semantics<parallel>, #tpu.dimension_semantics<parallel>, #tpu.dimension_semantics<arbitrary>], iteration_bounds = array<i64: 1, 1, 1>, scalar_prefetch = 0 : i64, scratch_operands = 0 : i64, tpu.core_type = #tpu.core_type<tc>, window_params = [{transform_indices = @transform_0, window_bounds = array<i64: 16, 256, 256>}, {transform_indices = @transform_1, window_bounds = array<i64: 16, 256>}]} {
    %c0 = arith.constant 0 : index
    %c0_0 = arith.constant 0 : index
    %c0_1 = arith.constant 0 : index
    %0 = vector.load %arg3[%c0, %c0_0, %c0_1] : memref<16x256x256xf32, #tpu.memory_space<vmem>>, vector<16x256x256xf32>
    %cst = arith.constant dense<0.000000e+00> : vector<16x256xf32>
    %1 = vector.multi_reduction <add>, %0, %cst [1] : vector<16x256x256xf32> to vector<16x256xf32>
    %c0_2 = arith.constant 0 : index
    %c0_3 = arith.constant 0 : index
    %2 = vector.load %arg4[%c0_2, %c0_3] : memref<16x256xf32, #tpu.memory_space<vmem>>, vector<16x256xf32>
    tpu.vector_store %arg4[%c0_2, %c0_3], %1 {strides = array<i32>} : memref<16x256xf32, #tpu.memory_space<vmem>>, vector<16x256xf32>,
    return
  }
  func.func @transform_0(%arg0: i32, %arg1: i32, %arg2: i32) -> (i32, i32, i32) {
    %c0_i32 = arith.constant 0 : i32
    return %arg0, %arg2, %arg1 : i32, i32, i32
  }
  func.func @transform_1(%arg0: i32, %arg1: i32, %arg2: i32) -> (i32, i32) {
    %c0_i32 = arith.constant 0 : i32
    return %arg0, %arg1 : i32, i32
  }
}

</mosaic_0001>

<bundles_post_ra>
// kernel: tpu_custom_call.1
= control target key start
LH: loop header
LB: loop body
LE: loop exit
PB: predicated region body
PF: predicated region fallthrough
CT: control target
= control target key end

     0   :  { %6 = vsyncpa [#allocation3], 0  ;;  %s2540_s0 = inlined_call_operand.hbm [shape: f32[16,256,256], index: 0, kind: input, shape index: {}]   ;;  %s2541_s1 = inlined_call_operand.hbm [shape: f32[16,256], index: 1, kind: output, shape index: {}]  }
   0x1   :  { %7 = vsyncpa [#allocation4], 0  ;;  %s2375_s6 = smov [#allocation2]   ;;  %s2327_s10 = scalar_lea.hbm %s2540_s0, 131072 }
   0x2   :  { %s13_s7 = sshll.u32 %s2375_s6, 4  ;;  %p2328_p0 = scmp.ne.s32.totalorder %s2540_s0, %s2327_s10  ;;  %s14_s7 = int_to_ptr.vmem [resolvable:$true] %s13_s7 }
   0x3   :  { %p2331_p1 = scmp.lt.u32.totalorder %s2327_s10, %s2540_s0 }
   0x5   :  { %p2333_p2 = pnand %p2331_p1, %p2328_p0 }
   0x7   :  { %2336 = shalt.err (!%p2333_p2)
}
   0x8   :  { %s2337_s15 = scalar_lea.vmem %s14_s7, 131072  ;;  %p2342_p4 = scmp.lt.s32.totalorder %s14_s7, %s14_s7 }
   0x9   :  { %p2338_p3 = scmp.ne.s32.totalorder %s14_s7, %s2337_s15  ;;  %p2343_p5 = scmp.lt.s32.totalorder %s2337_s15, %s2337_s15 }
   0xb   :  { %p2344_p6 = por %p2343_p5, %p2342_p4 }
   0xd   :  { %p2345_p7 = pnand %p2344_p6, %p2338_p3 }
   0xf   :  { %2348 = shalt.err (!%p2345_p7)
}
  0x10   :  { %s2376_s16 = smov 256   ;;  %s2377_s17 = smov 16  }
  0x11   :  { %19 = dma.hbm_to_vmem [thread:$0]  %s2540_s0, 131072, %s14_s7, [#allocation3], %s2376_s16, %s2376_s16, %s2377_s17  }
  0x12   :  { %2371 = dma.done.wait [#allocation3], 131072  }
  0x13   :  { %2372 = vsyncadd [#allocation3], 4294836224  ;;  %v23_v0 = vld [vmem:[#allocation2] sm:$0xff]  ;;  %v24_v1 = vld [vmem:[#allocation2 + $0x8] sm:$0xff]  ;;  %vm2263_vm0 = vcmask 1041409   ;;  %vm2265_vm1 = vcmask 1042434  }
  0x14   :  { %v25_v2 = vld [vmem:[#allocation2 + $0x10] sm:$0xff]  ;;  %v26_v3 = vld [vmem:[#allocation2 + $0x18] sm:$0xff]  ;;  %v87_v4 = vld [vmem:[#allocation2 + $0x200] sm:$0xff]  ;;  %vm2267_vm2 = vcmask 1043459   ;;  %vm2269_vm3 = vcmask 1044484   ;;  %vm2271_vm4 = vcmask 1045509  }
  0x15   :  { %v88_v5 = vld [vmem:[#allocation2 + $0x208] sm:$0xff]  ;;  %v89_v6 = vld [vmem:[#allocation2 + $0x210] sm:$0xff]  ;;  %v90_v7 = vld [vmem:[#allocation2 + $0x218] sm:$0xff]  ;;  %v1047_v24 = vadd.f32 %v25_v2, %v23_v0  ;;  %v1084_v25 = vadd.f32 %v26_v3, %v24_v1  ;;  %vm2273_vm5 = vcmask 1046534   ;;  %vm2275_vm6 = vcmask 1047559   ;;  %s2378_s0 = smov [#allocation5]  }
  0x16   :  { %v27_v8 = vld [vmem:[#allocation2 + $0x20] sm:$0xff]  ;;  %v28_v9 = vld [vmem:[#allocation2 + $0x28] sm:$0xff]  ;;  %v153_v14 = vld [vmem:[#allocation2 + $0x410] sm:$0xff]  ;;  %v1121_v26 = vadd.f32 %v89_v6, %v87_v4  ;;  %v1158_v27 = vadd.f32 %v90_v7, %v88_v5  ;;  %s2311_s20 = sshll.u32 %s2378_s0, 4  ;;  %s2312_s20 = int_to_ptr.vmem [resolvable:$true] %s2311_s20 }
  0x17   :  { %v91_v10 = vld [vmem:[#allocation2 + $0x220] sm:$0xff]  ;;  %v92_v11 = vld [vmem:[#allocation2 + $0x228] sm:$0xff]  ;;  %v154_v15 = vld [vmem:[#allocation2 + $0x418] sm:$0xff]  ;;  %v1048_v38 = vadd.f32 %v1047_v24, %v27_v8  ;;  %v1085_v39 = vadd.f32 %v1084_v25, %v28_v9  ;;  %s2349_s21 = scalar_lea.vmem %s2312_s20, 512  ;;  %p2354_p9 = scmp.lt.s32.totalorder %s2312_s20, %s2312_s20 }
  0x18   :  { %v151_v12 = vld [vmem:[#allocation2 + $0x400] sm:$0xff]  ;;  %v152_v13 = vld [vmem:[#allocation2 + $0x408] sm:$0xff]  ;;  %v29_v16 = vld [vmem:[#allocation2 + $0x30] sm:$0xff]  ;;  %v1122_v40 = vadd.f32 %v1121_v26, %v91_v10  ;;  %v1159_v41 = vadd.f32 %v1158_v27, %v92_v11  ;;  %p2350_p8 = scmp.ne.s32.totalorder %s2312_s20, %s2349_s21  ;;  %p2355_p10 = scmp.lt.s32.totalorder %s2349_s21, %s2349_s21 }
  0x19   :  { %v30_v17 = vld [vmem:[#allocation2 + $0x38] sm:$0xff]  ;;  %v155_v18 = vld [vmem:[#allocation2 + $0x420] sm:$0xff]  ;;  %v156_v19 = vld [vmem:[#allocation2 + $0x428] sm:$0xff]  ;;  %v1195_v33 = vadd.f32 %v153_v14, %v151_v12  ;;  %v1232_v34 = vadd.f32 %v154_v15, %v152_v13  ;;  %v1049_v54 = vadd.f32 %v1048_v38, %v29_v16 }
  0x1a   :  { %v215_v20 = vld [vmem:[#allocation2 + $0x600] sm:$0xff]  ;;  %v216_v21 = vld [vmem:[#allocation2 + $0x608] sm:$0xff]  ;;  %v217_v22 = vld [vmem:[#allocation2 + $0x610] sm:$0xff]  ;;  %v1086_v55 = vadd.f32 %v1085_v39, %v30_v17  ;;  %p2356_p11 = por %p2355_p10, %p2354_p9 }
  0x1b   :  { %v218_v23 = vld [vmem:[#allocation2 + $0x618] sm:$0xff]  ;;  %v31_v28 = vld [vmem:[#allocation2 + $0x40] sm:$0xff]  ;;  %v32_v29 = vld [vmem:[#allocation2 + $0x48] sm:$0xff]  ;;  %v1196_v47 = vadd.f32 %v1195_v33, %v155_v18  ;;  %v1233_v48 = vadd.f32 %v1232_v34, %v156_v19  ;;  %v1269_v49 = vadd.f32 %v217_v22, %v215_v20 }
  0x1c   :  { %v93_v30 = vld [vmem:[#allocation2 + $0x230] sm:$0xff]  ;;  %v94_v31 = vld [vmem:[#allocation2 + $0x238] sm:$0xff]  ;;  %v219_v36 = vld [vmem:[#allocation2 + $0x620] sm:$0xff]  ;;  %v1306_v50 = vadd.f32 %v218_v23, %v216_v21  ;;  %v1050_v6 = vadd.f32 %v1049_v54, %v31_v28  ;;  %v1087_v7 = vadd.f32 %v1086_v55, %v32_v29  ;;  %p2357_p12 = pnand %p2356_p11, %p2350_p8 }
  0x1d   :  { %v157_v32 = vld [vmem:[#allocation2 + $0x430] sm:$0xff]  ;;  %v158_v35 = vld [vmem:[#allocation2 + $0x438] sm:$0xff]  ;;  %v220_v37 = vld [vmem:[#allocation2 + $0x628] sm:$0xff]  ;;  %v1123_v56 = vadd.f32 %v1122_v40, %v93_v30  ;;  %v1160_v57 = vadd.f32 %v1159_v41, %v94_v31  ;;  %v1270_v1 = vadd.f32 %v1269_v49, %v219_v36 }
  0x1e   :  { %v33_v42 = vld [vmem:[#allocation2 + $0x50] sm:$0xff]  ;;  %v34_v43 = vld [vmem:[#allocation2 + $0x58] sm:$0xff]  ;;  %v95_v44 = vld [vmem:[#allocation2 + $0x240] sm:$0xff]  ;;  %v1197_v63 = vadd.f32 %v1196_v47, %v157_v32  ;;  %v1234_v0 = vadd.f32 %v1233_v48, %v158_v35  ;;  %v1307_v2 = vadd.f32 %v1306_v50, %v220_v37 }
  0x1f   :  { %v96_v45 = vld [vmem:[#allocation2 + $0x248] sm:$0xff]  ;;  %v159_v46 = vld [vmem:[#allocation2 + $0x440] sm:$0xff]  ;;  %v221_v52 = vld [vmem:[#allocation2 + $0x630] sm:$0xff]  ;;  %v1124_v8 = vadd.f32 %v1123_v56, %v95_v44  ;;  %v1051_v22 = vadd.f32 %v1050_v6, %v33_v42  ;;  %v1088_v23 = vadd.f32 %v1087_v7, %v34_v43 }
  0x20   :  { %v160_v51 = vld [vmem:[#allocation2 + $0x448] sm:$0xff]  ;;  %v222_v53 = vld [vmem:[#allocation2 + $0x638] sm:$0xff]  ;;  %v35_v58 = vld [vmem:[#allocation2 + $0x60] sm:$0xff]  ;;  %v1161_v9 = vadd.f32 %v1160_v57, %v96_v45  ;;  %v1198_v15 = vadd.f32 %v1197_v63, %v159_v46  ;;  %v1271_v17 = vadd.f32 %v1270_v1, %v221_v52 }
  0x21   :  { %v36_v59 = vld [vmem:[#allocation2 + $0x68] sm:$0xff]  ;;  %v97_v60 = vld [vmem:[#allocation2 + $0x250] sm:$0xff]  ;;  %v98_v61 = vld [vmem:[#allocation2 + $0x258] sm:$0xff]  ;;  %v1235_v16 = vadd.f32 %v1234_v0, %v160_v51  ;;  %v1308_v18 = vadd.f32 %v1307_v2, %v222_v53  ;;  %v1052_v38 = vadd.f32 %v1051_v22, %v35_v58 }
  0x22   :  { %v161_v62 = vld [vmem:[#allocation2 + $0x450] sm:$0xff]  ;;  %v162_v3 = vld [vmem:[#allocation2 + $0x458] sm:$0xff]  ;;  %v223_v4 = vld [vmem:[#allocation2 + $0x640] sm:$0xff]  ;;  %v1125_v24 = vadd.f32 %v1124_v8, %v97_v60  ;;  %v1162_v25 = vadd.f32 %v1161_v9, %v98_v61  ;;  %v1089_v39 = vadd.f32 %v1088_v23, %v36_v59 }
  0x23   :  { %v224_v5 = vld [vmem:[#allocation2 + $0x648] sm:$0xff]  ;;  %v37_v10 = vld [vmem:[#allocation2 + $0x70] sm:$0xff]  ;;  %v38_v11 = vld [vmem:[#allocation2 + $0x78] sm:$0xff]  ;;  %v1199_v31 = vadd.f32 %v1198_v15, %v161_v62  ;;  %v1236_v32 = vadd.f32 %v1235_v16, %v162_v3  ;;  %v1272_v33 = vadd.f32 %v1271_v17, %v223_v4 }
  0x24   :  { %v99_v12 = vld [vmem:[#allocation2 + $0x260] sm:$0xff]  ;;  %v100_v13 = vld [vmem:[#allocation2 + $0x268] sm:$0xff]  ;;  %v225_v20 = vld [vmem:[#allocation2 + $0x650] sm:$0xff]  ;;  %v1309_v34 = vadd.f32 %v1308_v18, %v224_v5  ;;  %v1053_v54 = vadd.f32 %v1052_v38, %v37_v10  ;;  %v1090_v55 = vadd.f32 %v1089_v39, %v38_v11 }
  0x25   :  { %v163_v14 = vld [vmem:[#allocation2 + $0x460] sm:$0xff]  ;;  %v164_v19 = vld [vmem:[#allocation2 + $0x468] sm:$0xff]  ;;  %v226_v21 = vld [vmem:[#allocation2 + $0x658] sm:$0xff]  ;;  %v1126_v40 = vadd.f32 %v1125_v24, %v99_v12  ;;  %v1163_v41 = vadd.f32 %v1162_v25, %v100_v13  ;;  %v1273_v49 = vadd.f32 %v1272_v33, %v225_v20 }
  0x26   :  { %v39_v26 = vld [vmem:[#allocation2 + $0x80] sm:$0xff]  ;;  %v40_v27 = vld [vmem:[#allocation2 + $0x88] sm:$0xff]  ;;  %v101_v28 = vld [vmem:[#allocation2 + $0x270] sm:$0xff]  ;;  %v1200_v47 = vadd.f32 %v1199_v31, %v163_v14  ;;  %v1237_v48 = vadd.f32 %v1236_v32, %v164_v19  ;;  %v1310_v50 = vadd.f32 %v1309_v34, %v226_v21 }
  0x27   :  { %v102_v29 = vld [vmem:[#allocation2 + $0x278] sm:$0xff]  ;;  %v165_v30 = vld [vmem:[#allocation2 + $0x470] sm:$0xff]  ;;  %v227_v36 = vld [vmem:[#allocation2 + $0x660] sm:$0xff]  ;;  %v1127_v56 = vadd.f32 %v1126_v40, %v101_v28  ;;  %v1054_v6 = vadd.f32 %v1053_v54, %v39_v26  ;;  %v1091_v7 = vadd.f32 %v1090_v55, %v40_v27 }
  0x28   :  { %v166_v35 = vld [vmem:[#allocation2 + $0x478] sm:$0xff]  ;;  %v228_v37 = vld [vmem:[#allocation2 + $0x668] sm:$0xff]  ;;  %v41_v42 = vld [vmem:[#allocation2 + $0x90] sm:$0xff]  ;;  %v1164_v57 = vadd.f32 %v1163_v41, %v102_v29  ;;  %v1201_v63 = vadd.f32 %v1200_v47, %v165_v30  ;;  %v1274_v1 = vadd.f32 %v1273_v49, %v227_v36 }
  0x29   :  { %v42_v43 = vld [vmem:[#allocation2 + $0x98] sm:$0xff]  ;;  %v103_v44 = vld [vmem:[#allocation2 + $0x280] sm:$0xff]  ;;  %v104_v45 = vld [vmem:[#allocation2 + $0x288] sm:$0xff]  ;;  %v1238_v0 = vadd.f32 %v1237_v48, %v166_v35  ;;  %v1311_v2 = vadd.f32 %v1310_v50, %v228_v37  ;;  %v1055_v22 = vadd.f32 %v1054_v6, %v41_v42 }
  0x2a   :  { %v167_v46 = vld [vmem:[#allocation2 + $0x480] sm:$0xff]  ;;  %v168_v51 = vld [vmem:[#allocation2 + $0x488] sm:$0xff]  ;;  %v229_v52 = vld [vmem:[#allocation2 + $0x670] sm:$0xff]  ;;  %v1128_v8 = vadd.f32 %v1127_v56, %v103_v44  ;;  %v1165_v9 = vadd.f32 %v1164_v57, %v104_v45  ;;  %v1092_v23 = vadd.f32 %v1091_v7, %v42_v43 }
  0x2b   :  { %v230_v53 = vld [vmem:[#allocation2 + $0x678] sm:$0xff]  ;;  %v43_v58 = vld [vmem:[#allocation2 + $0xa0] sm:$0xff]  ;;  %v44_v59 = vld [vmem:[#allocation2 + $0xa8] sm:$0xff]  ;;  %v1202_v15 = vadd.f32 %v1201_v63, %v167_v46  ;;  %v1239_v16 = vadd.f32 %v1238_v0, %v168_v51  ;;  %v1275_v17 = vadd.f32 %v1274_v1, %v229_v52 }
  0x2c   :  { %v105_v60 = vld [vmem:[#allocation2 + $0x290] sm:$0xff]  ;;  %v106_v61 = vld [vmem:[#allocation2 + $0x298] sm:$0xff]  ;;  %v231_v4 = vld [vmem:[#allocation2 + $0x680] sm:$0xff]  ;;  %v1312_v18 = vadd.f32 %v1311_v2, %v230_v53  ;;  %v1056_v38 = vadd.f32 %v1055_v22, %v43_v58  ;;  %v1093_v39 = vadd.f32 %v1092_v23, %v44_v59 }
  0x2d   :  { %v169_v62 = vld [vmem:[#allocation2 + $0x490] sm:$0xff]  ;;  %v170_v3 = vld [vmem:[#allocation2 + $0x498] sm:$0xff]  ;;  %v232_v5 = vld [vmem:[#allocation2 + $0x688] sm:$0xff]  ;;  %v1129_v24 = vadd.f32 %v1128_v8, %v105_v60  ;;  %v1166_v25 = vadd.f32 %v1165_v9, %v106_v61  ;;  %v1276_v33 = vadd.f32 %v1275_v17, %v231_v4 }
  0x2e   :  { %v45_v10 = vld [vmem:[#allocation2 + $0xb0] sm:$0xff]  ;;  %v46_v11 = vld [vmem:[#allocation2 + $0xb8] sm:$0xff]  ;;  %v107_v12 = vld [vmem:[#allocation2 + $0x2a0] sm:$0xff]  ;;  %v1203_v31 = vadd.f32 %v1202_v15, %v169_v62  ;;  %v1240_v32 = vadd.f32 %v1239_v16, %v170_v3  ;;  %v1313_v34 = vadd.f32 %v1312_v18, %v232_v5 }
  0x2f   :  { %v108_v13 = vld [vmem:[#allocation2 + $0x2a8] sm:$0xff]  ;;  %v171_v14 = vld [vmem:[#allocation2 + $0x4a0] sm:$0xff]  ;;  %v233_v20 = vld [vmem:[#allocation2 + $0x690] sm:$0xff]  ;;  %v1130_v40 = vadd.f32 %v1129_v24, %v107_v12  ;;  %v1057_v54 = vadd.f32 %v1056_v38, %v45_v10  ;;  %v1094_v55 = vadd.f32 %v1093_v39, %v46_v11 }
  0x30   :  { %v172_v19 = vld [vmem:[#allocation2 + $0x4a8] sm:$0xff]  ;;  %v234_v21 = vld [vmem:[#allocation2 + $0x698] sm:$0xff]  ;;  %v47_v26 = vld [vmem:[#allocation2 + $0xc0] sm:$0xff]  ;;  %v1167_v41 = vadd.f32 %v1166_v25, %v108_v13  ;;  %v1204_v47 = vadd.f32 %v1203_v31, %v171_v14  ;;  %v1277_v49 = vadd.f32 %v1276_v33, %v233_v20 }
  0x31   :  { %v48_v27 = vld [vmem:[#allocation2 + $0xc8] sm:$0xff]  ;;  %v109_v28 = vld [vmem:[#allocation2 + $0x2b0] sm:$0xff]  ;;  %v110_v29 = vld [vmem:[#allocation2 + $0x2b8] sm:$0xff]  ;;  %v1241_v48 = vadd.f32 %v1240_v32, %v172_v19  ;;  %v1314_v50 = vadd.f32 %v1313_v34, %v234_v21  ;;  %v1058_v6 = vadd.f32 %v1057_v54, %v47_v26 }
  0x32   :  { %v173_v30 = vld [vmem:[#allocation2 + $0x4b0] sm:$0xff]  ;;  %v174_v35 = vld [vmem:[#allocation2 + $0x4b8] sm:$0xff]  ;;  %v235_v36 = vld [vmem:[#allocation2 + $0x6a0] sm:$0xff]  ;;  %v1131_v56 = vadd.f32 %v1130_v40, %v109_v28  ;;  %v1168_v57 = vadd.f32 %v1167_v41, %v110_v29  ;;  %v1095_v7 = vadd.f32 %v1094_v55, %v48_v27 }
  0x33   :  { %v236_v37 = vld [vmem:[#allocation2 + $0x6a8] sm:$0xff]  ;;  %v49_v42 = vld [vmem:[#allocation2 + $0xd0] sm:$0xff]  ;;  %v50_v43 = vld [vmem:[#allocation2 + $0xd8] sm:$0xff]  ;;  %v1205_v63 = vadd.f32 %v1204_v47, %v173_v30  ;;  %v1242_v0 = vadd.f32 %v1241_v48, %v174_v35  ;;  %v1278_v1 = vadd.f32 %v1277_v49, %v235_v36 }
  0x34   :  { %v111_v44 = vld [vmem:[#allocation2 + $0x2c0] sm:$0xff]  ;;  %v112_v45 = vld [vmem:[#allocation2 + $0x2c8] sm:$0xff]  ;;  %v237_v52 = vld [vmem:[#allocation2 + $0x6b0] sm:$0xff]  ;;  %v1315_v2 = vadd.f32 %v1314_v50, %v236_v37  ;;  %v1059_v22 = vadd.f32 %v1058_v6, %v49_v42  ;;  %v1096_v23 = vadd.f32 %v1095_v7, %v50_v43 }
  0x35   :  { %v175_v46 = vld [vmem:[#allocation2 + $0x4c0] sm:$0xff]  ;;  %v176_v51 = vld [vmem:[#allocation2 + $0x4c8] sm:$0xff]  ;;  %v238_v53 = vld [vmem:[#allocation2 + $0x6b8] sm:$0xff]  ;;  %v1132_v8 = vadd.f32 %v1131_v56, %v111_v44  ;;  %v1169_v9 = vadd.f32 %v1168_v57, %v112_v45  ;;  %v1279_v17 = vadd.f32 %v1278_v1, %v237_v52 }
  0x36   :  { %v51_v58 = vld [vmem:[#allocation2 + $0xe0] sm:$0xff]  ;;  %v52_v59 = vld [vmem:[#allocation2 + $0xe8] sm:$0xff]  ;;  %v113_v60 = vld [vmem:[#allocation2 + $0x2d0] sm:$0xff]  ;;  %v1206_v15 = vadd.f32 %v1205_v63, %v175_v46  ;;  %v1243_v16 = vadd.f32 %v1242_v0, %v176_v51  ;;  %v1316_v18 = vadd.f32 %v1315_v2, %v238_v53 }
  0x37   :  { %v114_v61 = vld [vmem:[#allocation2 + $0x2d8] sm:$0xff]  ;;  %v177_v62 = vld [vmem:[#allocation2 + $0x4d0] sm:$0xff]  ;;  %v239_v4 = vld [vmem:[#allocation2 + $0x6c0] sm:$0xff]  ;;  %v1133_v24 = vadd.f32 %v1132_v8, %v113_v60  ;;  %v1060_v38 = vadd.f32 %v1059_v22, %v51_v58  ;;  %v1097_v39 = vadd.f32 %v1096_v23, %v52_v59 }
  0x38   :  { %v178_v3 = vld [vmem:[#allocation2 + $0x4d8] sm:$0xff]  ;;  %v240_v5 = vld [vmem:[#allocation2 + $0x6c8] sm:$0xff]  ;;  %v53_v10 = vld [vmem:[#allocation2 + $0xf0] sm:$0xff]  ;;  %v1170_v25 = vadd.f32 %v1169_v9, %v114_v61  ;;  %v1207_v31 = vadd.f32 %v1206_v15, %v177_v62  ;;  %v1280_v33 = vadd.f32 %v1279_v17, %v239_v4 }
  0x39   :  { %v54_v11 = vld [vmem:[#allocation2 + $0xf8] sm:$0xff]  ;;  %v115_v12 = vld [vmem:[#allocation2 + $0x2e0] sm:$0xff]  ;;  %v116_v13 = vld [vmem:[#allocation2 + $0x2e8] sm:$0xff]  ;;  %v1244_v32 = vadd.f32 %v1243_v16, %v178_v3  ;;  %v1317_v34 = vadd.f32 %v1316_v18, %v240_v5  ;;  %v1061_v54 = vadd.f32 %v1060_v38, %v53_v10 }
  0x3a   :  { %v179_v14 = vld [vmem:[#allocation2 + $0x4e0] sm:$0xff]  ;;  %v180_v19 = vld [vmem:[#allocation2 + $0x4e8] sm:$0xff]  ;;  %v241_v20 = vld [vmem:[#allocation2 + $0x6d0] sm:$0xff]  ;;  %v1134_v40 = vadd.f32 %v1133_v24, %v115_v12  ;;  %v1171_v41 = vadd.f32 %v1170_v25, %v116_v13  ;;  %v1098_v55 = vadd.f32 %v1097_v39, %v54_v11 }
  0x3b   :  { %v242_v21 = vld [vmem:[#allocation2 + $0x6d8] sm:$0xff]  ;;  %v55_v26 = vld [vmem:[#allocation2 + $0x100] sm:$0xff]  ;;  %v56_v27 = vld [vmem:[#allocation2 + $0x108] sm:$0xff]  ;;  %v1208_v47 = vadd.f32 %v1207_v31, %v179_v14  ;;  %v1245_v48 = vadd.f32 %v1244_v32, %v180_v19  ;;  %v1281_v49 = vadd.f32 %v1280_v33, %v241_v20 }
  0x3c   :  { %v117_v28 = vld [vmem:[#allocation2 + $0x2f0] sm:$0xff]  ;;  %v118_v29 = vld [vmem:[#allocation2 + $0x2f8] sm:$0xff]  ;;  %v243_v36 = vld [vmem:[#allocation2 + $0x6e0] sm:$0xff]  ;;  %v1318_v50 = vadd.f32 %v1317_v34, %v242_v21  ;;  %v1062_v6 = vadd.f32 %v1061_v54, %v55_v26  ;;  %v1099_v7 = vadd.f32 %v1098_v55, %v56_v27 }
  0x3d   :  { %v181_v30 = vld [vmem:[#allocation2 + $0x4f0] sm:$0xff]  ;;  %v182_v35 = vld [vmem:[#allocation2 + $0x4f8] sm:$0xff]  ;;  %v244_v37 = vld [vmem:[#allocation2 + $0x6e8] sm:$0xff]  ;;  %v1135_v56 = vadd.f32 %v1134_v40, %v117_v28  ;;  %v1172_v57 = vadd.f32 %v1171_v41, %v118_v29  ;;  %v1282_v1 = vadd.f32 %v1281_v49, %v243_v36 }
  0x3e   :  { %v57_v42 = vld [vmem:[#allocation2 + $0x110] sm:$0xff]  ;;  %v58_v43 = vld [vmem:[#allocation2 + $0x118] sm:$0xff]  ;;  %v119_v44 = vld [vmem:[#allocation2 + $0x300] sm:$0xff]  ;;  %v1209_v63 = vadd.f32 %v1208_v47, %v181_v30  ;;  %v1246_v0 = vadd.f32 %v1245_v48, %v182_v35  ;;  %v1319_v2 = vadd.f32 %v1318_v50, %v244_v37 }
  0x3f   :  { %v120_v45 = vld [vmem:[#allocation2 + $0x308] sm:$0xff]  ;;  %v183_v46 = vld [vmem:[#allocation2 + $0x500] sm:$0xff]  ;;  %v245_v52 = vld [vmem:[#allocation2 + $0x6f0] sm:$0xff]  ;;  %v1136_v8 = vadd.f32 %v1135_v56, %v119_v44  ;;  %v1063_v22 = vadd.f32 %v1062_v6, %v57_v42  ;;  %v1100_v23 = vadd.f32 %v1099_v7, %v58_v43 }
  0x40   :  { %v184_v51 = vld [vmem:[#allocation2 + $0x508] sm:$0xff]  ;;  %v246_v53 = vld [vmem:[#allocation2 + $0x6f8] sm:$0xff]  ;;  %v59_v58 = vld [vmem:[#allocation2 + $0x120] sm:$0xff]  ;;  %v1173_v9 = vadd.f32 %v1172_v57, %v120_v45  ;;  %v1210_v15 = vadd.f32 %v1209_v63, %v183_v46  ;;  %v1283_v17 = vadd.f32 %v1282_v1, %v245_v52 }
  0x41   :  { %v60_v59 = vld [vmem:[#allocation2 + $0x128] sm:$0xff]  ;;  %v121_v60 = vld [vmem:[#allocation2 + $0x310] sm:$0xff]  ;;  %v122_v61 = vld [vmem:[#allocation2 + $0x318] sm:$0xff]  ;;  %v1247_v16 = vadd.f32 %v1246_v0, %v184_v51  ;;  %v1320_v18 = vadd.f32 %v1319_v2, %v246_v53  ;;  %v1064_v38 = vadd.f32 %v1063_v22, %v59_v58 }
  0x42   :  { %v185_v62 = vld [vmem:[#allocation2 + $0x510] sm:$0xff]  ;;  %v186_v3 = vld [vmem:[#allocation2 + $0x518] sm:$0xff]  ;;  %v247_v4 = vld [vmem:[#allocation2 + $0x700] sm:$0xff]  ;;  %v1137_v24 = vadd.f32 %v1136_v8, %v121_v60  ;;  %v1174_v25 = vadd.f32 %v1173_v9, %v122_v61  ;;  %v1101_v39 = vadd.f32 %v1100_v23, %v60_v59 }
  0x43   :  { %v248_v5 = vld [vmem:[#allocation2 + $0x708] sm:$0xff]  ;;  %v61_v10 = vld [vmem:[#allocation2 + $0x130] sm:$0xff]  ;;  %v62_v11 = vld [vmem:[#allocation2 + $0x138] sm:$0xff]  ;;  %v1211_v31 = vadd.f32 %v1210_v15, %v185_v62  ;;  %v1248_v32 = vadd.f32 %v1247_v16, %v186_v3  ;;  %v1284_v33 = vadd.f32 %v1283_v17, %v247_v4 }
  0x44   :  { %v123_v12 = vld [vmem:[#allocation2 + $0x320] sm:$0xff]  ;;  %v124_v13 = vld [vmem:[#allocation2 + $0x328] sm:$0xff]  ;;  %v249_v20 = vld [vmem:[#allocation2 + $0x710] sm:$0xff]  ;;  %v1321_v34 = vadd.f32 %v1320_v18, %v248_v5  ;;  %v1065_v54 = vadd.f32 %v1064_v38, %v61_v10  ;;  %v1102_v55 = vadd.f32 %v1101_v39, %v62_v11 }
  0x45   :  { %v187_v14 = vld [vmem:[#allocation2 + $0x520] sm:$0xff]  ;;  %v188_v19 = vld [vmem:[#allocation2 + $0x528] sm:$0xff]  ;;  %v250_v21 = vld [vmem:[#allocation2 + $0x718] sm:$0xff]  ;;  %v1138_v40 = vadd.f32 %v1137_v24, %v123_v12  ;;  %v1175_v41 = vadd.f32 %v1174_v25, %v124_v13  ;;  %v1285_v49 = vadd.f32 %v1284_v33, %v249_v20 }
  0x46   :  { %v63_v26 = vld [vmem:[#allocation2 + $0x140] sm:$0xff]  ;;  %v64_v27 = vld [vmem:[#allocation2 + $0x148] sm:$0xff]  ;;  %v125_v28 = vld [vmem:[#allocation2 + $0x330] sm:$0xff]  ;;  %v1212_v47 = vadd.f32 %v1211_v31, %v187_v14  ;;  %v1249_v48 = vadd.f32 %v1248_v32, %v188_v19  ;;  %v1322_v50 = vadd.f32 %v1321_v34, %v250_v21 }
  0x47   :  { %v126_v29 = vld [vmem:[#allocation2 + $0x338] sm:$0xff]  ;;  %v189_v30 = vld [vmem:[#allocation2 + $0x530] sm:$0xff]  ;;  %v251_v36 = vld [vmem:[#allocation2 + $0x720] sm:$0xff]  ;;  %v1139_v56 = vadd.f32 %v1138_v40, %v125_v28  ;;  %v1066_v6 = vadd.f32 %v1065_v54, %v63_v26  ;;  %v1103_v7 = vadd.f32 %v1102_v55, %v64_v27 }
  0x48   :  { %v190_v35 = vld [vmem:[#allocation2 + $0x538] sm:$0xff]  ;;  %v252_v37 = vld [vmem:[#allocation2 + $0x728] sm:$0xff]  ;;  %v65_v42 = vld [vmem:[#allocation2 + $0x150] sm:$0xff]  ;;  %v1176_v57 = vadd.f32 %v1175_v41, %v126_v29  ;;  %v1213_v63 = vadd.f32 %v1212_v47, %v189_v30  ;;  %v1286_v1 = vadd.f32 %v1285_v49, %v251_v36 }
  0x49   :  { %v66_v43 = vld [vmem:[#allocation2 + $0x158] sm:$0xff]  ;;  %v127_v44 = vld [vmem:[#allocation2 + $0x340] sm:$0xff]  ;;  %v128_v45 = vld [vmem:[#allocation2 + $0x348] sm:$0xff]  ;;  %v1250_v0 = vadd.f32 %v1249_v48, %v190_v35  ;;  %v1323_v2 = vadd.f32 %v1322_v50, %v252_v37  ;;  %v1067_v22 = vadd.f32 %v1066_v6, %v65_v42 }
  0x4a   :  { %v191_v46 = vld [vmem:[#allocation2 + $0x540] sm:$0xff]  ;;  %v192_v51 = vld [vmem:[#allocation2 + $0x548] sm:$0xff]  ;;  %v253_v52 = vld [vmem:[#allocation2 + $0x730] sm:$0xff]  ;;  %v1140_v8 = vadd.f32 %v1139_v56, %v127_v44  ;;  %v1177_v9 = vadd.f32 %v1176_v57, %v128_v45  ;;  %v1104_v23 = vadd.f32 %v1103_v7, %v66_v43 }
  0x4b   :  { %v254_v53 = vld [vmem:[#allocation2 + $0x738] sm:$0xff]  ;;  %v67_v58 = vld [vmem:[#allocation2 + $0x160] sm:$0xff]  ;;  %v68_v59 = vld [vmem:[#allocation2 + $0x168] sm:$0xff]  ;;  %v1214_v15 = vadd.f32 %v1213_v63, %v191_v46  ;;  %v1251_v16 = vadd.f32 %v1250_v0, %v192_v51  ;;  %v1287_v17 = vadd.f32 %v1286_v1, %v253_v52 }
  0x4c   :  { %v129_v60 = vld [vmem:[#allocation2 + $0x350] sm:$0xff]  ;;  %v130_v61 = vld [vmem:[#allocation2 + $0x358] sm:$0xff]  ;;  %v255_v4 = vld [vmem:[#allocation2 + $0x740] sm:$0xff]  ;;  %v1324_v18 = vadd.f32 %v1323_v2, %v254_v53  ;;  %v1068_v38 = vadd.f32 %v1067_v22, %v67_v58  ;;  %v1105_v39 = vadd.f32 %v1104_v23, %v68_v59 }
  0x4d   :  { %v193_v62 = vld [vmem:[#allocation2 + $0x550] sm:$0xff]  ;;  %v194_v3 = vld [vmem:[#allocation2 + $0x558] sm:$0xff]  ;;  %v256_v5 = vld [vmem:[#allocation2 + $0x748] sm:$0xff]  ;;  %v1141_v24 = vadd.f32 %v1140_v8, %v129_v60  ;;  %v1178_v25 = vadd.f32 %v1177_v9, %v130_v61  ;;  %v1288_v33 = vadd.f32 %v1287_v17, %v255_v4 }
  0x4e   :  { %v69_v10 = vld [vmem:[#allocation2 + $0x170] sm:$0xff]  ;;  %v70_v11 = vld [vmem:[#allocation2 + $0x178] sm:$0xff]  ;;  %v131_v12 = vld [vmem:[#allocation2 + $0x360] sm:$0xff]  ;;  %v1215_v31 = vadd.f32 %v1214_v15, %v193_v62  ;;  %v1252_v32 = vadd.f32 %v1251_v16, %v194_v3  ;;  %v1325_v34 = vadd.f32 %v1324_v18, %v256_v5 }
  0x4f   :  { %v132_v13 = vld [vmem:[#allocation2 + $0x368] sm:$0xff]  ;;  %v195_v14 = vld [vmem:[#allocation2 + $0x560] sm:$0xff]  ;;  %v257_v20 = vld [vmem:[#allocation2 + $0x750] sm:$0xff]  ;;  %v1142_v40 = vadd.f32 %v1141_v24, %v131_v12  ;;  %v1069_v54 = vadd.f32 %v1068_v38, %v69_v10  ;;  %v1106_v55 = vadd.f32 %v1105_v39, %v70_v11 }
  0x50   :  { %v196_v19 = vld [vmem:[#allocation2 + $0x568] sm:$0xff]  ;;  %v258_v21 = vld [vmem:[#allocation2 + $0x758] sm:$0xff]  ;;  %v71_v26 = vld [vmem:[#allocation2 + $0x180] sm:$0xff]  ;;  %v1179_v41 = vadd.f32 %v1178_v25, %v132_v13  ;;  %v1216_v47 = vadd.f32 %v1215_v31, %v195_v14  ;;  %v1289_v49 = vadd.f32 %v1288_v33, %v257_v20 }
  0x51   :  { %v72_v27 = vld [vmem:[#allocation2 + $0x188] sm:$0xff]  ;;  %v133_v28 = vld [vmem:[#allocation2 + $0x370] sm:$0xff]  ;;  %v134_v29 = vld [vmem:[#allocation2 + $0x378] sm:$0xff]  ;;  %v1253_v48 = vadd.f32 %v1252_v32, %v196_v19  ;;  %v1326_v50 = vadd.f32 %v1325_v34, %v258_v21  ;;  %v1070_v6 = vadd.f32 %v1069_v54, %v71_v26 }
  0x52   :  { %v197_v30 = vld [vmem:[#allocation2 + $0x570] sm:$0xff]  ;;  %v198_v35 = vld [vmem:[#allocation2 + $0x578] sm:$0xff]  ;;  %v259_v36 = vld [vmem:[#allocation2 + $0x760] sm:$0xff]  ;;  %v1143_v56 = vadd.f32 %v1142_v40, %v133_v28  ;;  %v1180_v57 = vadd.f32 %v1179_v41, %v134_v29  ;;  %v1107_v7 = vadd.f32 %v1106_v55, %v72_v27 }
  0x53   :  { %v260_v37 = vld [vmem:[#allocation2 + $0x768] sm:$0xff]  ;;  %v73_v42 = vld [vmem:[#allocation2 + $0x190] sm:$0xff]  ;;  %v74_v43 = vld [vmem:[#allocation2 + $0x198] sm:$0xff]  ;;  %v1217_v63 = vadd.f32 %v1216_v47, %v197_v30  ;;  %v1254_v0 = vadd.f32 %v1253_v48, %v198_v35  ;;  %v1290_v1 = vadd.f32 %v1289_v49, %v259_v36 }
  0x54   :  { %v135_v44 = vld [vmem:[#allocation2 + $0x380] sm:$0xff]  ;;  %v136_v45 = vld [vmem:[#allocation2 + $0x388] sm:$0xff]  ;;  %v261_v52 = vld [vmem:[#allocation2 + $0x770] sm:$0xff]  ;;  %v1327_v2 = vadd.f32 %v1326_v50, %v260_v37  ;;  %v1071_v22 = vadd.f32 %v1070_v6, %v73_v42  ;;  %v1108_v23 = vadd.f32 %v1107_v7, %v74_v43 }
  0x55   :  { %v199_v46 = vld [vmem:[#allocation2 + $0x580] sm:$0xff]  ;;  %v200_v51 = vld [vmem:[#allocation2 + $0x588] sm:$0xff]  ;;  %v262_v53 = vld [vmem:[#allocation2 + $0x778] sm:$0xff]  ;;  %v1144_v8 = vadd.f32 %v1143_v56, %v135_v44  ;;  %v1181_v9 = vadd.f32 %v1180_v57, %v136_v45  ;;  %v1291_v17 = vadd.f32 %v1290_v1, %v261_v52 }
  0x56   :  { %v75_v58 = vld [vmem:[#allocation2 + $0x1a0] sm:$0xff]  ;;  %v76_v59 = vld [vmem:[#allocation2 + $0x1a8] sm:$0xff]  ;;  %v137_v60 = vld [vmem:[#allocation2 + $0x390] sm:$0xff]  ;;  %v1218_v15 = vadd.f32 %v1217_v63, %v199_v46  ;;  %v1255_v16 = vadd.f32 %v1254_v0, %v200_v51  ;;  %v1328_v18 = vadd.f32 %v1327_v2, %v262_v53 }
  0x57   :  { %v138_v61 = vld [vmem:[#allocation2 + $0x398] sm:$0xff]  ;;  %v201_v62 = vld [vmem:[#allocation2 + $0x590] sm:$0xff]  ;;  %v263_v4 = vld [vmem:[#allocation2 + $0x780] sm:$0xff]  ;;  %v1145_v24 = vadd.f32 %v1144_v8, %v137_v60  ;;  %v1072_v38 = vadd.f32 %v1071_v22, %v75_v58  ;;  %v1109_v39 = vadd.f32 %v1108_v23, %v76_v59 }
  0x58   :  { %v202_v3 = vld [vmem:[#allocation2 + $0x598] sm:$0xff]  ;;  %v264_v5 = vld [vmem:[#allocation2 + $0x788] sm:$0xff]  ;;  %v77_v10 = vld [vmem:[#allocation2 + $0x1b0] sm:$0xff]  ;;  %v1182_v25 = vadd.f32 %v1181_v9, %v138_v61  ;;  %v1219_v31 = vadd.f32 %v1218_v15, %v201_v62  ;;  %v1292_v33 = vadd.f32 %v1291_v17, %v263_v4 }
  0x59   :  { %v78_v11 = vld [vmem:[#allocation2 + $0x1b8] sm:$0xff]  ;;  %v139_v12 = vld [vmem:[#allocation2 + $0x3a0] sm:$0xff]  ;;  %v140_v13 = vld [vmem:[#allocation2 + $0x3a8] sm:$0xff]  ;;  %v1256_v32 = vadd.f32 %v1255_v16, %v202_v3  ;;  %v1329_v34 = vadd.f32 %v1328_v18, %v264_v5  ;;  %v1073_v54 = vadd.f32 %v1072_v38, %v77_v10 }
  0x5a   :  { %v203_v14 = vld [vmem:[#allocation2 + $0x5a0] sm:$0xff]  ;;  %v204_v19 = vld [vmem:[#allocation2 + $0x5a8] sm:$0xff]  ;;  %v265_v20 = vld [vmem:[#allocation2 + $0x790] sm:$0xff]  ;;  %v1146_v40 = vadd.f32 %v1145_v24, %v139_v12  ;;  %v1183_v41 = vadd.f32 %v1182_v25, %v140_v13  ;;  %v1110_v55 = vadd.f32 %v1109_v39, %v78_v11 }
  0x5b   :  { %v266_v21 = vld [vmem:[#allocation2 + $0x798] sm:$0xff]  ;;  %v79_v26 = vld [vmem:[#allocation2 + $0x1c0] sm:$0xff]  ;;  %v80_v27 = vld [vmem:[#allocation2 + $0x1c8] sm:$0xff]  ;;  %v1220_v47 = vadd.f32 %v1219_v31, %v203_v14  ;;  %v1257_v48 = vadd.f32 %v1256_v32, %v204_v19  ;;  %v1293_v49 = vadd.f32 %v1292_v33, %v265_v20 }
  0x5c   :  { %v141_v28 = vld [vmem:[#allocation2 + $0x3b0] sm:$0xff]  ;;  %v142_v29 = vld [vmem:[#allocation2 + $0x3b8] sm:$0xff]  ;;  %v267_v36 = vld [vmem:[#allocation2 + $0x7a0] sm:$0xff]  ;;  %v1330_v50 = vadd.f32 %v1329_v34, %v266_v21  ;;  %v1074_v6 = vadd.f32 %v1073_v54, %v79_v26  ;;  %v1111_v7 = vadd.f32 %v1110_v55, %v80_v27 }
  0x5d   :  { %v205_v30 = vld [vmem:[#allocation2 + $0x5b0] sm:$0xff]  ;;  %v206_v35 = vld [vmem:[#allocation2 + $0x5b8] sm:$0xff]  ;;  %v268_v37 = vld [vmem:[#allocation2 + $0x7a8] sm:$0xff]  ;;  %v1147_v56 = vadd.f32 %v1146_v40, %v141_v28  ;;  %v1184_v57 = vadd.f32 %v1183_v41, %v142_v29  ;;  %v1294_v1 = vadd.f32 %v1293_v49, %v267_v36 }
  0x5e   :  { %v81_v42 = vld [vmem:[#allocation2 + $0x1d0] sm:$0xff]  ;;  %v82_v43 = vld [vmem:[#allocation2 + $0x1d8] sm:$0xff]  ;;  %v143_v44 = vld [vmem:[#allocation2 + $0x3c0] sm:$0xff]  ;;  %v1221_v63 = vadd.f32 %v1220_v47, %v205_v30  ;;  %v1258_v0 = vadd.f32 %v1257_v48, %v206_v35  ;;  %v1331_v2 = vadd.f32 %v1330_v50, %v268_v37 }
  0x5f   :  { %v144_v45 = vld [vmem:[#allocation2 + $0x3c8] sm:$0xff]  ;;  %v207_v46 = vld [vmem:[#allocation2 + $0x5c0] sm:$0xff]  ;;  %v269_v52 = vld [vmem:[#allocation2 + $0x7b0] sm:$0xff]  ;;  %v1148_v8 = vadd.f32 %v1147_v56, %v143_v44  ;;  %v1075_v22 = vadd.f32 %v1074_v6, %v81_v42  ;;  %v1112_v23 = vadd.f32 %v1111_v7, %v82_v43 }
  0x60   :  { %v208_v51 = vld [vmem:[#allocation2 + $0x5c8] sm:$0xff]  ;;  %v270_v53 = vld [vmem:[#allocation2 + $0x7b8] sm:$0xff]  ;;  %v83_v58 = vld [vmem:[#allocation2 + $0x1e0] sm:$0xff]  ;;  %v1185_v9 = vadd.f32 %v1184_v57, %v144_v45  ;;  %v1222_v15 = vadd.f32 %v1221_v63, %v207_v46  ;;  %v1295_v17 = vadd.f32 %v1294_v1, %v269_v52 }
  0x61   :  { %v84_v59 = vld [vmem:[#allocation2 + $0x1e8] sm:$0xff]  ;;  %v145_v60 = vld [vmem:[#allocation2 + $0x3d0] sm:$0xff]  ;;  %v146_v61 = vld [vmem:[#allocation2 + $0x3d8] sm:$0xff]  ;;  %v1259_v16 = vadd.f32 %v1258_v0, %v208_v51  ;;  %v1332_v18 = vadd.f32 %v1331_v2, %v270_v53  ;;  %v1076_v36 = vadd.f32 %v1075_v22, %v83_v58 }
  0x62   :  { %v209_v62 = vld [vmem:[#allocation2 + $0x5d0] sm:$0xff]  ;;  %v210_v3 = vld [vmem:[#allocation2 + $0x5d8] sm:$0xff]  ;;  %v271_v4 = vld [vmem:[#allocation2 + $0x7c0] sm:$0xff]  ;;  %v1149_v24 = vadd.f32 %v1148_v8, %v145_v60  ;;  %v1186_v25 = vadd.f32 %v1185_v9, %v146_v61  ;;  %v1113_v37 = vadd.f32 %v1112_v23, %v84_v59 }
  0x63   :  { %v272_v5 = vld [vmem:[#allocation2 + $0x7c8] sm:$0xff]  ;;  %v85_v10 = vld [vmem:[#allocation2 + $0x1f0] sm:$0xff]  ;;  %v86_v11 = vld [vmem:[#allocation2 + $0x1f8] sm:$0xff]  ;;  %v1223_v29 = vadd.f32 %v1222_v15, %v209_v62  ;;  %v1260_v30 = vadd.f32 %v1259_v16, %v210_v3  ;;  %v1296_v31 = vadd.f32 %v1295_v17, %v271_v4 }
  0x64   :  { %v147_v12 = vld [vmem:[#allocation2 + $0x3e0] sm:$0xff]  ;;  %v148_v13 = vld [vmem:[#allocation2 + $0x3e8] sm:$0xff]  ;;  %v273_v20 = vld [vmem:[#allocation2 + $0x7d0] sm:$0xff]  ;;  %v1333_v32 = vadd.f32 %v1332_v18, %v272_v5  ;;  %v1077_v47 = vadd.f32 %v1076_v36, %v85_v10  ;;  %v1114_v48 = vadd.f32 %v1113_v37, %v86_v11 }
  0x65   :  { %v211_v14 = vld [vmem:[#allocation2 + $0x5e0] sm:$0xff]  ;;  %v212_v19 = vld [vmem:[#allocation2 + $0x5e8] sm:$0xff]  ;;  %v274_v21 = vld [vmem:[#allocation2 + $0x7d8] sm:$0xff]  ;;  %v1150_v38 = vadd.f32 %v1149_v24, %v147_v12  ;;  %v1187_v39 = vadd.f32 %v1186_v25, %v148_v13  ;;  %v1297_v44 = vadd.f32 %v1296_v31, %v273_v20 }
  0x66   :  { %v149_v26 = vld [vmem:[#allocation2 + $0x3f0] sm:$0xff]  ;;  %v150_v27 = vld [vmem:[#allocation2 + $0x3f8] sm:$0xff]  ;;  %v275_v34 = vld [vmem:[#allocation2 + $0x7e0] sm:$0xff]  ;;  %v1224_v42 = vadd.f32 %v1223_v29, %v211_v14  ;;  %v1261_v43 = vadd.f32 %v1260_v30, %v212_v19  ;;  %v1334_v45 = vadd.f32 %v1333_v32, %v274_v21  ;;  %v1078_v56 = vrot.slane %v1077_v47, 4 }
  0x67   :  { %v213_v28 = vld [vmem:[#allocation2 + $0x5f0] sm:$0xff]  ;;  %v214_v33 = vld [vmem:[#allocation2 + $0x5f8] sm:$0xff]  ;;  %v276_v35 = vld [vmem:[#allocation2 + $0x7e8] sm:$0xff]  ;;  %v1151_v49 = vadd.f32 %v1150_v38, %v149_v26  ;;  %v1188_v50 = vadd.f32 %v1187_v39, %v150_v27  ;;  %v1298_v54 = vadd.f32 %v1297_v44, %v275_v34  ;;  %v1115_v57 = vrot.slane %v1114_v48, 4 }
  0x68   :  { %v279_v40 = vld [vmem:[#allocation2 + $0x800] sm:$0xff]  ;;  %v281_v41 = vld [vmem:[#allocation2 + $0x810] sm:$0xff]  ;;  %v278_v51 = vld [vmem:[#allocation2 + $0x7f8] sm:$0xff]  ;;  %v1225_v52 = vadd.f32 %v1224_v42, %v213_v28  ;;  %v1262_v53 = vadd.f32 %v1261_v43, %v214_v33  ;;  %v1335_v55 = vadd.f32 %v1334_v45, %v276_v35  ;;  %v1079_v1 = vadd.f32 %v1078_v56, %v1077_v47 }
  0x69   :  { %v277_v46 = vld [vmem:[#allocation2 + $0x7f0] sm:$0xff]  ;;  %v1152_v58 = vrot.slane %v1151_v49, 4  ;;  %v1343_v59 = vadd.f32 %v281_v41, %v279_v40  ;;  %v283_v60 = vld [vmem:[#allocation2 + $0x820] sm:$0xff]  ;;  %v1189_v61 = vrot.slane %v1188_v50, 4  ;;  %v1116_v2 = vadd.f32 %v1115_v57, %v1114_v48  ;;  %v280_v21 = vld [vmem:[#allocation2 + $0x808] sm:$0xff] }
  0x6a   :  { %v1226_v62 = vrot.slane %v1225_v52, 4  ;;  %v1263_v63 = vrot.slane %v1262_v53, 4  ;;  %v1299_v0 = vadd.f32 %v1298_v54, %v277_v46  ;;  %v1336_v4 = vadd.f32 %v1335_v55, %v278_v51  ;;  %v282_v22 = vld [vmem:[#allocation2 + $0x818] sm:$0xff]  ;;  %v535_v23 = vld [vmem:[#allocation2 + $0x1000] sm:$0xff]  ;;  %v537_v24 = vld [vmem:[#allocation2 + $0x1010] sm:$0xff] }
  0x6b   :  { %v1153_v3 = vadd.f32 %v1152_v58, %v1151_v49  ;;  %v1190_v5 = vadd.f32 %v1189_v61, %v1188_v50  ;;  %v1080_v9 = vrot.slane %v1079_v1, 2  ;;  %v1117_v10 = vrot.slane %v1116_v2, 2  ;;  %v285_v29 = vld [vmem:[#allocation2 + $0x830] sm:$0xff]  ;;  %v343_v30 = vld [vmem:[#allocation2 + $0xa00] sm:$0xff]  ;;  %v344_v31 = vld [vmem:[#allocation2 + $0xa08] sm:$0xff] }
  0x6c   :  { %v1227_v6 = vadd.f32 %v1226_v62, %v1225_v52  ;;  %v1264_v7 = vadd.f32 %v1263_v63, %v1262_v53  ;;  %v1300_v8 = vrot.slane %v1299_v0, 4  ;;  %v1344_v12 = vadd.f32 %v1343_v59, %v283_v60  ;;  %v284_v36 = vld [vmem:[#allocation2 + $0x828] sm:$0xff]  ;;  %v287_v37 = vld [vmem:[#allocation2 + $0x840] sm:$0xff]  ;;  %v345_v38 = vld [vmem:[#allocation2 + $0xa10] sm:$0xff] }
  0x6d   :  { %v1154_v11 = vrot.slane %v1153_v3, 2  ;;  %v1191_v13 = vrot.slane %v1190_v5, 2  ;;  %v1081_v17 = vadd.f32 %v1080_v9, %v1079_v1  ;;  %v1118_v18 = vadd.f32 %v1117_v10, %v1116_v2  ;;  %v346_v39 = vld [vmem:[#allocation2 + $0xa18] sm:$0xff]  ;;  %v407_v40 = vld [vmem:[#allocation2 + $0xc00] sm:$0xff]  ;;  %v408_v45 = vld [vmem:[#allocation2 + $0xc08] sm:$0xff] }
  0x6e   :  { %v1228_v14 = vrot.slane %v1227_v6, 2  ;;  %v1265_v15 = vrot.slane %v1264_v7, 2  ;;  %v1301_v16 = vadd.f32 %v1300_v8, %v1299_v0  ;;  %v1337_v20 = vrot.slane %v1336_v4, 4  ;;  %v409_v46 = vld [vmem:[#allocation2 + $0xc10] sm:$0xff]  ;;  %v410_v47 = vld [vmem:[#allocation2 + $0xc18] sm:$0xff]  ;;  %v347_v54 = vld [vmem:[#allocation2 + $0xa20] sm:$0xff] }
  0x6f   :  { %v1155_v19 = vadd.f32 %v1154_v11, %v1153_v3  ;;  %v1192_v25 = vadd.f32 %v1191_v13, %v1190_v5  ;;  %v1082_v32 = vrot.slane %v1081_v17, 1  ;;  %v1119_v33 = vrot.slane %v1118_v18, 1  ;;  %v286_v52 = vld [vmem:[#allocation2 + $0x838] sm:$0xff]  ;;  %v289_v53 = vld [vmem:[#allocation2 + $0x850] sm:$0xff]  ;;  %v348_v55 = vld [vmem:[#allocation2 + $0xa28] sm:$0xff] }
  0x70   :  { %v1229_v26 = vadd.f32 %v1228_v14, %v1227_v6  ;;  %v1266_v27 = vadd.f32 %v1265_v15, %v1264_v7  ;;  %v1302_v28 = vrot.slane %v1301_v16, 2  ;;  %v1338_v35 = vadd.f32 %v1337_v20, %v1336_v4  ;;  %v411_v56 = vld [vmem:[#allocation2 + $0xc20] sm:$0xff]  ;;  %v412_v61 = vld [vmem:[#allocation2 + $0xc28] sm:$0xff]  ;;  %v473_v63 = vld [vmem:[#allocation2 + $0xe10] sm:$0xff] }
  0x71   :  { %v1156_v34 = vrot.slane %v1155_v19, 1  ;;  %v1193_v41 = vrot.slane %v1192_v25, 1  ;;  %v2404_v48 = vadd.f32 %v1082_v32, %v1081_v17  ;;  %v2406_v49 = vadd.f32 %v1119_v33, %v1118_v18  ;;  %v471_v62 = vld [vmem:[#allocation2 + $0xe00] sm:$0xff]  ;;  %v288_v4 = vld [vmem:[#allocation2 + $0x848] sm:$0xff]  ;;  %v349_v6 = vld [vmem:[#allocation2 + $0xa30] sm:$0xff] }
  0x72   :  { %v1230_v42 = vrot.slane %v1229_v26, 1  ;;  %v1267_v43 = vrot.slane %v1266_v27, 1  ;;  %v1303_v44 = vadd.f32 %v1302_v28, %v1301_v16  ;;  %v1339_v50 = vrot.slane %v1338_v35, 2  ;;  %v291_v5 = vld [vmem:[#allocation2 + $0x860] sm:$0xff]  ;;  %v350_v7 = vld [vmem:[#allocation2 + $0xa38] sm:$0xff]  ;;  %v413_v14 = vld [vmem:[#allocation2 + $0xc30] sm:$0xff] }
  0x73   :  { %v2408_v51 = vadd.f32 %v537_v24, %v535_v23  ;;  %v2410_v57 = vadd.f32 %v1156_v34, %v1155_v19  ;;  %v2412_v58 = vadd.f32 %v1193_v41, %v1192_v25  ;;  %v1345_v1 = vadd.f32 %v1344_v12, %v285_v29  ;;  %v351_v8 = vld [vmem:[#allocation2 + $0xa40] sm:$0xff]  ;;  %v414_v15 = vld [vmem:[#allocation2 + $0xc38] sm:$0xff]  ;;  %v472_v23 = vld [vmem:[#allocation2 + $0xe08] sm:$0xff] }
  0x74   :  { %v2414_v59 = vadd.f32 %v1230_v42, %v1229_v26  ;;  %v1304_v60 = vrot.slane %v1303_v44, 1  ;;  %v2416_v0 = vadd.f32 %v1339_v50, %v1338_v35  ;;  %v1380_v2 = vadd.f32 %v282_v22, %v280_v21  ;;  %v475_v16 = vld [vmem:[#allocation2 + $0xe20] sm:$0xff]  ;;  %v290_v20 = vld [vmem:[#allocation2 + $0x858] sm:$0xff]  ;;  %v293_v21 = vld [vmem:[#allocation2 + $0x870] sm:$0xff] }
  0x75   :  { %v1417_v3 = vadd.f32 %v345_v38, %v343_v30  ;;  %v2418_v9 = vadd.f32 %v1267_v43, %v1266_v27  ;;  %v1454_v10 = vadd.f32 %v346_v39, %v344_v31  ;;  %v1491_v11 = vadd.f32 %v409_v46, %v407_v40  ;;  %v352_v22 = vld [vmem:[#allocation2 + $0xa48] sm:$0xff]  ;;  %v474_v24 = vld [vmem:[#allocation2 + $0xe18] sm:$0xff]  ;;  %v415_v29 = vld [vmem:[#allocation2 + $0xc40] sm:$0xff] }
  0x76   :  { %v1528_v13 = vadd.f32 %v410_v47, %v408_v45  ;;  %v2420_v17 = vadd.f32 %v1304_v60, %v1303_v44  ;;  %v1346_v18 = vadd.f32 %v1345_v1, %v287_v37  ;;  %v1381_v19 = vadd.f32 %v1380_v2, %v284_v36  ;;  %v416_v30 = vld [vmem:[#allocation2 + $0xc48] sm:$0xff]  ;;  %v477_v31 = vld [vmem:[#allocation2 + $0xe30] sm:$0xff]  ;;  %v295_v36 = vld [vmem:[#allocation2 + $0x880] sm:$0xff] }
  0x77   :  { %v1418_v12 = vadd.f32 %v1417_v3, %v347_v54  ;;  %v1455_v25 = vadd.f32 %v1454_v10, %v348_v55  ;;  %v1492_v26 = vadd.f32 %v1491_v11, %v411_v56  ;;  %v1565_v28 = vadd.f32 %v473_v63, %v471_v62  ;;  %v292_v37 = vld [vmem:[#allocation2 + $0x868] sm:$0xff]  ;;  %v353_v38 = vld [vmem:[#allocation2 + $0xa50] sm:$0xff]  ;;  %v354_v39 = vld [vmem:[#allocation2 + $0xa58] sm:$0xff] }
  0x78   :  { %v1529_v27 = vadd.f32 %v1528_v13, %v412_v61  ;;  %v1341_v32 = vrot.slane %v2416_v0, 1  ;;  %v1347_v33 = vadd.f32 %v1346_v18, %v289_v53  ;;  %v1382_v34 = vadd.f32 %v1381_v19, %v286_v52  ;;  %v476_v40 = vld [vmem:[#allocation2 + $0xe28] sm:$0xff]  ;;  %v417_v45 = vld [vmem:[#allocation2 + $0xc50] sm:$0xff]  ;;  %v418_v46 = vld [vmem:[#allocation2 + $0xc58] sm:$0xff] }
  0x79   :  { %v1419_v35 = vadd.f32 %v1418_v12, %v349_v6  ;;  %v1456_v41 = vadd.f32 %v1455_v25, %v350_v7  ;;  %v1493_v42 = vadd.f32 %v1492_v26, %v413_v14  ;;  %v1566_v44 = vadd.f32 %v1565_v28, %v475_v16  ;;  %v479_v47 = vld [vmem:[#allocation2 + $0xe40] sm:$0xff]  ;;  %v294_v60 = vld [vmem:[#allocation2 + $0x878] sm:$0xff]  ;;  %v297_v53 = vld [vmem:[#allocation2 + $0x890] sm:$0xff] }
  0x7a   :  { %v1530_v43 = vadd.f32 %v1529_v27, %v414_v15  ;;  %v1348_v50 = vadd.f32 %v1347_v33, %v291_v5  ;;  %v1383_v54 = vadd.f32 %v1382_v34, %v288_v4  ;;  %v1602_v56 = vadd.f32 %v474_v24, %v472_v23  ;;  %v355_v52 = vld [vmem:[#allocation2 + $0xa60] sm:$0xff]  ;;  %v356_v61 = vld [vmem:[#allocation2 + $0xa68] sm:$0xff]  ;;  %v478_v62 = vld [vmem:[#allocation2 + $0xe38] sm:$0xff] }
  0x7b   :  { %v1420_v55 = vadd.f32 %v1419_v35, %v351_v8  ;;  %v1457_v63 = vadd.f32 %v1456_v41, %v352_v22  ;;  %v1494_v1 = vadd.f32 %v1493_v42, %v415_v29  ;;  %v1567_v3 = vadd.f32 %v1566_v44, %v477_v31  ;;  %v419_v6 = vld [vmem:[#allocation2 + $0xc60] sm:$0xff]  ;;  %v420_v7 = vld [vmem:[#allocation2 + $0xc68] sm:$0xff]  ;;  %v481_v10 = vld [vmem:[#allocation2 + $0xe50] sm:$0xff] }
  0x7c   :  { %v1531_v2 = vadd.f32 %v1530_v43, %v416_v30  ;;  %v1349_v11 = vadd.f32 %v1348_v50, %v293_v21  ;;  %v1384_v13 = vadd.f32 %v1383_v54, %v290_v20  ;;  %v1603_v15 = vadd.f32 %v1602_v56, %v476_v40  ;;  %v296_v5 = vld [vmem:[#allocation2 + $0x888] sm:$0xff]  ;;  %v299_v4 = vld [vmem:[#allocation2 + $0x8a0] sm:$0xff]  ;;  %v357_v8 = vld [vmem:[#allocation2 + $0xa70] sm:$0xff] }
  0x7d   :  { %v1421_v14 = vadd.f32 %v1420_v55, %v353_v38  ;;  %v358_v16 = vld [vmem:[#allocation2 + $0xa78] sm:$0xff]  ;;  %v480_v18 = vld [vmem:[#allocation2 + $0xe48] sm:$0xff]  ;;  %v1458_v19 = vadd.f32 %v1457_v63, %v354_v39  ;;  %v1495_v12 = vadd.f32 %v1494_v1, %v417_v45  ;;  %v1568_v24 = vadd.f32 %v1567_v3, %v479_v47  ;;  %v421_v22 = vld [vmem:[#allocation2 + $0xc70] sm:$0xff] }
  0x7e   :  { %v1532_v23 = vadd.f32 %v1531_v2, %v418_v46  ;;  %v422_v25 = vld [vmem:[#allocation2 + $0xc78] sm:$0xff]  ;;  %v483_v26 = vld [vmem:[#allocation2 + $0xe60] sm:$0xff]  ;;  %v1350_v27 = vadd.f32 %v1349_v11, %v295_v36  ;;  %v1385_v28 = vadd.f32 %v1384_v13, %v292_v37  ;;  %v1604_v30 = vadd.f32 %v1603_v15, %v478_v62  ;;  %v301_v20 = vld [vmem:[#allocation2 + $0x8b0] sm:$0xff] }
  0x7f   :  { %v1422_v29 = vadd.f32 %v1421_v14, %v355_v52  ;;  %v298_v21 = vld [vmem:[#allocation2 + $0x898] sm:$0xff]  ;;  %v359_v31 = vld [vmem:[#allocation2 + $0xa80] sm:$0xff]  ;;  %v360_v33 = vld [vmem:[#allocation2 + $0xa88] sm:$0xff]  ;;  %v1459_v35 = vadd.f32 %v1458_v19, %v356_v61  ;;  %v1496_v38 = vadd.f32 %v1495_v12, %v419_v6  ;;  %v1569_v41 = vadd.f32 %v1568_v24, %v481_v10 }
  0x80   :  { %v482_v34 = vld [vmem:[#allocation2 + $0xe58] sm:$0xff]  ;;  %v1533_v40 = vadd.f32 %v1532_v23, %v420_v7  ;;  %v423_v39 = vld [vmem:[#allocation2 + $0xc80] sm:$0xff]  ;;  %v424_v42 = vld [vmem:[#allocation2 + $0xc88] sm:$0xff]  ;;  %v1351_v44 = vadd.f32 %v1350_v27, %v297_v53  ;;  %v1386_v45 = vadd.f32 %v1385_v28, %v294_v60  ;;  %v1605_v47 = vadd.f32 %v1604_v30, %v480_v18 }
  0x81   :  { %v485_v43 = vld [vmem:[#allocation2 + $0xe70] sm:$0xff]  ;;  %v1423_v46 = vadd.f32 %v1422_v29, %v357_v8  ;;  %v300_v36 = vld [vmem:[#allocation2 + $0x8a8] sm:$0xff]  ;;  %v303_v37 = vld [vmem:[#allocation2 + $0x8c0] sm:$0xff]  ;;  %v1460_v56 = vadd.f32 %v1459_v35, %v358_v16  ;;  %v1497_v52 = vadd.f32 %v1496_v38, %v421_v22  ;;  %v1570_v63 = vadd.f32 %v1569_v41, %v483_v26 }
  0x82   :  { %v361_v50 = vld [vmem:[#allocation2 + $0xa90] sm:$0xff]  ;;  %v362_v54 = vld [vmem:[#allocation2 + $0xa98] sm:$0xff]  ;;  %v484_v55 = vld [vmem:[#allocation2 + $0xe68] sm:$0xff]  ;;  %v1534_v62 = vadd.f32 %v1533_v40, %v422_v25  ;;  %v1352_v3 = vadd.f32 %v1351_v44, %v299_v4  ;;  %v1387_v6 = vadd.f32 %v1386_v45, %v296_v5  ;;  %v1606_v10 = vadd.f32 %v1605_v47, %v482_v34 }
  0x83   :  { %v425_v61 = vld [vmem:[#allocation2 + $0xc90] sm:$0xff]  ;;  %v426_v1 = vld [vmem:[#allocation2 + $0xc98] sm:$0xff]  ;;  %v487_v2 = vld [vmem:[#allocation2 + $0xe80] sm:$0xff]  ;;  %v1424_v7 = vadd.f32 %v1423_v46, %v359_v31  ;;  %v1461_v15 = vadd.f32 %v1460_v56, %v360_v33  ;;  %v1498_v8 = vadd.f32 %v1497_v52, %v423_v39  ;;  %v1571_v19 = vadd.f32 %v1570_v63, %v485_v43 }
  0x84   :  { %v302_v53 = vld [vmem:[#allocation2 + $0x8b8] sm:$0xff]  ;;  %v305_v60 = vld [vmem:[#allocation2 + $0x8d0] sm:$0xff]  ;;  %v363_v11 = vld [vmem:[#allocation2 + $0xaa0] sm:$0xff]  ;;  %v1535_v18 = vadd.f32 %v1534_v62, %v424_v42  ;;  %v1353_v24 = vadd.f32 %v1352_v3, %v301_v20  ;;  %v1388_v22 = vadd.f32 %v1387_v6, %v298_v21  ;;  %v1607_v26 = vadd.f32 %v1606_v10, %v484_v55 }
  0x85   :  { %v364_v13 = vld [vmem:[#allocation2 + $0xaa8] sm:$0xff]  ;;  %v486_v14 = vld [vmem:[#allocation2 + $0xe78] sm:$0xff]  ;;  %v427_v16 = vld [vmem:[#allocation2 + $0xca0] sm:$0xff]  ;;  %v1425_v25 = vadd.f32 %v1424_v7, %v361_v50  ;;  %v1462_v30 = vadd.f32 %v1461_v15, %v362_v54  ;;  %v1499_v31 = vadd.f32 %v1498_v8, %v425_v61  ;;  %v1572_v35 = vadd.f32 %v1571_v19, %v487_v2 }
  0x86   :  { %v428_v12 = vld [vmem:[#allocation2 + $0xca8] sm:$0xff]  ;;  %v489_v23 = vld [vmem:[#allocation2 + $0xe90] sm:$0xff]  ;;  %v307_v5 = vld [vmem:[#allocation2 + $0x8e0] sm:$0xff]  ;;  %v1536_v34 = vadd.f32 %v1535_v18, %v426_v1  ;;  %v1354_v41 = vadd.f32 %v1353_v24, %v303_v37  ;;  %v1389_v39 = vadd.f32 %v1388_v22, %v300_v36  ;;  %v1608_v43 = vadd.f32 %v1607_v26, %v486_v14 }
  0x87   :  { %v304_v4 = vld [vmem:[#allocation2 + $0x8c8] sm:$0xff]  ;;  %v365_v27 = vld [vmem:[#allocation2 + $0xab0] sm:$0xff]  ;;  %v366_v28 = vld [vmem:[#allocation2 + $0xab8] sm:$0xff]  ;;  %v1426_v42 = vadd.f32 %v1425_v25, %v363_v11  ;;  %v1463_v47 = vadd.f32 %v1462_v30, %v364_v13  ;;  %v1500_v50 = vadd.f32 %v1499_v31, %v427_v16  ;;  %v1573_v56 = vadd.f32 %v1572_v35, %v489_v23 }
  0x88   :  { %v488_v29 = vld [vmem:[#allocation2 + $0xe88] sm:$0xff]  ;;  %v429_v33 = vld [vmem:[#allocation2 + $0xcb0] sm:$0xff]  ;;  %v430_v38 = vld [vmem:[#allocation2 + $0xcb8] sm:$0xff]  ;;  %v1537_v55 = vadd.f32 %v1536_v34, %v428_v12  ;;  %v1355_v63 = vadd.f32 %v1354_v41, %v305_v60  ;;  %v1390_v61 = vadd.f32 %v1389_v39, %v302_v53 }
  0x89   :  { %v491_v40 = vld [vmem:[#allocation2 + $0xea0] sm:$0xff]  ;;  %v306_v20 = vld [vmem:[#allocation2 + $0x8d8] sm:$0xff]  ;;  %v309_v21 = vld [vmem:[#allocation2 + $0x8f0] sm:$0xff]  ;;  %v1427_v1 = vadd.f32 %v1426_v42, %v365_v27  ;;  %v1609_v2 = vadd.f32 %v1608_v43, %v488_v29  ;;  %v1464_v10 = vadd.f32 %v1463_v47, %v366_v28  ;;  %v1501_v11 = vadd.f32 %v1500_v50, %v429_v33 }
  0x8a   :  { %v367_v44 = vld [vmem:[#allocation2 + $0xac0] sm:$0xff]  ;;  %v368_v45 = vld [vmem:[#allocation2 + $0xac8] sm:$0xff]  ;;  %v490_v46 = vld [vmem:[#allocation2 + $0xe98] sm:$0xff]  ;;  %v1538_v14 = vadd.f32 %v1537_v55, %v430_v38  ;;  %v1574_v15 = vadd.f32 %v1573_v56, %v491_v40  ;;  %v1356_v19 = vadd.f32 %v1355_v63, %v307_v5  ;;  %v1391_v16 = vadd.f32 %v1390_v61, %v304_v4 }
  0x8b   :  { %v431_v54 = vld [vmem:[#allocation2 + $0xcc0] sm:$0xff]  ;;  %v432_v52 = vld [vmem:[#allocation2 + $0xcc8] sm:$0xff]  ;;  %v493_v62 = vld [vmem:[#allocation2 + $0xeb0] sm:$0xff]  ;;  %v1428_v12 = vadd.f32 %v1427_v1, %v367_v44  ;;  %v1610_v23 = vadd.f32 %v1609_v2, %v490_v46  ;;  %v1465_v26 = vadd.f32 %v1464_v10, %v368_v45 }
  0x8c   :  { %v308_v37 = vld [vmem:[#allocation2 + $0x8e8] sm:$0xff]  ;;  %v311_v36 = vld [vmem:[#allocation2 + $0x900] sm:$0xff]  ;;  %v369_v3 = vld [vmem:[#allocation2 + $0xad0] sm:$0xff]  ;;  %v1502_v27 = vadd.f32 %v1501_v11, %v431_v54  ;;  %v1539_v29 = vadd.f32 %v1538_v14, %v432_v52  ;;  %v1575_v30 = vadd.f32 %v1574_v15, %v493_v62  ;;  %v1357_v35 = vadd.f32 %v1356_v19, %v309_v21 }
  0x8d   :  { %v370_v6 = vld [vmem:[#allocation2 + $0xad8] sm:$0xff]  ;;  %v492_v7 = vld [vmem:[#allocation2 + $0xea8] sm:$0xff]  ;;  %v433_v13 = vld [vmem:[#allocation2 + $0xcd0] sm:$0xff]  ;;  %v1392_v33 = vadd.f32 %v1391_v16, %v306_v20  ;;  %v1429_v38 = vadd.f32 %v1428_v12, %v369_v3 }
  0x8e   :  { %v434_v8 = vld [vmem:[#allocation2 + $0xcd8] sm:$0xff]  ;;  %v495_v18 = vld [vmem:[#allocation2 + $0xec0] sm:$0xff]  ;;  %v313_v53 = vld [vmem:[#allocation2 + $0x910] sm:$0xff]  ;;  %v1611_v40 = vadd.f32 %v1610_v23, %v492_v7  ;;  %v1466_v43 = vadd.f32 %v1465_v26, %v370_v6  ;;  %v1503_v44 = vadd.f32 %v1502_v27, %v433_v13  ;;  %v1358_v56 = vadd.f32 %v1357_v35, %v311_v36 }
  0x8f   :  { %v310_v60 = vld [vmem:[#allocation2 + $0x8f8] sm:$0xff]  ;;  %v371_v24 = vld [vmem:[#allocation2 + $0xae0] sm:$0xff]  ;;  %v372_v22 = vld [vmem:[#allocation2 + $0xae8] sm:$0xff]  ;;  %v1540_v46 = vadd.f32 %v1539_v29, %v434_v8  ;;  %v1576_v47 = vadd.f32 %v1575_v30, %v495_v18  ;;  %v1393_v54 = vadd.f32 %v1392_v33, %v308_v37 }
  0x90   :  { %v494_v25 = vld [vmem:[#allocation2 + $0xeb8] sm:$0xff]  ;;  %v435_v28 = vld [vmem:[#allocation2 + $0xce0] sm:$0xff]  ;;  %v436_v31 = vld [vmem:[#allocation2 + $0xce8] sm:$0xff]  ;;  %v1430_v52 = vadd.f32 %v1429_v38, %v371_v24  ;;  %v1467_v2 = vadd.f32 %v1466_v43, %v372_v22  ;;  %v1359_v15 = vadd.f32 %v1358_v56, %v313_v53 }
  0x91   :  { %v497_v34 = vld [vmem:[#allocation2 + $0xed0] sm:$0xff]  ;;  %v312_v5 = vld [vmem:[#allocation2 + $0x908] sm:$0xff]  ;;  %v315_v4 = vld [vmem:[#allocation2 + $0x920] sm:$0xff]  ;;  %v1612_v62 = vadd.f32 %v1611_v40, %v494_v25  ;;  %v1504_v3 = vadd.f32 %v1503_v44, %v435_v28  ;;  %v1541_v7 = vadd.f32 %v1540_v46, %v436_v31  ;;  %v1394_v13 = vadd.f32 %v1393_v54, %v310_v60 }
  0x92   :  { %v373_v41 = vld [vmem:[#allocation2 + $0xaf0] sm:$0xff]  ;;  %v374_v39 = vld [vmem:[#allocation2 + $0xaf8] sm:$0xff]  ;;  %v496_v42 = vld [vmem:[#allocation2 + $0xec8] sm:$0xff]  ;;  %v1577_v10 = vadd.f32 %v1576_v47, %v497_v34  ;;  %v1360_v30 = vadd.f32 %v1359_v15, %v315_v4 }
  0x93   :  { %v437_v45 = vld [vmem:[#allocation2 + $0xcf0] sm:$0xff]  ;;  %v438_v50 = vld [vmem:[#allocation2 + $0xcf8] sm:$0xff]  ;;  %v499_v55 = vld [vmem:[#allocation2 + $0xee0] sm:$0xff]  ;;  %v1431_v8 = vadd.f32 %v1430_v52, %v373_v41  ;;  %v1613_v18 = vadd.f32 %v1612_v62, %v496_v42  ;;  %v1468_v23 = vadd.f32 %v1467_v2, %v374_v39  ;;  %v1395_v28 = vadd.f32 %v1394_v13, %v312_v5 }
  0x94   :  { %v314_v21 = vld [vmem:[#allocation2 + $0x918] sm:$0xff]  ;;  %v317_v20 = vld [vmem:[#allocation2 + $0x930] sm:$0xff]  ;;  %v375_v63 = vld [vmem:[#allocation2 + $0xb00] sm:$0xff]  ;;  %v1505_v24 = vadd.f32 %v1504_v3, %v437_v45  ;;  %v1542_v25 = vadd.f32 %v1541_v7, %v438_v50  ;;  %v1578_v26 = vadd.f32 %v1577_v10, %v499_v55 }
  0x95   :  { %v376_v61 = vld [vmem:[#allocation2 + $0xb08] sm:$0xff]  ;;  %v498_v1 = vld [vmem:[#allocation2 + $0xed8] sm:$0xff]  ;;  %v439_v6 = vld [vmem:[#allocation2 + $0xd00] sm:$0xff]  ;;  %v1432_v31 = vadd.f32 %v1431_v8, %v375_v63  ;;  %v1361_v47 = vadd.f32 %v1360_v30, %v317_v20  ;;  %v1396_v45 = vadd.f32 %v1395_v28, %v314_v21 }
  0x96   :  { %v440_v11 = vld [vmem:[#allocation2 + $0xd08] sm:$0xff]  ;;  %v501_v14 = vld [vmem:[#allocation2 + $0xef0] sm:$0xff]  ;;  %v319_v37 = vld [vmem:[#allocation2 + $0x940] sm:$0xff]  ;;  %v1614_v34 = vadd.f32 %v1613_v18, %v498_v1  ;;  %v1469_v40 = vadd.f32 %v1468_v23, %v376_v61  ;;  %v1506_v41 = vadd.f32 %v1505_v24, %v439_v6 }
  0x97   :  { %v316_v36 = vld [vmem:[#allocation2 + $0x928] sm:$0xff]  ;;  %v377_v19 = vld [vmem:[#allocation2 + $0xb10] sm:$0xff]  ;;  %v378_v16 = vld [vmem:[#allocation2 + $0xb18] sm:$0xff]  ;;  %v1543_v42 = vadd.f32 %v1542_v25, %v440_v11  ;;  %v1579_v43 = vadd.f32 %v1578_v26, %v501_v14  ;;  %v1362_v10 = vadd.f32 %v1361_v47, %v319_v37 }
  0x98   :  { %v500_v12 = vld [vmem:[#allocation2 + $0xee8] sm:$0xff]  ;;  %v441_v22 = vld [vmem:[#allocation2 + $0xd10] sm:$0xff]  ;;  %v442_v27 = vld [vmem:[#allocation2 + $0xd18] sm:$0xff]  ;;  %v1433_v50 = vadd.f32 %v1432_v31, %v377_v19  ;;  %v1470_v62 = vadd.f32 %v1469_v40, %v378_v16  ;;  %v1397_v6 = vadd.f32 %v1396_v45, %v316_v36 }
  0x99   :  { %v503_v29 = vld [vmem:[#allocation2 + $0xf00] sm:$0xff]  ;;  %v318_v53 = vld [vmem:[#allocation2 + $0x938] sm:$0xff]  ;;  %v321_v60 = vld [vmem:[#allocation2 + $0x950] sm:$0xff]  ;;  %v1615_v55 = vadd.f32 %v1614_v34, %v500_v12  ;;  %v1507_v63 = vadd.f32 %v1506_v41, %v441_v22  ;;  %v1544_v1 = vadd.f32 %v1543_v42, %v442_v27 }
  0x9a   :  { %v379_v35 = vld [vmem:[#allocation2 + $0xb20] sm:$0xff]  ;;  %v380_v33 = vld [vmem:[#allocation2 + $0xb28] sm:$0xff]  ;;  %v502_v38 = vld [vmem:[#allocation2 + $0xef8] sm:$0xff]  ;;  %v1580_v2 = vadd.f32 %v1579_v43, %v503_v29  ;;  %v1363_v26 = vadd.f32 %v1362_v10, %v321_v60  ;;  %v1398_v22 = vadd.f32 %v1397_v6, %v318_v53 }
  0x9b   :  { %v443_v39 = vld [vmem:[#allocation2 + $0xd20] sm:$0xff]  ;;  %v444_v44 = vld [vmem:[#allocation2 + $0xd28] sm:$0xff]  ;;  %v505_v46 = vld [vmem:[#allocation2 + $0xf10] sm:$0xff]  ;;  %v1434_v11 = vadd.f32 %v1433_v50, %v379_v35  ;;  %v1616_v14 = vadd.f32 %v1615_v55, %v502_v38  ;;  %v1471_v18 = vadd.f32 %v1470_v62, %v380_v33 }
  0x9c   :  { %v320_v4 = vld [vmem:[#allocation2 + $0x948] sm:$0xff]  ;;  %v323_v5 = vld [vmem:[#allocation2 + $0x960] sm:$0xff]  ;;  %v381_v56 = vld [vmem:[#allocation2 + $0xb30] sm:$0xff]  ;;  %v1508_v19 = vadd.f32 %v1507_v63, %v443_v39  ;;  %v1545_v12 = vadd.f32 %v1544_v1, %v444_v44  ;;  %v1581_v23 = vadd.f32 %v1580_v2, %v505_v46 }
  0x9d   :  { %v382_v54 = vld [vmem:[#allocation2 + $0xb38] sm:$0xff]  ;;  %v504_v52 = vld [vmem:[#allocation2 + $0xf08] sm:$0xff]  ;;  %v445_v61 = vld [vmem:[#allocation2 + $0xd30] sm:$0xff]  ;;  %v1435_v27 = vadd.f32 %v1434_v11, %v381_v56  ;;  %v1364_v43 = vadd.f32 %v1363_v26, %v323_v5  ;;  %v1399_v39 = vadd.f32 %v1398_v22, %v320_v4 }
  0x9e   :  { %v446_v3 = vld [vmem:[#allocation2 + $0xd38] sm:$0xff]  ;;  %v507_v7 = vld [vmem:[#allocation2 + $0xf20] sm:$0xff]  ;;  %v325_v21 = vld [vmem:[#allocation2 + $0x970] sm:$0xff]  ;;  %v1617_v29 = vadd.f32 %v1616_v14, %v504_v52  ;;  %v1472_v34 = vadd.f32 %v1471_v18, %v382_v54  ;;  %v1509_v35 = vadd.f32 %v1508_v19, %v445_v61 }
  0x9f   :  { %v322_v20 = vld [vmem:[#allocation2 + $0x958] sm:$0xff]  ;;  %v383_v15 = vld [vmem:[#allocation2 + $0xb40] sm:$0xff]  ;;  %v384_v13 = vld [vmem:[#allocation2 + $0xb48] sm:$0xff]  ;;  %v1546_v38 = vadd.f32 %v1545_v12, %v446_v3  ;;  %v1582_v40 = vadd.f32 %v1581_v23, %v507_v7  ;;  %v1365_v2 = vadd.f32 %v1364_v43, %v325_v21 }
  0xa0   :  { %v506_v8 = vld [vmem:[#allocation2 + $0xf18] sm:$0xff]  ;;  %v447_v16 = vld [vmem:[#allocation2 + $0xd40] sm:$0xff]  ;;  %v448_v24 = vld [vmem:[#allocation2 + $0xd48] sm:$0xff]  ;;  %v1436_v44 = vadd.f32 %v1435_v27, %v383_v15  ;;  %v1473_v55 = vadd.f32 %v1472_v34, %v384_v13  ;;  %v1400_v61 = vadd.f32 %v1399_v39, %v322_v20 }
  0xa1   :  { %v509_v25 = vld [vmem:[#allocation2 + $0xf30] sm:$0xff]  ;;  %v324_v37 = vld [vmem:[#allocation2 + $0x968] sm:$0xff]  ;;  %v327_v36 = vld [vmem:[#allocation2 + $0x980] sm:$0xff]  ;;  %v1618_v46 = vadd.f32 %v1617_v29, %v506_v8  ;;  %v1510_v56 = vadd.f32 %v1509_v35, %v447_v16  ;;  %v1547_v52 = vadd.f32 %v1546_v38, %v448_v24 }
  0xa2   :  { %v385_v30 = vld [vmem:[#allocation2 + $0xb50] sm:$0xff]  ;;  %v386_v28 = vld [vmem:[#allocation2 + $0xb58] sm:$0xff]  ;;  %v508_v31 = vld [vmem:[#allocation2 + $0xf28] sm:$0xff]  ;;  %v1583_v62 = vadd.f32 %v1582_v40, %v509_v25  ;;  %v1366_v23 = vadd.f32 %v1365_v2, %v327_v36  ;;  %v1401_v16 = vadd.f32 %v1400_v61, %v324_v37 }
  0xa3   :  { %v449_v33 = vld [vmem:[#allocation2 + $0xd50] sm:$0xff]  ;;  %v450_v41 = vld [vmem:[#allocation2 + $0xd58] sm:$0xff]  ;;  %v511_v42 = vld [vmem:[#allocation2 + $0xf40] sm:$0xff]  ;;  %v1437_v3 = vadd.f32 %v1436_v44, %v385_v30  ;;  %v1619_v7 = vadd.f32 %v1618_v46, %v508_v31  ;;  %v1474_v14 = vadd.f32 %v1473_v55, %v386_v28 }
  0xa4   :  { %v326_v60 = vld [vmem:[#allocation2 + $0x978] sm:$0xff]  ;;  %v329_v53 = vld [vmem:[#allocation2 + $0x990] sm:$0xff]  ;;  %v387_v47 = vld [vmem:[#allocation2 + $0xb60] sm:$0xff]  ;;  %v1511_v15 = vadd.f32 %v1510_v56, %v449_v33  ;;  %v1548_v8 = vadd.f32 %v1547_v52, %v450_v41  ;;  %v1584_v18 = vadd.f32 %v1583_v62, %v511_v42 }
  0xa5   :  { %v388_v45 = vld [vmem:[#allocation2 + $0xb68] sm:$0xff]  ;;  %v510_v50 = vld [vmem:[#allocation2 + $0xf38] sm:$0xff]  ;;  %v451_v54 = vld [vmem:[#allocation2 + $0xd60] sm:$0xff]  ;;  %v1438_v24 = vadd.f32 %v1437_v3, %v387_v47  ;;  %v1367_v40 = vadd.f32 %v1366_v23, %v329_v53  ;;  %v1402_v33 = vadd.f32 %v1401_v16, %v326_v60 }
  0xa6   :  { %v452_v63 = vld [vmem:[#allocation2 + $0xd68] sm:$0xff]  ;;  %v513_v1 = vld [vmem:[#allocation2 + $0xf50] sm:$0xff]  ;;  %v331_v4 = vld [vmem:[#allocation2 + $0x9a0] sm:$0xff]  ;;  %v1620_v25 = vadd.f32 %v1619_v7, %v510_v50  ;;  %v1475_v29 = vadd.f32 %v1474_v14, %v388_v45  ;;  %v1512_v30 = vadd.f32 %v1511_v15, %v451_v54 }
  0xa7   :  { %v328_v5 = vld [vmem:[#allocation2 + $0x988] sm:$0xff]  ;;  %v389_v10 = vld [vmem:[#allocation2 + $0xb70] sm:$0xff]  ;;  %v390_v6 = vld [vmem:[#allocation2 + $0xb78] sm:$0xff]  ;;  %v1549_v31 = vadd.f32 %v1548_v8, %v452_v63  ;;  %v1585_v34 = vadd.f32 %v1584_v18, %v513_v1  ;;  %v1368_v62 = vadd.f32 %v1367_v40, %v331_v4 }
  0xa8   :  { %v512_v11 = vld [vmem:[#allocation2 + $0xf48] sm:$0xff]  ;;  %v453_v13 = vld [vmem:[#allocation2 + $0xd70] sm:$0xff]  ;;  %v454_v19 = vld [vmem:[#allocation2 + $0xd78] sm:$0xff]  ;;  %v1439_v41 = vadd.f32 %v1438_v24, %v389_v10  ;;  %v1476_v46 = vadd.f32 %v1475_v29, %v390_v6  ;;  %v1403_v54 = vadd.f32 %v1402_v33, %v328_v5 }
  0xa9   :  { %v515_v12 = vld [vmem:[#allocation2 + $0xf60] sm:$0xff]  ;;  %v330_v21 = vld [vmem:[#allocation2 + $0x998] sm:$0xff]  ;;  %v333_v20 = vld [vmem:[#allocation2 + $0x9b0] sm:$0xff]  ;;  %v1621_v42 = vadd.f32 %v1620_v25, %v512_v11  ;;  %v1513_v47 = vadd.f32 %v1512_v30, %v453_v13  ;;  %v1550_v50 = vadd.f32 %v1549_v31, %v454_v19 }
  0xaa   :  { %v391_v26 = vld [vmem:[#allocation2 + $0xb80] sm:$0xff]  ;;  %v392_v22 = vld [vmem:[#allocation2 + $0xb88] sm:$0xff]  ;;  %v514_v27 = vld [vmem:[#allocation2 + $0xf58] sm:$0xff]  ;;  %v1586_v55 = vadd.f32 %v1585_v34, %v515_v12  ;;  %v1369_v18 = vadd.f32 %v1368_v62, %v333_v20  ;;  %v1404_v13 = vadd.f32 %v1403_v54, %v330_v21 }
  0xab   :  { %v455_v28 = vld [vmem:[#allocation2 + $0xd80] sm:$0xff]  ;;  %v456_v35 = vld [vmem:[#allocation2 + $0xd88] sm:$0xff]  ;;  %v517_v38 = vld [vmem:[#allocation2 + $0xf70] sm:$0xff]  ;;  %v1440_v63 = vadd.f32 %v1439_v41, %v391_v26  ;;  %v1622_v1 = vadd.f32 %v1621_v42, %v514_v27  ;;  %v1477_v7 = vadd.f32 %v1476_v46, %v392_v22 }
  0xac   :  { %v332_v36 = vld [vmem:[#allocation2 + $0x9a8] sm:$0xff]  ;;  %v335_v37 = vld [vmem:[#allocation2 + $0x9c0] sm:$0xff]  ;;  %v393_v43 = vld [vmem:[#allocation2 + $0xb90] sm:$0xff]  ;;  %v1514_v10 = vadd.f32 %v1513_v47, %v455_v28  ;;  %v1551_v11 = vadd.f32 %v1550_v50, %v456_v35  ;;  %v1587_v14 = vadd.f32 %v1586_v55, %v517_v38 }
  0xad   :  { %v394_v39 = vld [vmem:[#allocation2 + $0xb98] sm:$0xff]  ;;  %v516_v44 = vld [vmem:[#allocation2 + $0xf68] sm:$0xff]  ;;  %v457_v45 = vld [vmem:[#allocation2 + $0xd90] sm:$0xff]  ;;  %v1441_v19 = vadd.f32 %v1440_v63, %v393_v43  ;;  %v1370_v34 = vadd.f32 %v1369_v18, %v335_v37  ;;  %v1405_v28 = vadd.f32 %v1404_v13, %v332_v36 }
  0xae   :  { %v458_v56 = vld [vmem:[#allocation2 + $0xd98] sm:$0xff]  ;;  %v519_v52 = vld [vmem:[#allocation2 + $0xf80] sm:$0xff]  ;;  %v337_v60 = vld [vmem:[#allocation2 + $0x9d0] sm:$0xff]  ;;  %v1623_v12 = vadd.f32 %v1622_v1, %v516_v44  ;;  %v1478_v25 = vadd.f32 %v1477_v7, %v394_v39  ;;  %v1515_v26 = vadd.f32 %v1514_v10, %v457_v45 }
  0xaf   :  { %v334_v53 = vld [vmem:[#allocation2 + $0x9b8] sm:$0xff]  ;;  %v395_v2 = vld [vmem:[#allocation2 + $0xba0] sm:$0xff]  ;;  %v396_v61 = vld [vmem:[#allocation2 + $0xba8] sm:$0xff]  ;;  %v1552_v27 = vadd.f32 %v1551_v11, %v458_v56  ;;  %v1588_v29 = vadd.f32 %v1587_v14, %v519_v52  ;;  %v1371_v55 = vadd.f32 %v1370_v34, %v337_v60 }
  0xb0   :  { %v518_v3 = vld [vmem:[#allocation2 + $0xf78] sm:$0xff]  ;;  %v459_v6 = vld [vmem:[#allocation2 + $0xda0] sm:$0xff]  ;;  %v460_v15 = vld [vmem:[#allocation2 + $0xda8] sm:$0xff]  ;;  %v1442_v35 = vadd.f32 %v1441_v19, %v395_v2  ;;  %v1479_v42 = vadd.f32 %v1478_v25, %v396_v61  ;;  %v1406_v45 = vadd.f32 %v1405_v28, %v334_v53 }
  0xb1   :  { %v521_v8 = vld [vmem:[#allocation2 + $0xf90] sm:$0xff]  ;;  %v336_v4 = vld [vmem:[#allocation2 + $0x9c8] sm:$0xff]  ;;  %v339_v5 = vld [vmem:[#allocation2 + $0x9e0] sm:$0xff]  ;;  %v1624_v38 = vadd.f32 %v1623_v12, %v518_v3  ;;  %v1516_v43 = vadd.f32 %v1515_v26, %v459_v6  ;;  %v1553_v44 = vadd.f32 %v1552_v27, %v460_v15 }
  0xb2   :  { %v397_v23 = vld [vmem:[#allocation2 + $0xbb0] sm:$0xff]  ;;  %v398_v16 = vld [vmem:[#allocation2 + $0xbb8] sm:$0xff]  ;;  %v520_v24 = vld [vmem:[#allocation2 + $0xf88] sm:$0xff]  ;;  %v1589_v46 = vadd.f32 %v1588_v29, %v521_v8  ;;  %v1372_v11 = vadd.f32 %v1371_v55, %v339_v5  ;;  %v1407_v14 = vadd.f32 %v1406_v45, %v336_v4 }
  0xb3   :  { %v461_v22 = vld [vmem:[#allocation2 + $0xdb0] sm:$0xff]  ;;  %v462_v30 = vld [vmem:[#allocation2 + $0xdb8] sm:$0xff]  ;;  %v523_v31 = vld [vmem:[#allocation2 + $0xfa0] sm:$0xff]  ;;  %v1443_v56 = vadd.f32 %v1442_v35, %v397_v23  ;;  %v1625_v52 = vadd.f32 %v1624_v38, %v520_v24  ;;  %v1480_v63 = vadd.f32 %v1479_v42, %v398_v16 }
  0xb4   :  { %v338_v20 = vld [vmem:[#allocation2 + $0x9d8] sm:$0xff]  ;;  %v341_v21 = vld [vmem:[#allocation2 + $0x9f0] sm:$0xff]  ;;  %v399_v40 = vld [vmem:[#allocation2 + $0xbc0] sm:$0xff]  ;;  %v1517_v1 = vadd.f32 %v1516_v43, %v461_v22  ;;  %v1554_v2 = vadd.f32 %v1553_v44, %v462_v30  ;;  %v1590_v3 = vadd.f32 %v1589_v46, %v523_v31 }
  0xb5   :  { %v400_v33 = vld [vmem:[#allocation2 + $0xbc8] sm:$0xff]  ;;  %v522_v41 = vld [vmem:[#allocation2 + $0xf98] sm:$0xff]  ;;  %v463_v39 = vld [vmem:[#allocation2 + $0xdc0] sm:$0xff]  ;;  %v1444_v6 = vadd.f32 %v1443_v56, %v399_v40  ;;  %v1373_v26 = vadd.f32 %v1372_v11, %v341_v21  ;;  %v1408_v27 = vadd.f32 %v1407_v14, %v338_v20 }
  0xb6   :  { %v464_v47 = vld [vmem:[#allocation2 + $0xdc8] sm:$0xff]  ;;  %v525_v50 = vld [vmem:[#allocation2 + $0xfb0] sm:$0xff]  ;;  %v402_v62 = vld [vmem:[#allocation2 + $0xbd8] sm:$0xff]  ;;  %v1626_v15 = vadd.f32 %v1625_v52, %v522_v41  ;;  %v1481_v13 = vadd.f32 %v1480_v63, %v400_v33  ;;  %v1518_v19 = vadd.f32 %v1517_v1, %v463_v39 }
  0xb7   :  { %v340_v37 = vld [vmem:[#allocation2 + $0x9e8] sm:$0xff]  ;;  %v401_v36 = vld [vmem:[#allocation2 + $0xbd0] sm:$0xff]  ;;  %v466_v61 = vld [vmem:[#allocation2 + $0xdd8] sm:$0xff]  ;;  %v1555_v12 = vadd.f32 %v1554_v2, %v464_v47  ;;  %v1591_v23 = vadd.f32 %v1590_v3, %v525_v50  ;;  %v1374_v41 = vrot.slane %v1373_v26, 4 }
  0xb8   :  { %v524_v54 = vld [vmem:[#allocation2 + $0xfa8] sm:$0xff]  ;;  %v465_v7 = vld [vmem:[#allocation2 + $0xdd0] sm:$0xff]  ;;  %v527_v10 = vld [vmem:[#allocation2 + $0xfc0] sm:$0xff]  ;;  %v1445_v29 = vadd.f32 %v1444_v6, %v401_v36  ;;  %v1482_v31 = vadd.f32 %v1481_v13, %v402_v62  ;;  %v1409_v42 = vadd.f32 %v1408_v27, %v340_v37 }
  0xb9   :  { %v342_v8 = vld [vmem:[#allocation2 + $0x9f8] sm:$0xff]  ;;  %v403_v60 = vld [vmem:[#allocation2 + $0xbe0] sm:$0xff]  ;;  %v404_v53 = vld [vmem:[#allocation2 + $0xbe8] sm:$0xff]  ;;  %v1627_v22 = vadd.f32 %v1626_v15, %v524_v54  ;;  %v1519_v34 = vadd.f32 %v1518_v19, %v465_v7  ;;  %v1556_v28 = vadd.f32 %v1555_v12, %v466_v61  ;;  %v1592_v35 = vadd.f32 %v1591_v23, %v527_v10 }
  0xba   :  { %v526_v18 = vld [vmem:[#allocation2 + $0xfb8] sm:$0xff]  ;;  %v467_v24 = vld [vmem:[#allocation2 + $0xde0] sm:$0xff]  ;;  %v468_v16 = vld [vmem:[#allocation2 + $0xde8] sm:$0xff]  ;;  %v1446_v43 = vadd.f32 %v1445_v29, %v403_v60  ;;  %v1483_v39 = vadd.f32 %v1482_v31, %v404_v53  ;;  %v1375_v55 = vadd.f32 %v1374_v41, %v1373_v26  ;;  %v1410_v45 = vadd.f32 %v1409_v42, %v342_v8 }
  0xbb   :  { %v529_v25 = vld [vmem:[#allocation2 + $0xfd0] sm:$0xff]  ;;  %v406_v5 = vld [vmem:[#allocation2 + $0xbf8] sm:$0xff]  ;;  %v528_v4 = vld [vmem:[#allocation2 + $0xfc8] sm:$0xff]  ;;  %v1628_v44 = vadd.f32 %v1627_v22, %v526_v18  ;;  %v1520_v21 = vadd.f32 %v1519_v34, %v467_v24  ;;  %v1557_v20 = vadd.f32 %v1556_v28, %v468_v16  ;;  %v2426_v23 = vadd.f32 %v1341_v32, %v2416_v0 }
  0xbc   :  { %v405_v30 = vld [vmem:[#allocation2 + $0xbf0] sm:$0xff]  ;;  %v470_v40 = vld [vmem:[#allocation2 + $0xdf8] sm:$0xff]  ;;  %v531_v33 = vld [vmem:[#allocation2 + $0xfe0] sm:$0xff]  ;;  %v1593_v47 = vadd.f32 %v1592_v35, %v529_v25  ;;  %v1484_v62 = vadd.f32 %v1483_v39, %v406_v5  ;;  %v1376_v2 = vrot.slane %v1375_v55, 2  ;;  %v1411_v3 = vrot.slane %v1410_v45, 4 }
  0xbd   :  { %v469_v38 = vld [vmem:[#allocation2 + $0xdf0] sm:$0xff]  ;;  %v530_v46 = vld [vmem:[#allocation2 + $0xfd8] sm:$0xff]  ;;  %v1447_v56 = vadd.f32 %v1446_v43, %v405_v30  ;;  %v1629_v52 = vadd.f32 %v1628_v44, %v528_v4  ;;  %v532_v36 = vld [vmem:[#allocation2 + $0xfe8] sm:$0xff]  ;;  %v1558_v63 = vadd.f32 %v1557_v20, %v470_v40 }
  0xbe   :  { %v533_v50 = vld [vmem:[#allocation2 + $0xff0] sm:$0xff]  ;;  %v1521_v54 = vadd.f32 %v1520_v21, %v469_v38  ;;  %v1594_v1 = vadd.f32 %v1593_v47, %v531_v33  ;;  %v534_v61 = vld [vmem:[#allocation2 + $0xff8] sm:$0xff]  ;;  %v1485_v10 = vrot.slane %v1484_v62, 4  ;;  %v1377_v15 = vadd.f32 %v1376_v2, %v1375_v55  ;;  %v539_v26 = vld [vmem:[#allocation2 + $0x1020] sm:$0xff] }
  0xbf   :  { %v1448_v37 = vrot.slane %v1447_v56, 4  ;;  %v1630_v7 = vadd.f32 %v1629_v52, %v530_v46  ;;  %v1559_v14 = vrot.slane %v1558_v63, 4  ;;  %v1412_v60 = vadd.f32 %v1411_v3, %v1410_v45  ;;  %v536_v28 = vld [vmem:[#allocation2 + $0x1008] sm:$0xff]  ;;  %v538_v35 = vld [vmem:[#allocation2 + $0x1018] sm:$0xff]  ;;  %v541_v38 = vld [vmem:[#allocation2 + $0x1030] sm:$0xff] }
  0xc0   :  { %v1522_v11 = vrot.slane %v1521_v54, 4  ;;  %v1595_v6 = vadd.f32 %v1594_v1, %v533_v50  ;;  %v1486_v18 = vadd.f32 %v1485_v10, %v1484_v62  ;;  %v1378_v5 = vrot.slane %v1377_v15, 1  ;;  %v543_v32 = vld [vmem:[#allocation2 + $0x1040] sm:$0xff]  ;;  %v600_v43 = vld [vmem:[#allocation2 + $0x1208] sm:$0xff]  ;;  %v545_v47 = vld [vmem:[#allocation2 + $0x1050] sm:$0xff] }
  0xc1   :  { %v1449_v53 = vadd.f32 %v1448_v37, %v1447_v56  ;;  %v1631_v8 = vadd.f32 %v1630_v7, %v532_v36  ;;  %v1560_v19 = vadd.f32 %v1559_v14, %v1558_v63  ;;  %v1413_v24 = vrot.slane %v1412_v60, 2  ;;  %v599_v42 = vld [vmem:[#allocation2 + $0x1200] sm:$0xff]  ;;  %v540_v20 = vld [vmem:[#allocation2 + $0x1028] sm:$0xff]  ;;  %v601_v50 = vld [vmem:[#allocation2 + $0x1210] sm:$0xff] }
  0xc2   :  { %v1523_v13 = vadd.f32 %v1522_v11, %v1521_v54  ;;  %v1596_v12 = vrot.slane %v1595_v6, 4  ;;  %v1487_v27 = vrot.slane %v1486_v18, 2  ;;  %v1640_v21 = vadd.f32 %v2408_v51, %v539_v26  ;;  %v602_v55 = vld [vmem:[#allocation2 + $0x1218] sm:$0xff]  ;;  %v663_v45 = vld [vmem:[#allocation2 + $0x1400] sm:$0xff]  ;;  %v664_v54 = vld [vmem:[#allocation2 + $0x1408] sm:$0xff] }
  0xc3   :  { %v1450_v16 = vrot.slane %v1449_v53, 2  ;;  %v1632_v25 = vadd.f32 %v1631_v8, %v534_v61  ;;  %v1561_v22 = vrot.slane %v1560_v19, 2  ;;  %v1414_v4 = vadd.f32 %v1413_v24, %v1412_v60  ;;  %v665_v63 = vld [vmem:[#allocation2 + $0x1410] sm:$0xff]  ;;  %v666_v1 = vld [vmem:[#allocation2 + $0x1418] sm:$0xff]  ;;  %v547_v51 = vld [vmem:[#allocation2 + $0x1060] sm:$0xff] }
  0xc4   :  { %v1524_v29 = vrot.slane %v1523_v13, 2  ;;  %v1597_v30 = vadd.f32 %v1596_v12, %v1595_v6  ;;  %v1488_v40 = vadd.f32 %v1487_v27, %v1486_v18  ;;  %v2429_v2 = vadd.f32 %v1378_v5, %v1377_v15  ;;  %v542_v61 = vld [vmem:[#allocation2 + $0x1038] sm:$0xff]  ;;  %v603_v10 = vld [vmem:[#allocation2 + $0x1220] sm:$0xff]  ;;  %v604_v11 = vld [vmem:[#allocation2 + $0x1228] sm:$0xff] }
  0xc5   :  { %v1451_v31 = vadd.f32 %v1450_v16, %v1449_v53  ;;  %v1633_v34 = vrot.slane %v1632_v25, 4  ;;  %v1562_v41 = vadd.f32 %v1561_v22, %v1560_v19  ;;  %v1415_v44 = vrot.slane %v1414_v4, 1  ;;  %v667_v14 = vld [vmem:[#allocation2 + $0x1420] sm:$0xff]  ;;  %v668_v18 = vld [vmem:[#allocation2 + $0x1428] sm:$0xff]  ;;  %v729_v15 = vld [vmem:[#allocation2 + $0x1610] sm:$0xff] }
  0xc6   :  { %v1525_v33 = vadd.f32 %v1524_v29, %v1523_v13  ;;  %v1598_v0 = vrot.slane %v1597_v30, 2  ;;  %v1489_v56 = vrot.slane %v1488_v40, 1  ;;  %v1641_v7 = vadd.f32 %v1640_v21, %v541_v38  ;;  %v727_v13 = vld [vmem:[#allocation2 + $0x1600] sm:$0xff]  ;;  %v549_v26 = vld [vmem:[#allocation2 + $0x1070] sm:$0xff]  ;;  %v606_v29 = vld [vmem:[#allocation2 + $0x1238] sm:$0xff] }
  0xc7   :  { %v1452_v46 = vrot.slane %v1451_v31, 1  ;;  %v1634_v39 = vadd.f32 %v1633_v34, %v1632_v25  ;;  %v1563_v36 = vrot.slane %v1562_v41, 1  ;;  %v2431_v3 = vadd.f32 %v1415_v44, %v1414_v4  ;;  %v544_v25 = vld [vmem:[#allocation2 + $0x1048] sm:$0xff]  ;;  %v605_v27 = vld [vmem:[#allocation2 + $0x1230] sm:$0xff]  ;;  %v607_v22 = vld [vmem:[#allocation2 + $0x1240] sm:$0xff] }
  0xc8   :  { %v1526_v52 = vrot.slane %v1525_v33, 1  ;;  %v1599_v62 = vadd.f32 %v1598_v0, %v1597_v30  ;;  %v2435_v60 = vadd.f32 %v1489_v56, %v1488_v40  ;;  %v1642_v12 = vadd.f32 %v1641_v7, %v543_v32  ;;  %v669_v34 = vld [vmem:[#allocation2 + $0x1430] sm:$0xff]  ;;  %v670_v38 = vld [vmem:[#allocation2 + $0x1438] sm:$0xff]  ;;  %v731_v40 = vld [vmem:[#allocation2 + $0x1620] sm:$0xff] }
  0xc9   :  { %2542 = vst [vmem:[#allocation8_spill] sm:$0xff] %v2431_v3  ;;  %v1635_v37 = vrot.slane %v1634_v39, 2  ;;  %v2433_v6 = vadd.f32 %v1452_v46, %v1451_v31  ;;  %v1676_v24 = vadd.f32 %v538_v35, %v536_v28  ;;  %v1713_v16 = vadd.f32 %v601_v50, %v599_v42  ;;  %v546_v28 = vld [vmem:[#allocation2 + $0x1058] sm:$0xff]  ;;  %v551_v35 = vld [vmem:[#allocation2 + $0x1080] sm:$0xff]  ;;  %v608_v42 = vld [vmem:[#allocation2 + $0x1248] sm:$0xff] }
  0xca   :  { %2543 = vst [vmem:[#allocation9_spill] sm:$0xff] %v2435_v60  ;;  %v2437_v53 = vadd.f32 %v1526_v52, %v1525_v33  ;;  %v1600_v8 = vrot.slane %v1599_v62, 1  ;;  %v2441_v30 = vadd.f32 %v1563_v36, %v1562_v41  ;;  %v1750_v5 = vadd.f32 %v602_v55, %v600_v43  ;;  %v728_v46 = vld [vmem:[#allocation2 + $0x1608] sm:$0xff]  ;;  %v671_v43 = vld [vmem:[#allocation2 + $0x1440] sm:$0xff] }
  0xcb   :  { %v2439_v19 = vadd.f32 %v1635_v37, %v1634_v39  ;;  %v1787_v4 = vadd.f32 %v665_v63, %v663_v45  ;;  %v1824_v31 = vadd.f32 %v666_v1, %v664_v54  ;;  %v1643_v0 = vadd.f32 %v1642_v12, %v545_v47  ;;  %v730_v39 = vld [vmem:[#allocation2 + $0x1618] sm:$0xff]  ;;  %v672_v55 = vld [vmem:[#allocation2 + $0x1448] sm:$0xff]  ;;  %v733_v45 = vld [vmem:[#allocation2 + $0x1630] sm:$0xff] }
  0xcc   :  { %2544 = vst [vmem:[#allocation10_spill] sm:$0xff] %v2441_v30  ;;  %v2443_v33 = vadd.f32 %v1600_v8, %v1599_v62  ;;  %v1677_v44 = vadd.f32 %v1676_v24, %v540_v20  ;;  %v1714_v32 = vadd.f32 %v1713_v16, %v603_v10  ;;  %v1751_v21 = vadd.f32 %v1750_v5, %v604_v11  ;;  %v548_v47 = vld [vmem:[#allocation2 + $0x1068] sm:$0xff]  ;;  %v553_v20 = vld [vmem:[#allocation2 + $0x1090] sm:$0xff]  ;;  %v610_v1 = vld [vmem:[#allocation2 + $0x1258] sm:$0xff] }
  0xcd   :  { %v1788_v50 = vadd.f32 %v1787_v4, %v667_v14  ;;  %v1825_v41 = vadd.f32 %v1824_v31, %v668_v18  ;;  %v1861_v56 = vadd.f32 %v729_v15, %v727_v13  ;;  %v1637_v52 = vrot.slane %v2439_v19, 1  ;;  %v609_v63 = vld [vmem:[#allocation2 + $0x1250] sm:$0xff]  ;;  %v732_v37 = vld [vmem:[#allocation2 + $0x1628] sm:$0xff]  ;;  %v674_v18 = vld [vmem:[#allocation2 + $0x1458] sm:$0xff] }
  0xce   :  { %2545 = vst [vmem:[#allocation11_spill] sm:$0xff] %v2443_v33  ;;  %v1644_v36 = vadd.f32 %v1643_v0, %v547_v51  ;;  %v1678_v62 = vadd.f32 %v1677_v44, %v542_v61  ;;  %v1715_v54 = vadd.f32 %v1714_v32, %v605_v27  ;;  %v1752_v7 = vadd.f32 %v1751_v21, %v606_v29  ;;  %v673_v14 = vld [vmem:[#allocation2 + $0x1450] sm:$0xff]  ;;  %v735_v13 = vld [vmem:[#allocation2 + $0x1640] sm:$0xff]  ;;  %v550_v5 = vld [vmem:[#allocation2 + $0x1078] sm:$0xff] }
  0xcf   :  { %v1789_v10 = vadd.f32 %v1788_v50, %v669_v34  ;;  %v1826_v8 = vadd.f32 %v1825_v41, %v670_v38  ;;  %v1862_v11 = vadd.f32 %v1861_v56, %v731_v40  ;;  %v1898_v16 = vadd.f32 %v730_v39, %v728_v46  ;;  %v555_v51 = vld [vmem:[#allocation2 + $0x10a0] sm:$0xff]  ;;  %v612_v27 = vld [vmem:[#allocation2 + $0x1268] sm:$0xff]  ;;  %v734_v4 = vld [vmem:[#allocation2 + $0x1638] sm:$0xff] }
  0xd0   :  { %v1645_v15 = vadd.f32 %v1644_v36, %v549_v26  ;;  %v1679_v12 = vadd.f32 %v1678_v62, %v544_v25  ;;  %v1716_v24 = vadd.f32 %v1715_v54, %v607_v22  ;;  %v611_v61 = vld [vmem:[#allocation2 + $0x1260] sm:$0xff]  ;;  %v1753_v31 = vadd.f32 %v1752_v7, %v608_v42  ;;  %v676_v34 = vld [vmem:[#allocation2 + $0x1468] sm:$0xff]  ;;  %v737_v38 = vld [vmem:[#allocation2 + $0x1650] sm:$0xff] }
  0xd1   :  { %v1790_v0 = vadd.f32 %v1789_v10, %v671_v43  ;;  %v1827_v44 = vadd.f32 %v1826_v8, %v672_v55  ;;  %v1863_v32 = vadd.f32 %v1862_v11, %v733_v45  ;;  %v675_v29 = vld [vmem:[#allocation2 + $0x1460] sm:$0xff]  ;;  %v1899_v41 = vadd.f32 %v1898_v16, %v732_v37  ;;  %v552_v26 = vld [vmem:[#allocation2 + $0x1088] sm:$0xff]  ;;  %v557_v25 = vld [vmem:[#allocation2 + $0x10b0] sm:$0xff] }
  0xd2   :  { %v1646_v40 = vadd.f32 %v1645_v15, %v551_v35  ;;  %v1680_v21 = vadd.f32 %v1679_v12, %v546_v28  ;;  %v1717_v50 = vadd.f32 %v1716_v24, %v609_v63  ;;  %v613_v22 = vld [vmem:[#allocation2 + $0x1270] sm:$0xff]  ;;  %v614_v46 = vld [vmem:[#allocation2 + $0x1278] sm:$0xff]  ;;  %v736_v39 = vld [vmem:[#allocation2 + $0x1648] sm:$0xff]  ;;  %v1754_v56 = vadd.f32 %v1753_v31, %v610_v1 }
  0xd3   :  { %v1791_v36 = vadd.f32 %v1790_v0, %v673_v14  ;;  %v1828_v62 = vadd.f32 %v1827_v44, %v674_v18  ;;  %v1864_v54 = vadd.f32 %v1863_v32, %v735_v13  ;;  %v677_v42 = vld [vmem:[#allocation2 + $0x1470] sm:$0xff]  ;;  %v678_v43 = vld [vmem:[#allocation2 + $0x1478] sm:$0xff]  ;;  %v739_v55 = vld [vmem:[#allocation2 + $0x1660] sm:$0xff]  ;;  %v1900_v8 = vadd.f32 %v1899_v41, %v734_v4 }
  0xd4   :  { %v1647_v45 = vadd.f32 %v1646_v40, %v553_v20  ;;  %v1681_v7 = vadd.f32 %v1680_v21, %v548_v47  ;;  %v1718_v10 = vadd.f32 %v1717_v50, %v611_v61  ;;  %v554_v35 = vld [vmem:[#allocation2 + $0x1098] sm:$0xff]  ;;  %v559_v28 = vld [vmem:[#allocation2 + $0x10c0] sm:$0xff]  ;;  %v616_v37 = vld [vmem:[#allocation2 + $0x1288] sm:$0xff]  ;;  %v1755_v15 = vadd.f32 %v1754_v56, %v612_v27 }
  0xd5   :  { %v615_v63 = vld [vmem:[#allocation2 + $0x1280] sm:$0xff]  ;;  %v738_v11 = vld [vmem:[#allocation2 + $0x1658] sm:$0xff]  ;;  %v1792_v12 = vadd.f32 %v1791_v36, %v675_v29  ;;  %v1829_v24 = vadd.f32 %v1828_v62, %v676_v34  ;;  %v1865_v16 = vadd.f32 %v1864_v54, %v737_v38  ;;  %v680_v14 = vld [vmem:[#allocation2 + $0x1488] sm:$0xff]  ;;  %v1901_v44 = vadd.f32 %v1900_v8, %v736_v39 }
  0xd6   :  { %v679_v1 = vld [vmem:[#allocation2 + $0x1480] sm:$0xff]  ;;  %v741_v18 = vld [vmem:[#allocation2 + $0x1670] sm:$0xff]  ;;  %v1648_v13 = vadd.f32 %v1647_v45, %v555_v51  ;;  %v1682_v31 = vadd.f32 %v1681_v7, %v550_v5  ;;  %v1719_v0 = vadd.f32 %v1718_v10, %v613_v22  ;;  %v556_v20 = vld [vmem:[#allocation2 + $0x10a8] sm:$0xff]  ;;  %v1756_v40 = vadd.f32 %v1755_v15, %v614_v46 }
  0xd7   :  { %v561_v47 = vld [vmem:[#allocation2 + $0x10d0] sm:$0xff]  ;;  %v618_v4 = vld [vmem:[#allocation2 + $0x1298] sm:$0xff]  ;;  %v740_v32 = vld [vmem:[#allocation2 + $0x1668] sm:$0xff]  ;;  %v1793_v21 = vadd.f32 %v1792_v12, %v677_v42  ;;  %v1830_v50 = vadd.f32 %v1829_v24, %v678_v43  ;;  %v1866_v41 = vadd.f32 %v1865_v16, %v739_v55  ;;  %v1902_v62 = vadd.f32 %v1901_v44, %v738_v11 }
  0xd8   :  { %v617_v61 = vld [vmem:[#allocation2 + $0x1290] sm:$0xff]  ;;  %v682_v29 = vld [vmem:[#allocation2 + $0x1498] sm:$0xff]  ;;  %v743_v34 = vld [vmem:[#allocation2 + $0x1680] sm:$0xff]  ;;  %v1649_v38 = vadd.f32 %v1648_v13, %v557_v25  ;;  %v1683_v56 = vadd.f32 %v1682_v31, %v552_v26  ;;  %v1720_v36 = vadd.f32 %v1719_v0, %v615_v63  ;;  %v1757_v45 = vadd.f32 %v1756_v40, %v616_v37 }
  0xd9   :  { %v681_v27 = vld [vmem:[#allocation2 + $0x1490] sm:$0xff]  ;;  %v558_v51 = vld [vmem:[#allocation2 + $0x10b8] sm:$0xff]  ;;  %v563_v5 = vld [vmem:[#allocation2 + $0x10e0] sm:$0xff]  ;;  %v1794_v7 = vadd.f32 %v1793_v21, %v679_v1  ;;  %v1831_v10 = vadd.f32 %v1830_v50, %v680_v14  ;;  %v1867_v8 = vadd.f32 %v1866_v41, %v741_v18  ;;  %v1903_v24 = vadd.f32 %v1902_v62, %v740_v32 }
  0xda   :  { %v619_v22 = vld [vmem:[#allocation2 + $0x12a0] sm:$0xff]  ;;  %v620_v39 = vld [vmem:[#allocation2 + $0x12a8] sm:$0xff]  ;;  %v742_v54 = vld [vmem:[#allocation2 + $0x1678] sm:$0xff]  ;;  %v1650_v55 = vadd.f32 %v1649_v38, %v559_v28  ;;  %v1684_v15 = vadd.f32 %v1683_v56, %v554_v35  ;;  %v1721_v12 = vadd.f32 %v1720_v36, %v617_v61  ;;  %v1758_v13 = vadd.f32 %v1757_v45, %v618_v4 }
  0xdb   :  { %v683_v46 = vld [vmem:[#allocation2 + $0x14a0] sm:$0xff]  ;;  %v684_v42 = vld [vmem:[#allocation2 + $0x14a8] sm:$0xff]  ;;  %v745_v43 = vld [vmem:[#allocation2 + $0x1690] sm:$0xff]  ;;  %v1795_v31 = vadd.f32 %v1794_v7, %v681_v27  ;;  %v1832_v0 = vadd.f32 %v1831_v10, %v682_v29  ;;  %v1868_v44 = vadd.f32 %v1867_v8, %v743_v34  ;;  %v1904_v50 = vadd.f32 %v1903_v24, %v742_v54 }
  0xdc   :  { %v560_v25 = vld [vmem:[#allocation2 + $0x10c8] sm:$0xff]  ;;  %v565_v26 = vld [vmem:[#allocation2 + $0x10f0] sm:$0xff]  ;;  %v622_v11 = vld [vmem:[#allocation2 + $0x12b8] sm:$0xff]  ;;  %v1651_v18 = vadd.f32 %v1650_v55, %v561_v47  ;;  %v1685_v40 = vadd.f32 %v1684_v15, %v556_v20  ;;  %v1722_v21 = vadd.f32 %v1721_v12, %v619_v22  ;;  %v1759_v38 = vadd.f32 %v1758_v13, %v620_v39 }
  0xdd   :  { %v621_v63 = vld [vmem:[#allocation2 + $0x12b0] sm:$0xff]  ;;  %v744_v16 = vld [vmem:[#allocation2 + $0x1688] sm:$0xff]  ;;  %v686_v1 = vld [vmem:[#allocation2 + $0x14b8] sm:$0xff]  ;;  %v1796_v56 = vadd.f32 %v1795_v31, %v683_v46  ;;  %v1833_v36 = vadd.f32 %v1832_v0, %v684_v42  ;;  %v1869_v62 = vadd.f32 %v1868_v44, %v745_v43 }
  0xde   :  { %v685_v37 = vld [vmem:[#allocation2 + $0x14b0] sm:$0xff]  ;;  %v747_v14 = vld [vmem:[#allocation2 + $0x16a0] sm:$0xff]  ;;  %v562_v28 = vld [vmem:[#allocation2 + $0x10d8] sm:$0xff]  ;;  %v1652_v34 = vadd.f32 %v1651_v18, %v563_v5  ;;  %v1686_v45 = vadd.f32 %v1685_v40, %v558_v51  ;;  %v1723_v7 = vadd.f32 %v1722_v21, %v621_v63  ;;  %v1905_v10 = vadd.f32 %v1904_v50, %v744_v16 }
  0xdf   :  { %v567_v35 = vld [vmem:[#allocation2 + $0x1100] sm:$0xff]  ;;  %v624_v32 = vld [vmem:[#allocation2 + $0x12c8] sm:$0xff]  ;;  %v746_v41 = vld [vmem:[#allocation2 + $0x1698] sm:$0xff]  ;;  %v1760_v55 = vadd.f32 %v1759_v38, %v622_v11  ;;  %v1797_v15 = vadd.f32 %v1796_v56, %v685_v37  ;;  %v1834_v12 = vadd.f32 %v1833_v36, %v686_v1  ;;  %v1870_v24 = vadd.f32 %v1869_v62, %v747_v14 }
  0xe0   :  { %v623_v61 = vld [vmem:[#allocation2 + $0x12c0] sm:$0xff]  ;;  %v688_v27 = vld [vmem:[#allocation2 + $0x14c8] sm:$0xff]  ;;  %v749_v29 = vld [vmem:[#allocation2 + $0x16b0] sm:$0xff]  ;;  %v1653_v43 = vadd.f32 %v1652_v34, %v565_v26  ;;  %v1687_v13 = vadd.f32 %v1686_v45, %v560_v25  ;;  %v1906_v0 = vadd.f32 %v1905_v10, %v746_v41 }
  0xe1   :  { %v687_v4 = vld [vmem:[#allocation2 + $0x14c0] sm:$0xff]  ;;  %v564_v47 = vld [vmem:[#allocation2 + $0x10e8] sm:$0xff]  ;;  %v569_v20 = vld [vmem:[#allocation2 + $0x1110] sm:$0xff]  ;;  %v1724_v31 = vadd.f32 %v1723_v7, %v623_v61  ;;  %v1761_v18 = vadd.f32 %v1760_v55, %v624_v32  ;;  %v1835_v21 = vadd.f32 %v1834_v12, %v688_v27  ;;  %v1871_v50 = vadd.f32 %v1870_v24, %v749_v29 }
  0xe2   :  { %v625_v22 = vld [vmem:[#allocation2 + $0x12d0] sm:$0xff]  ;;  %v626_v54 = vld [vmem:[#allocation2 + $0x12d8] sm:$0xff]  ;;  %v748_v8 = vld [vmem:[#allocation2 + $0x16a8] sm:$0xff]  ;;  %v1798_v40 = vadd.f32 %v1797_v15, %v687_v4  ;;  %v1654_v14 = vadd.f32 %v1653_v43, %v567_v35  ;;  %v1688_v38 = vadd.f32 %v1687_v13, %v562_v28 }
  0xe3   :  { %v689_v39 = vld [vmem:[#allocation2 + $0x14d0] sm:$0xff]  ;;  %v690_v46 = vld [vmem:[#allocation2 + $0x14d8] sm:$0xff]  ;;  %v751_v42 = vld [vmem:[#allocation2 + $0x16c0] sm:$0xff]  ;;  %v1725_v56 = vadd.f32 %v1724_v31, %v625_v22  ;;  %v1907_v36 = vadd.f32 %v1906_v0, %v748_v8  ;;  %v1762_v34 = vadd.f32 %v1761_v18, %v626_v54 }
  0xe4   :  { %v566_v5 = vld [vmem:[#allocation2 + $0x10f8] sm:$0xff]  ;;  %v571_v51 = vld [vmem:[#allocation2 + $0x1120] sm:$0xff]  ;;  %v628_v16 = vld [vmem:[#allocation2 + $0x12e8] sm:$0xff]  ;;  %v1799_v45 = vadd.f32 %v1798_v40, %v689_v39  ;;  %v1836_v7 = vadd.f32 %v1835_v21, %v690_v46  ;;  %v1872_v10 = vadd.f32 %v1871_v50, %v751_v42  ;;  %v1655_v29 = vadd.f32 %v1654_v14, %v569_v20 }
  0xe5   :  { %v627_v63 = vld [vmem:[#allocation2 + $0x12e0] sm:$0xff]  ;;  %v750_v44 = vld [vmem:[#allocation2 + $0x16b8] sm:$0xff]  ;;  %v692_v37 = vld [vmem:[#allocation2 + $0x14e8] sm:$0xff]  ;;  %v1689_v55 = vadd.f32 %v1688_v38, %v564_v47  ;;  %v1763_v43 = vadd.f32 %v1762_v34, %v628_v16 }
  0xe6   :  { %v691_v11 = vld [vmem:[#allocation2 + $0x14e0] sm:$0xff]  ;;  %v753_v1 = vld [vmem:[#allocation2 + $0x16d0] sm:$0xff]  ;;  %v568_v26 = vld [vmem:[#allocation2 + $0x1108] sm:$0xff]  ;;  %v1726_v15 = vadd.f32 %v1725_v56, %v627_v63  ;;  %v1908_v12 = vadd.f32 %v1907_v36, %v750_v44  ;;  %v1837_v31 = vadd.f32 %v1836_v7, %v692_v37  ;;  %v1656_v42 = vadd.f32 %v1655_v29, %v571_v51 }
  0xe7   :  { %v573_v25 = vld [vmem:[#allocation2 + $0x1130] sm:$0xff]  ;;  %v630_v41 = vld [vmem:[#allocation2 + $0x12f8] sm:$0xff]  ;;  %v752_v62 = vld [vmem:[#allocation2 + $0x16c8] sm:$0xff]  ;;  %v1800_v13 = vadd.f32 %v1799_v45, %v691_v11  ;;  %v1873_v0 = vadd.f32 %v1872_v10, %v753_v1  ;;  %v1690_v18 = vadd.f32 %v1689_v55, %v566_v5 }
  0xe8   :  { %v629_v61 = vld [vmem:[#allocation2 + $0x12f0] sm:$0xff]  ;;  %v694_v4 = vld [vmem:[#allocation2 + $0x14f8] sm:$0xff]  ;;  %v755_v27 = vld [vmem:[#allocation2 + $0x16e0] sm:$0xff]  ;;  %v1909_v21 = vadd.f32 %v1908_v12, %v752_v62  ;;  %v1764_v14 = vadd.f32 %v1763_v43, %v630_v41  ;;  %v1657_v1 = vadd.f32 %v1656_v42, %v573_v25 }
  0xe9   :  { %v693_v32 = vld [vmem:[#allocation2 + $0x14f0] sm:$0xff]  ;;  %v570_v35 = vld [vmem:[#allocation2 + $0x1118] sm:$0xff]  ;;  %v575_v28 = vld [vmem:[#allocation2 + $0x1140] sm:$0xff]  ;;  %v1727_v40 = vadd.f32 %v1726_v15, %v629_v61  ;;  %v1838_v56 = vadd.f32 %v1837_v31, %v694_v4  ;;  %v1874_v36 = vadd.f32 %v1873_v0, %v755_v27  ;;  %v1691_v34 = vadd.f32 %v1690_v18, %v568_v26 }
  0xea   :  { %v631_v22 = vld [vmem:[#allocation2 + $0x1300] sm:$0xff]  ;;  %v632_v8 = vld [vmem:[#allocation2 + $0x1308] sm:$0xff]  ;;  %v754_v24 = vld [vmem:[#allocation2 + $0x16d8] sm:$0xff]  ;;  %v1801_v38 = vadd.f32 %v1800_v13, %v693_v32  ;;  %v1658_v27 = vadd.f32 %v1657_v1, %v575_v28 }
  0xeb   :  { %v695_v54 = vld [vmem:[#allocation2 + $0x1500] sm:$0xff]  ;;  %v696_v39 = vld [vmem:[#allocation2 + $0x1508] sm:$0xff]  ;;  %v757_v46 = vld [vmem:[#allocation2 + $0x16f0] sm:$0xff]  ;;  %v1728_v45 = vadd.f32 %v1727_v40, %v631_v22  ;;  %v1910_v7 = vadd.f32 %v1909_v21, %v754_v24  ;;  %v1765_v29 = vadd.f32 %v1764_v14, %v632_v8  ;;  %v1692_v43 = vadd.f32 %v1691_v34, %v570_v35 }
  0xec   :  { %v572_v20 = vld [vmem:[#allocation2 + $0x1128] sm:$0xff]  ;;  %v577_v47 = vld [vmem:[#allocation2 + $0x1150] sm:$0xff]  ;;  %v634_v44 = vld [vmem:[#allocation2 + $0x1318] sm:$0xff]  ;;  %v1802_v55 = vadd.f32 %v1801_v38, %v695_v54  ;;  %v1839_v15 = vadd.f32 %v1838_v56, %v696_v39  ;;  %v1875_v12 = vadd.f32 %v1874_v36, %v757_v46 }
  0xed   :  { %v633_v63 = vld [vmem:[#allocation2 + $0x1310] sm:$0xff]  ;;  %v756_v50 = vld [vmem:[#allocation2 + $0x16e8] sm:$0xff]  ;;  %v698_v11 = vld [vmem:[#allocation2 + $0x1518] sm:$0xff]  ;;  %v1766_v42 = vadd.f32 %v1765_v29, %v634_v44  ;;  %v1659_v46 = vadd.f32 %v1658_v27, %v577_v47  ;;  %v1693_v14 = vadd.f32 %v1692_v43, %v572_v20 }
  0xee   :  { %v697_v16 = vld [vmem:[#allocation2 + $0x1510] sm:$0xff]  ;;  %v759_v37 = vld [vmem:[#allocation2 + $0x1700] sm:$0xff]  ;;  %v574_v51 = vld [vmem:[#allocation2 + $0x1138] sm:$0xff]  ;;  %v1729_v13 = vadd.f32 %v1728_v45, %v633_v63  ;;  %v1911_v31 = vadd.f32 %v1910_v7, %v756_v50  ;;  %v1840_v40 = vadd.f32 %v1839_v15, %v698_v11 }
  0xef   :  { %v579_v5 = vld [vmem:[#allocation2 + $0x1160] sm:$0xff]  ;;  %v636_v62 = vld [vmem:[#allocation2 + $0x1328] sm:$0xff]  ;;  %v758_v10 = vld [vmem:[#allocation2 + $0x16f8] sm:$0xff]  ;;  %v1803_v18 = vadd.f32 %v1802_v55, %v697_v16  ;;  %v1876_v21 = vadd.f32 %v1875_v12, %v759_v37  ;;  %v1694_v29 = vadd.f32 %v1693_v14, %v574_v51 }
  0xf0   :  { %v635_v61 = vld [vmem:[#allocation2 + $0x1320] sm:$0xff]  ;;  %v700_v32 = vld [vmem:[#allocation2 + $0x1528] sm:$0xff]  ;;  %v761_v4 = vld [vmem:[#allocation2 + $0x1710] sm:$0xff]  ;;  %v1912_v56 = vadd.f32 %v1911_v31, %v758_v10  ;;  %v1767_v1 = vadd.f32 %v1766_v42, %v636_v62  ;;  %v1660_v37 = vadd.f32 %v1659_v46, %v579_v5 }
  0xf1   :  { %v699_v41 = vld [vmem:[#allocation2 + $0x1520] sm:$0xff]  ;;  %v576_v25 = vld [vmem:[#allocation2 + $0x1148] sm:$0xff]  ;;  %v581_v26 = vld [vmem:[#allocation2 + $0x1170] sm:$0xff]  ;;  %v1730_v38 = vadd.f32 %v1729_v13, %v635_v61  ;;  %v1841_v45 = vadd.f32 %v1840_v40, %v700_v32  ;;  %v1877_v7 = vadd.f32 %v1876_v21, %v761_v4 }
  0xf2   :  { %v637_v22 = vld [vmem:[#allocation2 + $0x1330] sm:$0xff]  ;;  %v638_v24 = vld [vmem:[#allocation2 + $0x1338] sm:$0xff]  ;;  %v760_v0 = vld [vmem:[#allocation2 + $0x1708] sm:$0xff]  ;;  %v1804_v34 = vadd.f32 %v1803_v18, %v699_v41  ;;  %v1661_v4 = vadd.f32 %v1660_v37, %v581_v26  ;;  %v1695_v42 = vadd.f32 %v1694_v29, %v576_v25 }
  0xf3   :  { %v701_v8 = vld [vmem:[#allocation2 + $0x1530] sm:$0xff]  ;;  %v702_v54 = vld [vmem:[#allocation2 + $0x1538] sm:$0xff]  ;;  %v763_v39 = vld [vmem:[#allocation2 + $0x1720] sm:$0xff]  ;;  %v1731_v55 = vadd.f32 %v1730_v38, %v637_v22  ;;  %v1913_v15 = vadd.f32 %v1912_v56, %v760_v0  ;;  %v1768_v27 = vadd.f32 %v1767_v1, %v638_v24 }
  0xf4   :  { %v578_v28 = vld [vmem:[#allocation2 + $0x1158] sm:$0xff]  ;;  %v583_v35 = vld [vmem:[#allocation2 + $0x1180] sm:$0xff]  ;;  %v640_v50 = vld [vmem:[#allocation2 + $0x1348] sm:$0xff]  ;;  %v1805_v43 = vadd.f32 %v1804_v34, %v701_v8  ;;  %v1842_v13 = vadd.f32 %v1841_v45, %v702_v54  ;;  %v1878_v31 = vadd.f32 %v1877_v7, %v763_v39 }
  0xf5   :  { %v639_v63 = vld [vmem:[#allocation2 + $0x1340] sm:$0xff]  ;;  %v762_v36 = vld [vmem:[#allocation2 + $0x1718] sm:$0xff]  ;;  %v704_v16 = vld [vmem:[#allocation2 + $0x1548] sm:$0xff]  ;;  %v1769_v46 = vadd.f32 %v1768_v27, %v640_v50  ;;  %v1662_v39 = vadd.f32 %v1661_v4, %v583_v35  ;;  %v1696_v1 = vadd.f32 %v1695_v42, %v578_v28 }
  0xf6   :  { %v703_v44 = vld [vmem:[#allocation2 + $0x1540] sm:$0xff]  ;;  %v765_v11 = vld [vmem:[#allocation2 + $0x1730] sm:$0xff]  ;;  %v580_v47 = vld [vmem:[#allocation2 + $0x1168] sm:$0xff]  ;;  %v1732_v18 = vadd.f32 %v1731_v55, %v639_v63  ;;  %v1914_v40 = vadd.f32 %v1913_v15, %v762_v36  ;;  %v1843_v38 = vadd.f32 %v1842_v13, %v704_v16 }
  0xf7   :  { %v585_v20 = vld [vmem:[#allocation2 + $0x1190] sm:$0xff]  ;;  %v642_v10 = vld [vmem:[#allocation2 + $0x1358] sm:$0xff]  ;;  %v764_v12 = vld [vmem:[#allocation2 + $0x1728] sm:$0xff]  ;;  %v1806_v14 = vadd.f32 %v1805_v43, %v703_v44  ;;  %v1879_v56 = vadd.f32 %v1878_v31, %v765_v11  ;;  %v1697_v27 = vadd.f32 %v1696_v1, %v580_v47 }
  0xf8   :  { %v641_v61 = vld [vmem:[#allocation2 + $0x1350] sm:$0xff]  ;;  %v706_v41 = vld [vmem:[#allocation2 + $0x1558] sm:$0xff]  ;;  %v767_v32 = vld [vmem:[#allocation2 + $0x1740] sm:$0xff]  ;;  %v1915_v45 = vadd.f32 %v1914_v40, %v764_v12  ;;  %v1770_v37 = vadd.f32 %v1769_v46, %v642_v10  ;;  %v1663_v11 = vadd.f32 %v1662_v39, %v585_v20 }
  0xf9   :  { %v705_v62 = vld [vmem:[#allocation2 + $0x1550] sm:$0xff]  ;;  %v582_v5 = vld [vmem:[#allocation2 + $0x1178] sm:$0xff]  ;;  %v587_v51 = vld [vmem:[#allocation2 + $0x11a0] sm:$0xff]  ;;  %v1733_v34 = vadd.f32 %v1732_v18, %v641_v61  ;;  %v1844_v55 = vadd.f32 %v1843_v38, %v706_v41  ;;  %v1880_v15 = vadd.f32 %v1879_v56, %v767_v32 }
  0xfa   :  { %v643_v22 = vld [vmem:[#allocation2 + $0x1360] sm:$0xff]  ;;  %v644_v0 = vld [vmem:[#allocation2 + $0x1368] sm:$0xff]  ;;  %v766_v21 = vld [vmem:[#allocation2 + $0x1738] sm:$0xff]  ;;  %v1807_v29 = vadd.f32 %v1806_v14, %v705_v62  ;;  %v1664_v32 = vadd.f32 %v1663_v11, %v587_v51  ;;  %v1698_v46 = vadd.f32 %v1697_v27, %v582_v5 }
  0xfb   :  { %v707_v24 = vld [vmem:[#allocation2 + $0x1560] sm:$0xff]  ;;  %v708_v8 = vld [vmem:[#allocation2 + $0x1568] sm:$0xff]  ;;  %v769_v54 = vld [vmem:[#allocation2 + $0x1750] sm:$0xff]  ;;  %v1734_v43 = vadd.f32 %v1733_v34, %v643_v22  ;;  %v1916_v13 = vadd.f32 %v1915_v45, %v766_v21  ;;  %v1771_v4 = vadd.f32 %v1770_v37, %v644_v0 }
  0xfc   :  { %v584_v26 = vld [vmem:[#allocation2 + $0x1188] sm:$0xff]  ;;  %v589_v25 = vld [vmem:[#allocation2 + $0x11b0] sm:$0xff]  ;;  %v646_v36 = vld [vmem:[#allocation2 + $0x1378] sm:$0xff]  ;;  %v1808_v42 = vadd.f32 %v1807_v29, %v707_v24  ;;  %v1845_v18 = vadd.f32 %v1844_v55, %v708_v8  ;;  %v1881_v40 = vadd.f32 %v1880_v15, %v769_v54 }
  0xfd   :  { %v645_v63 = vld [vmem:[#allocation2 + $0x1370] sm:$0xff]  ;;  %v768_v7 = vld [vmem:[#allocation2 + $0x1748] sm:$0xff]  ;;  %v710_v44 = vld [vmem:[#allocation2 + $0x1578] sm:$0xff]  ;;  %v1772_v39 = vadd.f32 %v1771_v4, %v646_v36  ;;  %v1665_v54 = vadd.f32 %v1664_v32, %v589_v25  ;;  %v1699_v37 = vadd.f32 %v1698_v46, %v584_v26 }
  0xfe   :  { %v709_v50 = vld [vmem:[#allocation2 + $0x1570] sm:$0xff]  ;;  %v771_v16 = vld [vmem:[#allocation2 + $0x1760] sm:$0xff]  ;;  %v586_v35 = vld [vmem:[#allocation2 + $0x1198] sm:$0xff]  ;;  %v1735_v14 = vadd.f32 %v1734_v43, %v645_v63  ;;  %v1917_v38 = vadd.f32 %v1916_v13, %v768_v7  ;;  %v1846_v34 = vadd.f32 %v1845_v18, %v710_v44 }
  0xff   :  { %v591_v28 = vld [vmem:[#allocation2 + $0x11c0] sm:$0xff]  ;;  %v648_v12 = vld [vmem:[#allocation2 + $0x1388] sm:$0xff]  ;;  %v770_v31 = vld [vmem:[#allocation2 + $0x1758] sm:$0xff]  ;;  %v1809_v1 = vadd.f32 %v1808_v42, %v709_v50  ;;  %v1882_v45 = vadd.f32 %v1881_v40, %v771_v16  ;;  %v1700_v4 = vadd.f32 %v1699_v37, %v586_v35 }
 0x100   :  { %v647_v61 = vld [vmem:[#allocation2 + $0x1380] sm:$0xff]  ;;  %v712_v62 = vld [vmem:[#allocation2 + $0x1588] sm:$0xff]  ;;  %v773_v41 = vld [vmem:[#allocation2 + $0x1770] sm:$0xff]  ;;  %v1918_v55 = vadd.f32 %v1917_v38, %v770_v31  ;;  %v1773_v11 = vadd.f32 %v1772_v39, %v648_v12  ;;  %v1666_v16 = vadd.f32 %v1665_v54, %v591_v28 }
 0x101   :  { %v711_v10 = vld [vmem:[#allocation2 + $0x1580] sm:$0xff]  ;;  %v588_v20 = vld [vmem:[#allocation2 + $0x11a8] sm:$0xff]  ;;  %v593_v47 = vld [vmem:[#allocation2 + $0x11d0] sm:$0xff]  ;;  %v1736_v29 = vadd.f32 %v1735_v14, %v647_v61  ;;  %v1847_v43 = vadd.f32 %v1846_v34, %v712_v62  ;;  %v1883_v13 = vadd.f32 %v1882_v45, %v773_v41 }
 0x102   :  { %v649_v22 = vld [vmem:[#allocation2 + $0x1390] sm:$0xff]  ;;  %v650_v21 = vld [vmem:[#allocation2 + $0x1398] sm:$0xff]  ;;  %v772_v56 = vld [vmem:[#allocation2 + $0x1768] sm:$0xff]  ;;  %v1810_v27 = vadd.f32 %v1809_v1, %v711_v10  ;;  %v1667_v41 = vadd.f32 %v1666_v16, %v593_v47  ;;  %v1701_v39 = vadd.f32 %v1700_v4, %v588_v20 }
 0x103   :  { %v713_v0 = vld [vmem:[#allocation2 + $0x1590] sm:$0xff]  ;;  %v714_v24 = vld [vmem:[#allocation2 + $0x1598] sm:$0xff]  ;;  %v775_v8 = vld [vmem:[#allocation2 + $0x1780] sm:$0xff]  ;;  %v1737_v42 = vadd.f32 %v1736_v29, %v649_v22  ;;  %v1919_v18 = vadd.f32 %v1918_v55, %v772_v56  ;;  %v1774_v32 = vadd.f32 %v1773_v11, %v650_v21 }
 0x104   :  { %v590_v51 = vld [vmem:[#allocation2 + $0x11b8] sm:$0xff]  ;;  %v595_v5 = vld [vmem:[#allocation2 + $0x11e0] sm:$0xff]  ;;  %v652_v7 = vld [vmem:[#allocation2 + $0x13a8] sm:$0xff]  ;;  %v1811_v46 = vadd.f32 %v1810_v27, %v713_v0  ;;  %v1848_v14 = vadd.f32 %v1847_v43, %v714_v24  ;;  %v1884_v38 = vadd.f32 %v1883_v13, %v775_v8 }
 0x105   :  { %v651_v63 = vld [vmem:[#allocation2 + $0x13a0] sm:$0xff]  ;;  %v774_v15 = vld [vmem:[#allocation2 + $0x1778] sm:$0xff]  ;;  %v716_v50 = vld [vmem:[#allocation2 + $0x15a8] sm:$0xff]  ;;  %v1775_v45 = vadd.f32 %v1774_v32, %v652_v7  ;;  %v1668_v24 = vadd.f32 %v1667_v41, %v595_v5  ;;  %v1702_v8 = vadd.f32 %v1701_v39, %v590_v51 }
 0x106   :  { %v715_v36 = vld [vmem:[#allocation2 + $0x15a0] sm:$0xff]  ;;  %v777_v44 = vld [vmem:[#allocation2 + $0x1790] sm:$0xff]  ;;  %v592_v25 = vld [vmem:[#allocation2 + $0x11c8] sm:$0xff]  ;;  %v1738_v1 = vadd.f32 %v1737_v42, %v651_v63  ;;  %v1920_v34 = vadd.f32 %v1919_v18, %v774_v15  ;;  %v1849_v37 = vadd.f32 %v1848_v14, %v716_v50 }
 0x107   :  { %v597_v26 = vld [vmem:[#allocation2 + $0x11f0] sm:$0xff]  ;;  %v654_v31 = vld [vmem:[#allocation2 + $0x13b8] sm:$0xff]  ;;  %v776_v40 = vld [vmem:[#allocation2 + $0x1788] sm:$0xff]  ;;  %v1812_v54 = vadd.f32 %v1811_v46, %v715_v36  ;;  %v1885_v29 = vadd.f32 %v1884_v38, %v777_v44  ;;  %v1703_v44 = vadd.f32 %v1702_v8, %v592_v25 }
 0x108   :  { %v653_v61 = vld [vmem:[#allocation2 + $0x13b0] sm:$0xff]  ;;  %v718_v10 = vld [vmem:[#allocation2 + $0x15b8] sm:$0xff]  ;;  %v779_v62 = vld [vmem:[#allocation2 + $0x17a0] sm:$0xff]  ;;  %v1921_v27 = vadd.f32 %v1920_v34, %v776_v40  ;;  %v1776_v15 = vadd.f32 %v1775_v45, %v654_v31  ;;  %v1669_v50 = vadd.f32 %v1668_v24, %v597_v26 }
 0x109   :  { %v717_v12 = vld [vmem:[#allocation2 + $0x15b0] sm:$0xff]  ;;  %v594_v28 = vld [vmem:[#allocation2 + $0x11d8] sm:$0xff]  ;;  %v655_v35 = vld [vmem:[#allocation2 + $0x13c0] sm:$0xff]  ;;  %v1739_v11 = vadd.f32 %v1738_v1, %v653_v61  ;;  %v1850_v16 = vadd.f32 %v1849_v37, %v718_v10  ;;  %v1886_v4 = vadd.f32 %v1885_v29, %v779_v62 }
 0x10a   :  { %v656_v22 = vld [vmem:[#allocation2 + $0x13c8] sm:$0xff]  ;;  %v778_v56 = vld [vmem:[#allocation2 + $0x1798] sm:$0xff]  ;;  %v719_v55 = vld [vmem:[#allocation2 + $0x15c0] sm:$0xff]  ;;  %v1813_v13 = vadd.f32 %v1812_v54, %v717_v12  ;;  %v1670_v10 = vrot.slane %v1669_v50, 4  ;;  %v1704_v62 = vadd.f32 %v1703_v44, %v594_v28 }
 0x10b   :  { %v720_v21 = vld [vmem:[#allocation2 + $0x15c8] sm:$0xff]  ;;  %v781_v0 = vld [vmem:[#allocation2 + $0x17b0] sm:$0xff]  ;;  %v658_v20 = vld [vmem:[#allocation2 + $0x13d8] sm:$0xff]  ;;  %v1740_v18 = vadd.f32 %v1739_v11, %v655_v35  ;;  %v1922_v32 = vadd.f32 %v1921_v27, %v778_v56  ;;  %v1777_v40 = vadd.f32 %v1776_v15, %v656_v22 }
 0x10c   :  { %v596_v43 = vld [vmem:[#allocation2 + $0x11e8] sm:$0xff]  ;;  %v657_v47 = vld [vmem:[#allocation2 + $0x13d0] sm:$0xff]  ;;  %v722_v7 = vld [vmem:[#allocation2 + $0x15d8] sm:$0xff]  ;;  %v1814_v14 = vadd.f32 %v1813_v13, %v719_v55  ;;  %v1851_v38 = vadd.f32 %v1850_v16, %v720_v21  ;;  %v1887_v41 = vadd.f32 %v1886_v4, %v781_v0  ;;  %v1671_v55 = vadd.f32 %v1670_v10, %v1669_v50 }
 0x10d   :  { %v780_v63 = vld [vmem:[#allocation2 + $0x17a8] sm:$0xff]  ;;  %v721_v42 = vld [vmem:[#allocation2 + $0x15d0] sm:$0xff]  ;;  %v783_v36 = vld [vmem:[#allocation2 + $0x17c0] sm:$0xff]  ;;  %v1741_v1 = vadd.f32 %v1740_v18, %v657_v47  ;;  %v1778_v35 = vadd.f32 %v1777_v40, %v658_v20  ;;  %v1705_v21 = vadd.f32 %v1704_v62, %v596_v43 }
 0x10e   :  { %v598_v46 = vld [vmem:[#allocation2 + $0x11f8] sm:$0xff]  ;;  %v659_v5 = vld [vmem:[#allocation2 + $0x13e0] sm:$0xff]  ;;  %v660_v51 = vld [vmem:[#allocation2 + $0x13e8] sm:$0xff]  ;;  %v1923_v34 = vadd.f32 %v1922_v32, %v780_v63  ;;  %v1815_v56 = vadd.f32 %v1814_v14, %v721_v42  ;;  %v1852_v54 = vadd.f32 %v1851_v38, %v722_v7  ;;  %v1888_v37 = vadd.f32 %v1887_v41, %v783_v36 }
 0x10f   :  { %v782_v61 = vld [vmem:[#allocation2 + $0x17b8] sm:$0xff]  ;;  %v723_v39 = vld [vmem:[#allocation2 + $0x15e0] sm:$0xff]  ;;  %v724_v31 = vld [vmem:[#allocation2 + $0x15e8] sm:$0xff]  ;;  %v1742_v0 = vadd.f32 %v1741_v1, %v659_v5  ;;  %v1779_v27 = vadd.f32 %v1778_v35, %v660_v51  ;;  %v1672_v13 = vrot.slane %v1671_v55, 2  ;;  %v1706_v16 = vadd.f32 %v1705_v21, %v598_v46 }
 0x110   :  { %v785_v12 = vld [vmem:[#allocation2 + $0x17d0] sm:$0xff]  ;;  %v662_v26 = vld [vmem:[#allocation2 + $0x13f8] sm:$0xff]  ;;  %v784_v25 = vld [vmem:[#allocation2 + $0x17c8] sm:$0xff]  ;;  %v1924_v8 = vadd.f32 %v1923_v34, %v782_v61  ;;  %v1816_v15 = vadd.f32 %v1815_v56, %v723_v39  ;;  %v1853_v28 = vadd.f32 %v1852_v54, %v724_v31  ;;  %v2449_v46 = vadd.f32 %v1637_v52, %v2439_v19 }
 0x111   :  { %v661_v45 = vld [vmem:[#allocation2 + $0x13f0] sm:$0xff]  ;;  %v726_v24 = vld [vmem:[#allocation2 + $0x15f8] sm:$0xff]  ;;  %v787_v22 = vld [vmem:[#allocation2 + $0x17e0] sm:$0xff]  ;;  %v1889_v47 = vadd.f32 %v1888_v37, %v785_v12  ;;  %v1780_v7 = vadd.f32 %v1779_v27, %v662_v26  ;;  %v1673_v32 = vadd.f32 %v1672_v13, %v1671_v55  ;;  %v1707_v50 = vrot.slane %v1706_v16, 4 }
 0x112   :  { %v725_v29 = vld [vmem:[#allocation2 + $0x15f0] sm:$0xff]  ;;  %v786_v11 = vld [vmem:[#allocation2 + $0x17d8] sm:$0xff]  ;;  %v1743_v4 = vadd.f32 %v1742_v0, %v661_v45  ;;  %v1925_v20 = vadd.f32 %v1924_v8, %v784_v25  ;;  %v788_v42 = vld [vmem:[#allocation2 + $0x17e8] sm:$0xff]  ;;  %v1854_v44 = vadd.f32 %v1853_v28, %v726_v24  ;;  %2546 = vst [vmem:[#allocation12_spill] sm:$0xff] %v2449_v46 }
 0x113   :  { %v789_v63 = vld [vmem:[#allocation2 + $0x17f0] sm:$0xff]  ;;  %v1817_v36 = vadd.f32 %v1816_v15, %v725_v29  ;;  %v1890_v18 = vadd.f32 %v1889_v47, %v787_v22  ;;  %v790_v61 = vld [vmem:[#allocation2 + $0x17f8] sm:$0xff]  ;;  %v1781_v40 = vrot.slane %v1780_v7, 4  ;;  %v1708_v41 = vadd.f32 %v1707_v50, %v1706_v16  ;;  %v791_v12 = vld [vmem:[#allocation2 + $0x1800] sm:$0xff] }
 0x114   :  { %v1744_v43 = vrot.slane %v1743_v4, 4  ;;  %v1926_v5 = vadd.f32 %v1925_v20, %v786_v11  ;;  %v1855_v14 = vrot.slane %v1854_v44, 4  ;;  %v793_v10 = vld [vmem:[#allocation2 + $0x1810] sm:$0xff]  ;;  %v1674_v26 = vrot.slane %v1673_v32, 1  ;;  %v795_v54 = vld [vmem:[#allocation2 + $0x1820] sm:$0xff]  ;;  %v792_v0 = vld [vmem:[#allocation2 + $0x1808] sm:$0xff] }
 0x115   :  { %v1818_v51 = vrot.slane %v1817_v36, 4  ;;  %v1891_v38 = vadd.f32 %v1890_v18, %v789_v63  ;;  %v1782_v62 = vadd.f32 %v1781_v40, %v1780_v7  ;;  %v1709_v25 = vrot.slane %v1708_v41, 2  ;;  %v794_v8 = vld [vmem:[#allocation2 + $0x1818] sm:$0xff]  ;;  %v797_v11 = vld [vmem:[#allocation2 + $0x1830] sm:$0xff]  ;;  %v799_v63 = vld [vmem:[#allocation2 + $0x1840] sm:$0xff] }
 0x116   :  { %v1745_v39 = vadd.f32 %v1744_v43, %v1743_v4  ;;  %v1927_v31 = vadd.f32 %v1926_v5, %v788_v42  ;;  %v1856_v34 = vadd.f32 %v1855_v14, %v1854_v44  ;;  %v1935_v21 = vadd.f32 %v793_v10, %v791_v12  ;;  %v855_v13 = vld [vmem:[#allocation2 + $0x1a00] sm:$0xff]  ;;  %v856_v16 = vld [vmem:[#allocation2 + $0x1a08] sm:$0xff]  ;;  %v801_v44 = vld [vmem:[#allocation2 + $0x1850] sm:$0xff] }
 0x117   :  { %v1819_v1 = vadd.f32 %v1818_v51, %v1817_v36  ;;  %v1892_v45 = vrot.slane %v1891_v38, 4  ;;  %v1783_v37 = vrot.slane %v1782_v62, 2  ;;  %v1710_v19 = vadd.f32 %v1709_v25, %v1708_v41  ;;  %v796_v36 = vld [vmem:[#allocation2 + $0x1828] sm:$0xff]  ;;  %v857_v18 = vld [vmem:[#allocation2 + $0x1a10] sm:$0xff]  ;;  %v858_v50 = vld [vmem:[#allocation2 + $0x1a18] sm:$0xff] }
 0x118   :  { %v1746_v35 = vrot.slane %v1745_v39, 2  ;;  %v1928_v56 = vadd.f32 %v1927_v31, %v790_v61  ;;  %v1857_v24 = vrot.slane %v1856_v34, 2  ;;  %v1936_v7 = vadd.f32 %v1935_v21, %v795_v54  ;;  %v919_v43 = vld [vmem:[#allocation2 + $0x1c00] sm:$0xff]  ;;  %v920_v14 = vld [vmem:[#allocation2 + $0x1c08] sm:$0xff]  ;;  %v922_v41 = vld [vmem:[#allocation2 + $0x1c18] sm:$0xff] }
 0x119   :  { %v1820_v29 = vrot.slane %v1819_v1, 2  ;;  %v1893_v22 = vadd.f32 %v1892_v45, %v1891_v38  ;;  %v1784_v27 = vadd.f32 %v1783_v37, %v1782_v62  ;;  %v1711_v4 = vrot.slane %v1710_v19, 1  ;;  %v921_v38 = vld [vmem:[#allocation2 + $0x1c10] sm:$0xff]  ;;  %v798_v62 = vld [vmem:[#allocation2 + $0x1838] sm:$0xff]  ;;  %v860_v45 = vld [vmem:[#allocation2 + $0x1a28] sm:$0xff] }
 0x11a   :  { %v1747_v52 = vadd.f32 %v1746_v35, %v1745_v39  ;;  %v1929_v55 = vrot.slane %v1928_v56, 4  ;;  %v1858_v28 = vadd.f32 %v1857_v24, %v1856_v34  ;;  %v2451_v39 = vadd.f32 %v1674_v26, %v1673_v32  ;;  %v859_v34 = vld [vmem:[#allocation2 + $0x1a20] sm:$0xff]  ;;  %v985_v32 = vld [vmem:[#allocation2 + $0x1e10] sm:$0xff]  ;;  %v800_v21 = vld [vmem:[#allocation2 + $0x1848] sm:$0xff] }
 0x11b   :  { %v1821_v15 = vadd.f32 %v1820_v29, %v1819_v1  ;;  %v1894_v47 = vrot.slane %v1893_v22, 2  ;;  %v1785_v5 = vrot.slane %v1784_v27, 1  ;;  %v2453_v31 = vadd.f32 %v1711_v4, %v1710_v19  ;;  %v803_v1 = vld [vmem:[#allocation2 + $0x1860] sm:$0xff]  ;;  %v924_v29 = vld [vmem:[#allocation2 + $0x1c28] sm:$0xff]  ;;  %v862_v4 = vld [vmem:[#allocation2 + $0x1a38] sm:$0xff] }
 0x11c   :  { %v1748_v20 = vrot.slane %v1747_v52, 1  ;;  %v1930_v42 = vadd.f32 %v1929_v55, %v1928_v56  ;;  %v1859_v40 = vrot.slane %v1858_v28, 1  ;;  %v1937_v10 = vadd.f32 %v1936_v7, %v797_v11  ;;  %v923_v25 = vld [vmem:[#allocation2 + $0x1c20] sm:$0xff]  ;;  %v805_v11 = vld [vmem:[#allocation2 + $0x1870] sm:$0xff] }
 0x11d   :  { %v1822_v61 = vrot.slane %v1821_v15, 1  ;;  %v1895_v51 = vadd.f32 %v1894_v47, %v1893_v22  ;;  %v2457_v56 = vadd.f32 %v1785_v5, %v1784_v27  ;;  %v983_v24 = vld [vmem:[#allocation2 + $0x1e00] sm:$0xff]  ;;  %v1972_v19 = vadd.f32 %v794_v8, %v792_v0  ;;  %v861_v47 = vld [vmem:[#allocation2 + $0x1a30] sm:$0xff]  ;;  %v802_v0 = vld [vmem:[#allocation2 + $0x1858] sm:$0xff] }
 0x11e   :  { %v1931_v12 = vrot.slane %v1930_v42, 2  ;;  %v2455_v35 = vadd.f32 %v1748_v20, %v1747_v52  ;;  %v1938_v22 = vadd.f32 %v1937_v10, %v799_v63  ;;  %v2009_v55 = vadd.f32 %v857_v18, %v855_v13  ;;  %v863_v7 = vld [vmem:[#allocation2 + $0x1a40] sm:$0xff]  ;;  %v925_v5 = vld [vmem:[#allocation2 + $0x1c30] sm:$0xff]  ;;  %v864_v13 = vld [vmem:[#allocation2 + $0x1a48] sm:$0xff] }
 0x11f   :  { %v2459_v54 = vadd.f32 %v1822_v61, %v1821_v15  ;;  %v1896_v37 = vrot.slane %v1895_v51, 1  ;;  %v2463_v52 = vadd.f32 %v1859_v40, %v1858_v28  ;;  %v2046_v27 = vadd.f32 %v858_v50, %v856_v16  ;;  %v926_v61 = vld [vmem:[#allocation2 + $0x1c38] sm:$0xff]  ;;  %v987_v46 = vld [vmem:[#allocation2 + $0x1e20] sm:$0xff]  ;;  %v984_v18 = vld [vmem:[#allocation2 + $0x1e08] sm:$0xff] }
 0x120   :  { %v2461_v26 = vadd.f32 %v1931_v12, %v1930_v42  ;;  %v2083_v20 = vadd.f32 %v921_v38, %v919_v43  ;;  %v2120_v15 = vadd.f32 %v922_v41, %v920_v14  ;;  %v1939_v42 = vadd.f32 %v1938_v22, %v801_v44  ;;  %v807_v8 = vld [vmem:[#allocation2 + $0x1880] sm:$0xff]  ;;  %v986_v10 = vld [vmem:[#allocation2 + $0x1e18] sm:$0xff]  ;;  %v928_v50 = vld [vmem:[#allocation2 + $0x1c48] sm:$0xff] }
 0x121   :  { %2547 = vst [vmem:[#allocation13_spill] sm:$0xff] %v2463_v52  ;;  %v2465_v30 = vadd.f32 %v1896_v37, %v1895_v51  ;;  %v1973_v12 = vadd.f32 %v1972_v19, %v796_v36  ;;  %v2010_v63 = vadd.f32 %v2009_v55, %v859_v34  ;;  %v2047_v60 = vadd.f32 %v2046_v27, %v860_v45  ;;  %v927_v16 = vld [vmem:[#allocation2 + $0x1c40] sm:$0xff]  ;;  %v989_v43 = vld [vmem:[#allocation2 + $0x1e30] sm:$0xff]  ;;  %v804_v44 = vld [vmem:[#allocation2 + $0x1868] sm:$0xff] }
 0x122   :  { %v2084_v3 = vadd.f32 %v2083_v20, %v923_v25  ;;  %v2121_v28 = vadd.f32 %v2120_v15, %v924_v29  ;;  %v2157_v40 = vadd.f32 %v985_v32, %v983_v24  ;;  %v1940_v38 = vadd.f32 %v1939_v42, %v803_v1  ;;  %v809_v36 = vld [vmem:[#allocation2 + $0x1890] sm:$0xff]  ;;  %v866_v37 = vld [vmem:[#allocation2 + $0x1a58] sm:$0xff]  ;;  %v988_v22 = vld [vmem:[#allocation2 + $0x1e28] sm:$0xff] }
 0x123   :  { %2548 = vst [vmem:[#allocation14_spill] sm:$0xff] %v2465_v30  ;;  %v1974_v51 = vadd.f32 %v1973_v12, %v798_v62  ;;  %v2011_v41 = vadd.f32 %v2010_v63, %v861_v47  ;;  %v865_v34 = vld [vmem:[#allocation2 + $0x1a50] sm:$0xff]  ;;  %v2048_v19 = vadd.f32 %v2047_v60, %v862_v4  ;;  %v930_v29 = vld [vmem:[#allocation2 + $0x1c58] sm:$0xff]  ;;  %v991_v24 = vld [vmem:[#allocation2 + $0x1e40] sm:$0xff]  ;;  %v2194_v15 = vadd.f32 %v986_v10, %v984_v18 }
 0x124   :  { %v2085_v55 = vadd.f32 %v2084_v3, %v925_v5  ;;  %v2122_v52 = vadd.f32 %v2121_v28, %v926_v61  ;;  %v2158_v45 = vadd.f32 %v2157_v40, %v987_v46  ;;  %v929_v25 = vld [vmem:[#allocation2 + $0x1c50] sm:$0xff]  ;;  %v1941_v32 = vadd.f32 %v1940_v38, %v805_v11  ;;  %v806_v14 = vld [vmem:[#allocation2 + $0x1878] sm:$0xff]  ;;  %v811_v1 = vld [vmem:[#allocation2 + $0x18a0] sm:$0xff] }
 0x125   :  { %v1975_v27 = vadd.f32 %v1974_v51, %v800_v21  ;;  %v2012_v20 = vadd.f32 %v2011_v41, %v863_v7  ;;  %v867_v62 = vld [vmem:[#allocation2 + $0x1a60] sm:$0xff]  ;;  %v868_v47 = vld [vmem:[#allocation2 + $0x1a68] sm:$0xff]  ;;  %v990_v42 = vld [vmem:[#allocation2 + $0x1e38] sm:$0xff]  ;;  %v2049_v12 = vadd.f32 %v2048_v19, %v864_v13  ;;  %v2195_v28 = vadd.f32 %v2194_v15, %v988_v22 }
 0x126   :  { %v2086_v63 = vadd.f32 %v2085_v55, %v927_v16  ;;  %v2123_v30 = vadd.f32 %v2122_v52, %v928_v50  ;;  %v2159_v33 = vadd.f32 %v2158_v45, %v989_v43  ;;  %v931_v60 = vld [vmem:[#allocation2 + $0x1c60] sm:$0xff]  ;;  %v932_v3 = vld [vmem:[#allocation2 + $0x1c68] sm:$0xff]  ;;  %v993_v4 = vld [vmem:[#allocation2 + $0x1e50] sm:$0xff]  ;;  %v1942_v46 = vadd.f32 %v1941_v32, %v807_v8 }
 0x127   :  { %v1976_v5 = vadd.f32 %v1975_v27, %v802_v0  ;;  %v2013_v61 = vadd.f32 %v2012_v20, %v865_v34  ;;  %v808_v11 = vld [vmem:[#allocation2 + $0x1888] sm:$0xff]  ;;  %v813_v21 = vld [vmem:[#allocation2 + $0x18b0] sm:$0xff]  ;;  %v870_v18 = vld [vmem:[#allocation2 + $0x1a78] sm:$0xff]  ;;  %v2050_v40 = vadd.f32 %v2049_v12, %v866_v37  ;;  %v2196_v55 = vadd.f32 %v2195_v28, %v990_v42 }
 0x128   :  { %v869_v7 = vld [vmem:[#allocation2 + $0x1a70] sm:$0xff]  ;;  %v992_v10 = vld [vmem:[#allocation2 + $0x1e48] sm:$0xff]  ;;  %v2087_v38 = vadd.f32 %v2086_v63, %v929_v25  ;;  %v2124_v51 = vadd.f32 %v2123_v30, %v930_v29  ;;  %v2160_v41 = vadd.f32 %v2159_v33, %v991_v24  ;;  %v934_v16 = vld [vmem:[#allocation2 + $0x1c78] sm:$0xff]  ;;  %v1943_v50 = vadd.f32 %v1942_v46, %v809_v36 }
 0x129   :  { %v933_v13 = vld [vmem:[#allocation2 + $0x1c70] sm:$0xff]  ;;  %v995_v52 = vld [vmem:[#allocation2 + $0x1e60] sm:$0xff]  ;;  %v1977_v43 = vadd.f32 %v1976_v5, %v804_v44  ;;  %v2014_v19 = vadd.f32 %v2013_v61, %v867_v62  ;;  %v810_v8 = vld [vmem:[#allocation2 + $0x1898] sm:$0xff]  ;;  %v2051_v32 = vadd.f32 %v2050_v40, %v868_v47  ;;  %v2197_v12 = vadd.f32 %v2196_v55, %v992_v10 }
 0x12a   :  { %v815_v0 = vld [vmem:[#allocation2 + $0x18c0] sm:$0xff]  ;;  %v872_v22 = vld [vmem:[#allocation2 + $0x1a88] sm:$0xff]  ;;  %v994_v45 = vld [vmem:[#allocation2 + $0x1e58] sm:$0xff]  ;;  %v2088_v27 = vadd.f32 %v2087_v38, %v931_v60  ;;  %v2125_v20 = vadd.f32 %v2124_v51, %v932_v3  ;;  %v2161_v15 = vadd.f32 %v2160_v41, %v993_v4  ;;  %v1944_v33 = vadd.f32 %v1943_v50, %v811_v1 }
 0x12b   :  { %v871_v34 = vld [vmem:[#allocation2 + $0x1a80] sm:$0xff]  ;;  %v936_v25 = vld [vmem:[#allocation2 + $0x1c88] sm:$0xff]  ;;  %v997_v30 = vld [vmem:[#allocation2 + $0x1e70] sm:$0xff]  ;;  %v1978_v29 = vadd.f32 %v1977_v43, %v806_v14  ;;  %v2015_v24 = vadd.f32 %v2014_v19, %v869_v7  ;;  %v2052_v46 = vadd.f32 %v2051_v32, %v870_v18  ;;  %v2198_v51 = vadd.f32 %v2197_v12, %v994_v45 }
 0x12c   :  { %v935_v37 = vld [vmem:[#allocation2 + $0x1c80] sm:$0xff]  ;;  %v812_v36 = vld [vmem:[#allocation2 + $0x18a8] sm:$0xff]  ;;  %v817_v44 = vld [vmem:[#allocation2 + $0x18d0] sm:$0xff]  ;;  %v2089_v5 = vadd.f32 %v2088_v27, %v933_v13  ;;  %v2126_v61 = vadd.f32 %v2125_v20, %v934_v16  ;;  %v2162_v28 = vadd.f32 %v2161_v15, %v995_v52  ;;  %v1945_v4 = vadd.f32 %v1944_v33, %v813_v21 }
 0x12d   :  { %v873_v62 = vld [vmem:[#allocation2 + $0x1a90] sm:$0xff]  ;;  %v874_v42 = vld [vmem:[#allocation2 + $0x1a98] sm:$0xff]  ;;  %v996_v63 = vld [vmem:[#allocation2 + $0x1e68] sm:$0xff]  ;;  %v1979_v40 = vadd.f32 %v1978_v29, %v808_v11  ;;  %v2016_v38 = vadd.f32 %v2015_v24, %v871_v34  ;;  %v2053_v50 = vadd.f32 %v2052_v46, %v872_v22 }
 0x12e   :  { %v937_v47 = vld [vmem:[#allocation2 + $0x1c90] sm:$0xff]  ;;  %v938_v60 = vld [vmem:[#allocation2 + $0x1c98] sm:$0xff]  ;;  %v999_v3 = vld [vmem:[#allocation2 + $0x1e80] sm:$0xff]  ;;  %v2090_v43 = vadd.f32 %v2089_v5, %v935_v37  ;;  %v2127_v19 = vadd.f32 %v2126_v61, %v936_v25  ;;  %v2163_v55 = vadd.f32 %v2162_v28, %v997_v30  ;;  %v1946_v52 = vadd.f32 %v1945_v4, %v815_v0 }
 0x12f   :  { %v814_v1 = vld [vmem:[#allocation2 + $0x18b8] sm:$0xff]  ;;  %v819_v14 = vld [vmem:[#allocation2 + $0x18e0] sm:$0xff]  ;;  %v876_v10 = vld [vmem:[#allocation2 + $0x1aa8] sm:$0xff]  ;;  %v1980_v32 = vadd.f32 %v1979_v40, %v810_v8  ;;  %v2017_v27 = vadd.f32 %v2016_v38, %v873_v62  ;;  %v2199_v20 = vadd.f32 %v2198_v51, %v996_v63  ;;  %v2054_v33 = vadd.f32 %v2053_v50, %v874_v42 }
 0x130   :  { %v875_v7 = vld [vmem:[#allocation2 + $0x1aa0] sm:$0xff]  ;;  %v998_v41 = vld [vmem:[#allocation2 + $0x1e78] sm:$0xff]  ;;  %v940_v13 = vld [vmem:[#allocation2 + $0x1ca8] sm:$0xff]  ;;  %v2091_v29 = vadd.f32 %v2090_v43, %v937_v47  ;;  %v2128_v24 = vadd.f32 %v2127_v19, %v938_v60  ;;  %v2164_v12 = vadd.f32 %v2163_v55, %v999_v3  ;;  %v1947_v30 = vadd.f32 %v1946_v52, %v817_v44 }
 0x131   :  { %v939_v18 = vld [vmem:[#allocation2 + $0x1ca0] sm:$0xff]  ;;  %v1001_v16 = vld [vmem:[#allocation2 + $0x1e90] sm:$0xff]  ;;  %v816_v21 = vld [vmem:[#allocation2 + $0x18c8] sm:$0xff]  ;;  %v1981_v46 = vadd.f32 %v1980_v32, %v812_v36  ;;  %v2018_v5 = vadd.f32 %v2017_v27, %v875_v7  ;;  %v2200_v61 = vadd.f32 %v2199_v20, %v998_v41  ;;  %v2055_v4 = vadd.f32 %v2054_v33, %v876_v10 }
 0x132   :  { %v821_v11 = vld [vmem:[#allocation2 + $0x18f0] sm:$0xff]  ;;  %v878_v45 = vld [vmem:[#allocation2 + $0x1ab8] sm:$0xff]  ;;  %v1000_v15 = vld [vmem:[#allocation2 + $0x1e88] sm:$0xff]  ;;  %v2092_v40 = vadd.f32 %v2091_v29, %v939_v18  ;;  %v2129_v38 = vadd.f32 %v2128_v24, %v940_v13  ;;  %v2165_v51 = vadd.f32 %v2164_v12, %v1001_v16  ;;  %v1948_v3 = vadd.f32 %v1947_v30, %v819_v14 }
 0x133   :  { %v877_v34 = vld [vmem:[#allocation2 + $0x1ab0] sm:$0xff]  ;;  %v942_v37 = vld [vmem:[#allocation2 + $0x1cb8] sm:$0xff]  ;;  %v1003_v25 = vld [vmem:[#allocation2 + $0x1ea0] sm:$0xff]  ;;  %v1982_v50 = vadd.f32 %v1981_v46, %v814_v1  ;;  %v2201_v19 = vadd.f32 %v2200_v61, %v1000_v15  ;;  %v2056_v52 = vadd.f32 %v2055_v4, %v878_v45 }
 0x134   :  { %v941_v22 = vld [vmem:[#allocation2 + $0x1cb0] sm:$0xff]  ;;  %v818_v0 = vld [vmem:[#allocation2 + $0x18d8] sm:$0xff]  ;;  %v823_v8 = vld [vmem:[#allocation2 + $0x1900] sm:$0xff]  ;;  %v2019_v43 = vadd.f32 %v2018_v5, %v877_v34  ;;  %v2130_v27 = vadd.f32 %v2129_v38, %v942_v37  ;;  %v2166_v20 = vadd.f32 %v2165_v51, %v1003_v25  ;;  %v1949_v16 = vadd.f32 %v1948_v3, %v821_v11 }
 0x135   :  { %v879_v62 = vld [vmem:[#allocation2 + $0x1ac0] sm:$0xff]  ;;  %v880_v63 = vld [vmem:[#allocation2 + $0x1ac8] sm:$0xff]  ;;  %v1002_v28 = vld [vmem:[#allocation2 + $0x1e98] sm:$0xff]  ;;  %v2093_v32 = vadd.f32 %v2092_v40, %v941_v22  ;;  %v1983_v33 = vadd.f32 %v1982_v50, %v816_v21 }
 0x136   :  { %v943_v42 = vld [vmem:[#allocation2 + $0x1cc0] sm:$0xff]  ;;  %v944_v47 = vld [vmem:[#allocation2 + $0x1cc8] sm:$0xff]  ;;  %v1005_v60 = vld [vmem:[#allocation2 + $0x1eb0] sm:$0xff]  ;;  %v2020_v29 = vadd.f32 %v2019_v43, %v879_v62  ;;  %v2202_v24 = vadd.f32 %v2201_v19, %v1002_v28  ;;  %v2057_v30 = vadd.f32 %v2056_v52, %v880_v63  ;;  %v1950_v25 = vadd.f32 %v1949_v16, %v823_v8 }
 0x137   :  { %v820_v44 = vld [vmem:[#allocation2 + $0x18e8] sm:$0xff]  ;;  %v825_v36 = vld [vmem:[#allocation2 + $0x1910] sm:$0xff]  ;;  %v882_v41 = vld [vmem:[#allocation2 + $0x1ad8] sm:$0xff]  ;;  %v2094_v46 = vadd.f32 %v2093_v32, %v943_v42  ;;  %v2131_v5 = vadd.f32 %v2130_v27, %v944_v47  ;;  %v2167_v61 = vadd.f32 %v2166_v20, %v1005_v60  ;;  %v1984_v4 = vadd.f32 %v1983_v33, %v818_v0 }
 0x138   :  { %v881_v7 = vld [vmem:[#allocation2 + $0x1ad0] sm:$0xff]  ;;  %v1004_v55 = vld [vmem:[#allocation2 + $0x1ea8] sm:$0xff]  ;;  %v946_v18 = vld [vmem:[#allocation2 + $0x1cd8] sm:$0xff]  ;;  %v2058_v3 = vadd.f32 %v2057_v30, %v882_v41  ;;  %v1951_v60 = vadd.f32 %v1950_v25, %v825_v36 }
 0x139   :  { %v945_v10 = vld [vmem:[#allocation2 + $0x1cd0] sm:$0xff]  ;;  %v1007_v13 = vld [vmem:[#allocation2 + $0x1ec0] sm:$0xff]  ;;  %v822_v14 = vld [vmem:[#allocation2 + $0x18f8] sm:$0xff]  ;;  %v2021_v40 = vadd.f32 %v2020_v29, %v881_v7  ;;  %v2203_v38 = vadd.f32 %v2202_v24, %v1004_v55  ;;  %v2132_v43 = vadd.f32 %v2131_v5, %v946_v18  ;;  %v1985_v52 = vadd.f32 %v1984_v4, %v820_v44 }
 0x13a   :  { %v827_v1 = vld [vmem:[#allocation2 + $0x1920] sm:$0xff]  ;;  %v884_v15 = vld [vmem:[#allocation2 + $0x1ae8] sm:$0xff]  ;;  %v1006_v12 = vld [vmem:[#allocation2 + $0x1eb8] sm:$0xff]  ;;  %v2095_v50 = vadd.f32 %v2094_v46, %v945_v10  ;;  %v2168_v19 = vadd.f32 %v2167_v61, %v1007_v13 }
 0x13b   :  { %v883_v34 = vld [vmem:[#allocation2 + $0x1ae0] sm:$0xff]  ;;  %v948_v22 = vld [vmem:[#allocation2 + $0x1ce8] sm:$0xff]  ;;  %v1009_v37 = vld [vmem:[#allocation2 + $0x1ed0] sm:$0xff]  ;;  %v2204_v27 = vadd.f32 %v2203_v38, %v1006_v12  ;;  %v2059_v16 = vadd.f32 %v2058_v3, %v884_v15  ;;  %v1952_v13 = vadd.f32 %v1951_v60, %v827_v1  ;;  %v1986_v30 = vadd.f32 %v1985_v52, %v822_v14 }
 0x13c   :  { %v947_v45 = vld [vmem:[#allocation2 + $0x1ce0] sm:$0xff]  ;;  %v824_v11 = vld [vmem:[#allocation2 + $0x1908] sm:$0xff]  ;;  %v829_v21 = vld [vmem:[#allocation2 + $0x1930] sm:$0xff]  ;;  %v2022_v32 = vadd.f32 %v2021_v40, %v883_v34  ;;  %v2133_v29 = vadd.f32 %v2132_v43, %v948_v22  ;;  %v2169_v24 = vadd.f32 %v2168_v19, %v1009_v37 }
 0x13d   :  { %v885_v62 = vld [vmem:[#allocation2 + $0x1af0] sm:$0xff]  ;;  %v886_v28 = vld [vmem:[#allocation2 + $0x1af8] sm:$0xff]  ;;  %v1008_v51 = vld [vmem:[#allocation2 + $0x1ec8] sm:$0xff]  ;;  %v2096_v33 = vadd.f32 %v2095_v50, %v947_v45  ;;  %v1953_v37 = vadd.f32 %v1952_v13, %v829_v21  ;;  %v1987_v3 = vadd.f32 %v1986_v30, %v824_v11 }
 0x13e   :  { %v949_v63 = vld [vmem:[#allocation2 + $0x1cf0] sm:$0xff]  ;;  %v950_v42 = vld [vmem:[#allocation2 + $0x1cf8] sm:$0xff]  ;;  %v1011_v47 = vld [vmem:[#allocation2 + $0x1ee0] sm:$0xff]  ;;  %v2023_v46 = vadd.f32 %v2022_v32, %v885_v62  ;;  %v2205_v5 = vadd.f32 %v2204_v27, %v1008_v51  ;;  %v2060_v25 = vadd.f32 %v2059_v16, %v886_v28 }
 0x13f   :  { %v826_v8 = vld [vmem:[#allocation2 + $0x1918] sm:$0xff]  ;;  %v831_v0 = vld [vmem:[#allocation2 + $0x1940] sm:$0xff]  ;;  %v888_v55 = vld [vmem:[#allocation2 + $0x1b08] sm:$0xff]  ;;  %v2097_v4 = vadd.f32 %v2096_v33, %v949_v63  ;;  %v2134_v40 = vadd.f32 %v2133_v29, %v950_v42  ;;  %v2170_v38 = vadd.f32 %v2169_v24, %v1011_v47 }
 0x140   :  { %v887_v7 = vld [vmem:[#allocation2 + $0x1b00] sm:$0xff]  ;;  %v1010_v20 = vld [vmem:[#allocation2 + $0x1ed8] sm:$0xff]  ;;  %v952_v10 = vld [vmem:[#allocation2 + $0x1d08] sm:$0xff]  ;;  %v2061_v60 = vadd.f32 %v2060_v25, %v888_v55  ;;  %v1954_v47 = vadd.f32 %v1953_v37, %v831_v0  ;;  %v1988_v16 = vadd.f32 %v1987_v3, %v826_v8 }
 0x141   :  { %v951_v41 = vld [vmem:[#allocation2 + $0x1d00] sm:$0xff]  ;;  %v1013_v18 = vld [vmem:[#allocation2 + $0x1ef0] sm:$0xff]  ;;  %v828_v36 = vld [vmem:[#allocation2 + $0x1928] sm:$0xff]  ;;  %v2024_v50 = vadd.f32 %v2023_v46, %v887_v7  ;;  %v2206_v43 = vadd.f32 %v2205_v5, %v1010_v20  ;;  %v2135_v32 = vadd.f32 %v2134_v40, %v952_v10 }
 0x142   :  { %v833_v44 = vld [vmem:[#allocation2 + $0x1950] sm:$0xff]  ;;  %v890_v12 = vld [vmem:[#allocation2 + $0x1b18] sm:$0xff]  ;;  %v1012_v61 = vld [vmem:[#allocation2 + $0x1ee8] sm:$0xff]  ;;  %v2098_v52 = vadd.f32 %v2097_v4, %v951_v41  ;;  %v2171_v27 = vadd.f32 %v2170_v38, %v1013_v18  ;;  %v1989_v25 = vadd.f32 %v1988_v16, %v828_v36 }
 0x143   :  { %v889_v34 = vld [vmem:[#allocation2 + $0x1b10] sm:$0xff]  ;;  %v954_v45 = vld [vmem:[#allocation2 + $0x1d18] sm:$0xff]  ;;  %v1015_v22 = vld [vmem:[#allocation2 + $0x1f00] sm:$0xff]  ;;  %v2207_v29 = vadd.f32 %v2206_v43, %v1012_v61  ;;  %v2062_v13 = vadd.f32 %v2061_v60, %v890_v12  ;;  %v1955_v18 = vadd.f32 %v1954_v47, %v833_v44 }
 0x144   :  { %v953_v15 = vld [vmem:[#allocation2 + $0x1d10] sm:$0xff]  ;;  %v830_v1 = vld [vmem:[#allocation2 + $0x1938] sm:$0xff]  ;;  %v835_v14 = vld [vmem:[#allocation2 + $0x1960] sm:$0xff]  ;;  %v2025_v33 = vadd.f32 %v2024_v50, %v889_v34  ;;  %v2136_v46 = vadd.f32 %v2135_v32, %v954_v45  ;;  %v2172_v5 = vadd.f32 %v2171_v27, %v1015_v22 }
 0x145   :  { %v891_v62 = vld [vmem:[#allocation2 + $0x1b20] sm:$0xff]  ;;  %v892_v51 = vld [vmem:[#allocation2 + $0x1b28] sm:$0xff]  ;;  %v1014_v19 = vld [vmem:[#allocation2 + $0x1ef8] sm:$0xff]  ;;  %v2099_v30 = vadd.f32 %v2098_v52, %v953_v15  ;;  %v1956_v22 = vadd.f32 %v1955_v18, %v835_v14  ;;  %v1990_v60 = vadd.f32 %v1989_v25, %v830_v1 }
 0x146   :  { %v955_v28 = vld [vmem:[#allocation2 + $0x1d20] sm:$0xff]  ;;  %v956_v63 = vld [vmem:[#allocation2 + $0x1d28] sm:$0xff]  ;;  %v1017_v42 = vld [vmem:[#allocation2 + $0x1f10] sm:$0xff]  ;;  %v2026_v4 = vadd.f32 %v2025_v33, %v891_v62  ;;  %v2208_v40 = vadd.f32 %v2207_v29, %v1014_v19  ;;  %v2063_v37 = vadd.f32 %v2062_v13, %v892_v51 }
 0x147   :  { %v832_v21 = vld [vmem:[#allocation2 + $0x1948] sm:$0xff]  ;;  %v837_v11 = vld [vmem:[#allocation2 + $0x1970] sm:$0xff]  ;;  %v894_v20 = vld [vmem:[#allocation2 + $0x1b38] sm:$0xff]  ;;  %v2100_v3 = vadd.f32 %v2099_v30, %v955_v28  ;;  %v2137_v50 = vadd.f32 %v2136_v46, %v956_v63  ;;  %v2173_v43 = vadd.f32 %v2172_v5, %v1017_v42 }
 0x148   :  { %v893_v7 = vld [vmem:[#allocation2 + $0x1b30] sm:$0xff]  ;;  %v1016_v24 = vld [vmem:[#allocation2 + $0x1f08] sm:$0xff]  ;;  %v958_v41 = vld [vmem:[#allocation2 + $0x1d38] sm:$0xff]  ;;  %v2064_v47 = vadd.f32 %v2063_v37, %v894_v20  ;;  %v1957_v42 = vadd.f32 %v1956_v22, %v837_v11  ;;  %v1991_v13 = vadd.f32 %v1990_v60, %v832_v21 }
 0x149   :  { %v957_v55 = vld [vmem:[#allocation2 + $0x1d30] sm:$0xff]  ;;  %v1019_v10 = vld [vmem:[#allocation2 + $0x1f20] sm:$0xff]  ;;  %v834_v0 = vld [vmem:[#allocation2 + $0x1958] sm:$0xff]  ;;  %v2027_v52 = vadd.f32 %v2026_v4, %v893_v7  ;;  %v2209_v32 = vadd.f32 %v2208_v40, %v1016_v24  ;;  %v2138_v33 = vadd.f32 %v2137_v50, %v958_v41 }
 0x14a   :  { %v839_v8 = vld [vmem:[#allocation2 + $0x1980] sm:$0xff]  ;;  %v896_v61 = vld [vmem:[#allocation2 + $0x1b48] sm:$0xff]  ;;  %v1018_v38 = vld [vmem:[#allocation2 + $0x1f18] sm:$0xff]  ;;  %v2101_v16 = vadd.f32 %v2100_v3, %v957_v55  ;;  %v2174_v29 = vadd.f32 %v2173_v43, %v1019_v10  ;;  %v1992_v37 = vadd.f32 %v1991_v13, %v834_v0 }
 0x14b   :  { %v895_v34 = vld [vmem:[#allocation2 + $0x1b40] sm:$0xff]  ;;  %v960_v15 = vld [vmem:[#allocation2 + $0x1d48] sm:$0xff]  ;;  %v1021_v45 = vld [vmem:[#allocation2 + $0x1f30] sm:$0xff]  ;;  %v2210_v46 = vadd.f32 %v2209_v32, %v1018_v38  ;;  %v2065_v18 = vadd.f32 %v2064_v47, %v896_v61  ;;  %v1958_v10 = vadd.f32 %v1957_v42, %v839_v8 }
 0x14c   :  { %v959_v12 = vld [vmem:[#allocation2 + $0x1d40] sm:$0xff]  ;;  %v836_v44 = vld [vmem:[#allocation2 + $0x1968] sm:$0xff]  ;;  %v841_v36 = vld [vmem:[#allocation2 + $0x1990] sm:$0xff]  ;;  %v2028_v30 = vadd.f32 %v2027_v52, %v895_v34  ;;  %v2139_v4 = vadd.f32 %v2138_v33, %v960_v15  ;;  %v2175_v40 = vadd.f32 %v2174_v29, %v1021_v45 }
 0x14d   :  { %v897_v62 = vld [vmem:[#allocation2 + $0x1b50] sm:$0xff]  ;;  %v898_v19 = vld [vmem:[#allocation2 + $0x1b58] sm:$0xff]  ;;  %v1020_v27 = vld [vmem:[#allocation2 + $0x1f28] sm:$0xff]  ;;  %v2102_v25 = vadd.f32 %v2101_v16, %v959_v12  ;;  %v1959_v45 = vadd.f32 %v1958_v10, %v841_v36  ;;  %v1993_v47 = vadd.f32 %v1992_v37, %v836_v44 }
 0x14e   :  { %v961_v51 = vld [vmem:[#allocation2 + $0x1d50] sm:$0xff]  ;;  %v962_v28 = vld [vmem:[#allocation2 + $0x1d58] sm:$0xff]  ;;  %v1023_v63 = vld [vmem:[#allocation2 + $0x1f40] sm:$0xff]  ;;  %v2029_v3 = vadd.f32 %v2028_v30, %v897_v62  ;;  %v2211_v50 = vadd.f32 %v2210_v46, %v1020_v27  ;;  %v2066_v22 = vadd.f32 %v2065_v18, %v898_v19 }
 0x14f   :  { %v838_v14 = vld [vmem:[#allocation2 + $0x1978] sm:$0xff]  ;;  %v843_v1 = vld [vmem:[#allocation2 + $0x19a0] sm:$0xff]  ;;  %v900_v24 = vld [vmem:[#allocation2 + $0x1b68] sm:$0xff]  ;;  %v2103_v60 = vadd.f32 %v2102_v25, %v961_v51  ;;  %v2140_v52 = vadd.f32 %v2139_v4, %v962_v28  ;;  %v2176_v32 = vadd.f32 %v2175_v40, %v1023_v63 }
 0x150   :  { %v899_v7 = vld [vmem:[#allocation2 + $0x1b60] sm:$0xff]  ;;  %v1022_v5 = vld [vmem:[#allocation2 + $0x1f38] sm:$0xff]  ;;  %v964_v55 = vld [vmem:[#allocation2 + $0x1d68] sm:$0xff]  ;;  %v2067_v42 = vadd.f32 %v2066_v22, %v900_v24  ;;  %v1960_v63 = vadd.f32 %v1959_v45, %v843_v1  ;;  %v1994_v18 = vadd.f32 %v1993_v47, %v838_v14 }
 0x151   :  { %v963_v20 = vld [vmem:[#allocation2 + $0x1d60] sm:$0xff]  ;;  %v1025_v41 = vld [vmem:[#allocation2 + $0x1f50] sm:$0xff]  ;;  %v840_v11 = vld [vmem:[#allocation2 + $0x1988] sm:$0xff]  ;;  %v2030_v16 = vadd.f32 %v2029_v3, %v899_v7  ;;  %v2212_v33 = vadd.f32 %v2211_v50, %v1022_v5  ;;  %v2141_v30 = vadd.f32 %v2140_v52, %v964_v55 }
 0x152   :  { %v845_v21 = vld [vmem:[#allocation2 + $0x19b0] sm:$0xff]  ;;  %v902_v38 = vld [vmem:[#allocation2 + $0x1b78] sm:$0xff]  ;;  %v1024_v43 = vld [vmem:[#allocation2 + $0x1f48] sm:$0xff]  ;;  %v2104_v13 = vadd.f32 %v2103_v60, %v963_v20  ;;  %v2177_v46 = vadd.f32 %v2176_v32, %v1025_v41  ;;  %v1995_v22 = vadd.f32 %v1994_v18, %v840_v11 }
 0x153   :  { %v901_v34 = vld [vmem:[#allocation2 + $0x1b70] sm:$0xff]  ;;  %v966_v12 = vld [vmem:[#allocation2 + $0x1d78] sm:$0xff]  ;;  %v1027_v15 = vld [vmem:[#allocation2 + $0x1f60] sm:$0xff]  ;;  %v2213_v4 = vadd.f32 %v2212_v33, %v1024_v43  ;;  %v2068_v10 = vadd.f32 %v2067_v42, %v902_v38  ;;  %v1961_v41 = vadd.f32 %v1960_v63, %v845_v21 }
 0x154   :  { %v965_v61 = vld [vmem:[#allocation2 + $0x1d70] sm:$0xff]  ;;  %v842_v8 = vld [vmem:[#allocation2 + $0x1998] sm:$0xff]  ;;  %v847_v0 = vld [vmem:[#allocation2 + $0x19c0] sm:$0xff]  ;;  %v2031_v25 = vadd.f32 %v2030_v16, %v901_v34  ;;  %v2142_v3 = vadd.f32 %v2141_v30, %v966_v12  ;;  %v2178_v50 = vadd.f32 %v2177_v46, %v1027_v15 }
 0x155   :  { %v903_v62 = vld [vmem:[#allocation2 + $0x1b80] sm:$0xff]  ;;  %v904_v27 = vld [vmem:[#allocation2 + $0x1b88] sm:$0xff]  ;;  %v1026_v29 = vld [vmem:[#allocation2 + $0x1f58] sm:$0xff]  ;;  %v2105_v37 = vadd.f32 %v2104_v13, %v965_v61  ;;  %v1962_v15 = vadd.f32 %v1961_v41, %v847_v0  ;;  %v1996_v42 = vadd.f32 %v1995_v22, %v842_v8 }
 0x156   :  { %v967_v19 = vld [vmem:[#allocation2 + $0x1d80] sm:$0xff]  ;;  %v968_v51 = vld [vmem:[#allocation2 + $0x1d88] sm:$0xff]  ;;  %v1029_v28 = vld [vmem:[#allocation2 + $0x1f70] sm:$0xff]  ;;  %v2032_v60 = vadd.f32 %v2031_v25, %v903_v62  ;;  %v2214_v52 = vadd.f32 %v2213_v4, %v1026_v29  ;;  %v2069_v45 = vadd.f32 %v2068_v10, %v904_v27 }
 0x157   :  { %v844_v36 = vld [vmem:[#allocation2 + $0x19a8] sm:$0xff]  ;;  %v849_v44 = vld [vmem:[#allocation2 + $0x19d0] sm:$0xff]  ;;  %v906_v5 = vld [vmem:[#allocation2 + $0x1b98] sm:$0xff]  ;;  %v2106_v47 = vadd.f32 %v2105_v37, %v967_v19  ;;  %v2143_v16 = vadd.f32 %v2142_v3, %v968_v51  ;;  %v2179_v33 = vadd.f32 %v2178_v50, %v1029_v28 }
 0x158   :  { %v905_v7 = vld [vmem:[#allocation2 + $0x1b90] sm:$0xff]  ;;  %v1028_v40 = vld [vmem:[#allocation2 + $0x1f68] sm:$0xff]  ;;  %v970_v20 = vld [vmem:[#allocation2 + $0x1d98] sm:$0xff]  ;;  %v2070_v63 = vadd.f32 %v2069_v45, %v906_v5  ;;  %v1963_v28 = vadd.f32 %v1962_v15, %v849_v44  ;;  %v1997_v10 = vadd.f32 %v1996_v42, %v844_v36 }
 0x159   :  { %v969_v24 = vld [vmem:[#allocation2 + $0x1d90] sm:$0xff]  ;;  %v1031_v55 = vld [vmem:[#allocation2 + $0x1f80] sm:$0xff]  ;;  %v846_v1 = vld [vmem:[#allocation2 + $0x19b8] sm:$0xff]  ;;  %v2033_v13 = vadd.f32 %v2032_v60, %v905_v7  ;;  %v2215_v30 = vadd.f32 %v2214_v52, %v1028_v40  ;;  %v2144_v25 = vadd.f32 %v2143_v16, %v970_v20 }
 0x15a   :  { %v851_v14 = vld [vmem:[#allocation2 + $0x19e0] sm:$0xff]  ;;  %v908_v43 = vld [vmem:[#allocation2 + $0x1ba8] sm:$0xff]  ;;  %v1030_v32 = vld [vmem:[#allocation2 + $0x1f78] sm:$0xff]  ;;  %v2107_v18 = vadd.f32 %v2106_v47, %v969_v24  ;;  %v2180_v4 = vadd.f32 %v2179_v33, %v1031_v55  ;;  %v1998_v55 = vadd.f32 %v1997_v10, %v846_v1 }
 0x15b   :  { %v907_v34 = vld [vmem:[#allocation2 + $0x1ba0] sm:$0xff]  ;;  %v972_v61 = vld [vmem:[#allocation2 + $0x1da8] sm:$0xff]  ;;  %v1033_v12 = vld [vmem:[#allocation2 + $0x1f90] sm:$0xff]  ;;  %v2216_v3 = vadd.f32 %v2215_v30, %v1030_v32  ;;  %v2071_v50 = vadd.f32 %v2070_v63, %v908_v43  ;;  %v1964_v20 = vadd.f32 %v1963_v28, %v851_v14 }
 0x15c   :  { %v971_v38 = vld [vmem:[#allocation2 + $0x1da0] sm:$0xff]  ;;  %v848_v21 = vld [vmem:[#allocation2 + $0x19c8] sm:$0xff]  ;;  %v853_v11 = vld [vmem:[#allocation2 + $0x19f0] sm:$0xff]  ;;  %v2034_v37 = vadd.f32 %v2033_v13, %v907_v34  ;;  %v2145_v22 = vadd.f32 %v2144_v25, %v972_v61  ;;  %v2181_v60 = vadd.f32 %v2180_v4, %v1033_v12 }
 0x15d   :  { %v909_v62 = vld [vmem:[#allocation2 + $0x1bb0] sm:$0xff]  ;;  %v910_v29 = vld [vmem:[#allocation2 + $0x1bb8] sm:$0xff]  ;;  %v1032_v46 = vld [vmem:[#allocation2 + $0x1f88] sm:$0xff]  ;;  %v2108_v41 = vadd.f32 %v2107_v18, %v971_v38  ;;  %v1965_v61 = vadd.f32 %v1964_v20, %v853_v11  ;;  %v1999_v12 = vadd.f32 %v1998_v55, %v848_v21 }
 0x15e   :  { %v973_v27 = vld [vmem:[#allocation2 + $0x1db0] sm:$0xff]  ;;  %v974_v19 = vld [vmem:[#allocation2 + $0x1db8] sm:$0xff]  ;;  %v1035_v51 = vld [vmem:[#allocation2 + $0x1fa0] sm:$0xff]  ;;  %v2035_v45 = vadd.f32 %v2034_v37, %v909_v62  ;;  %v2217_v47 = vadd.f32 %v2216_v3, %v1032_v46  ;;  %v2072_v32 = vadd.f32 %v2071_v50, %v910_v29 }
 0x15f   :  { %v850_v0 = vld [vmem:[#allocation2 + $0x19d8] sm:$0xff]  ;;  %v911_v8 = vld [vmem:[#allocation2 + $0x1bc0] sm:$0xff]  ;;  %v912_v7 = vld [vmem:[#allocation2 + $0x1bc8] sm:$0xff]  ;;  %v2109_v33 = vadd.f32 %v2108_v41, %v973_v27  ;;  %v2146_v15 = vadd.f32 %v2145_v22, %v974_v19  ;;  %v2182_v42 = vadd.f32 %v2181_v60, %v1035_v51  ;;  %v1966_v19 = vrot.slane %v1965_v61, 4 }
 0x160   :  { %v1034_v40 = vld [vmem:[#allocation2 + $0x1f98] sm:$0xff]  ;;  %v975_v52 = vld [vmem:[#allocation2 + $0x1dc0] sm:$0xff]  ;;  %v976_v5 = vld [vmem:[#allocation2 + $0x1dc8] sm:$0xff]  ;;  %v2036_v30 = vadd.f32 %v2035_v45, %v911_v8  ;;  %v2073_v46 = vadd.f32 %v2072_v32, %v912_v7  ;;  %v2000_v51 = vadd.f32 %v1999_v12, %v850_v0 }
 0x161   :  { %v1037_v24 = vld [vmem:[#allocation2 + $0x1fb0] sm:$0xff]  ;;  %v852_v16 = vld [vmem:[#allocation2 + $0x19e8] sm:$0xff]  ;;  %v914_v36 = vld [vmem:[#allocation2 + $0x1bd8] sm:$0xff]  ;;  %v2218_v63 = vadd.f32 %v2217_v47, %v1034_v40  ;;  %v2110_v25 = vadd.f32 %v2109_v33, %v975_v52  ;;  %v2147_v4 = vadd.f32 %v2146_v15, %v976_v5  ;;  %v1967_v52 = vadd.f32 %v1966_v19, %v1965_v61 }
 0x162   :  { %v913_v44 = vld [vmem:[#allocation2 + $0x1bd0] sm:$0xff]  ;;  %v1036_v34 = vld [vmem:[#allocation2 + $0x1fa8] sm:$0xff]  ;;  %v978_v43 = vld [vmem:[#allocation2 + $0x1dd8] sm:$0xff]  ;;  %v2183_v28 = vadd.f32 %v2182_v42, %v1037_v24  ;;  %v2074_v8 = vadd.f32 %v2073_v46, %v914_v36  ;;  %v2001_v5 = vadd.f32 %v2000_v51, %v852_v16 }
 0x163   :  { %v977_v13 = vld [vmem:[#allocation2 + $0x1dd0] sm:$0xff]  ;;  %v1039_v38 = vld [vmem:[#allocation2 + $0x1fc0] sm:$0xff]  ;;  %v854_v18 = vld [vmem:[#allocation2 + $0x19f8] sm:$0xff]  ;;  %v2037_v37 = vadd.f32 %v2036_v30, %v913_v44  ;;  %v2219_v3 = vadd.f32 %v2218_v63, %v1036_v34  ;;  %v2148_v41 = vadd.f32 %v2147_v4, %v978_v43  ;;  %v1968_v33 = vrot.slane %v1967_v52, 2 }
 0x164   :  { %v915_v14 = vld [vmem:[#allocation2 + $0x1be0] sm:$0xff]  ;;  %v916_v1 = vld [vmem:[#allocation2 + $0x1be8] sm:$0xff]  ;;  %v1038_v62 = vld [vmem:[#allocation2 + $0x1fb8] sm:$0xff]  ;;  %v2111_v40 = vadd.f32 %v2110_v25, %v977_v13  ;;  %v2184_v22 = vadd.f32 %v2183_v28, %v1039_v38  ;;  %v2002_v15 = vadd.f32 %v2001_v5, %v854_v18  ;;  %v2549_v28 = vrot.slane %v2461_v26, 1 }
 0x165   :  { %v979_v10 = vld [vmem:[#allocation2 + $0x1de0] sm:$0xff]  ;;  %v980_v29 = vld [vmem:[#allocation2 + $0x1de8] sm:$0xff]  ;;  %v1041_v27 = vld [vmem:[#allocation2 + $0x1fd0] sm:$0xff]  ;;  %v2038_v24 = vadd.f32 %v2037_v37, %v915_v14  ;;  %v2220_v55 = vadd.f32 %v2219_v3, %v1038_v62  ;;  %v2075_v47 = vadd.f32 %v2074_v8, %v916_v1  ;;  %v1969_v63 = vadd.f32 %v1968_v33, %v1967_v52 }
 0x166   :  { %v917_v50 = vld [vmem:[#allocation2 + $0x1bf0] sm:$0xff]  ;;  %v918_v11 = vld [vmem:[#allocation2 + $0x1bf8] sm:$0xff]  ;;  %v1040_v21 = vld [vmem:[#allocation2 + $0x1fc8] sm:$0xff]  ;;  %v2112_v32 = vadd.f32 %v2111_v40, %v979_v10  ;;  %v2149_v0 = vadd.f32 %v2148_v41, %v980_v29  ;;  %v2185_v44 = vadd.f32 %v2184_v22, %v1041_v27  ;;  %v2003_v61 = vrot.slane %v2002_v15, 4 }
 0x167   :  { %v981_v60 = vld [vmem:[#allocation2 + $0x1df0] sm:$0xff]  ;;  %v982_v20 = vld [vmem:[#allocation2 + $0x1df8] sm:$0xff]  ;;  %v1043_v7 = vld [vmem:[#allocation2 + $0x1fe0] sm:$0xff]  ;;  %v2039_v42 = vadd.f32 %v2038_v24, %v917_v50  ;;  %v2221_v36 = vadd.f32 %v2220_v55, %v1040_v21  ;;  %v2076_v43 = vadd.f32 %v2075_v47, %v918_v11  ;;  %v2471_v18 = vadd.f32 %v2549_v28, %v2461_v26 }
 0x168   :  { %v1042_v45 = vld [vmem:[#allocation2 + $0x1fd8] sm:$0xff]  ;;  %v1045_v34 = vld [vmem:[#allocation2 + $0x1ff0] sm:$0xff]  ;;  %v1044_v13 = vld [vmem:[#allocation2 + $0x1fe8] sm:$0xff]  ;;  %v2113_v38 = vadd.f32 %v2112_v32, %v981_v60  ;;  %v2150_v12 = vadd.f32 %v2149_v0, %v982_v20  ;;  %v2186_v30 = vadd.f32 %v2185_v44, %v1043_v7  ;;  %v2004_v10 = vadd.f32 %v2003_v61, %v2002_v15 }
 0x169   :  { %v2040_v16 = vrot.slane %v2039_v42, 4  ;;  %v2222_v14 = vadd.f32 %v2221_v36, %v1042_v45  ;;  %v1046_v62 = vld [vmem:[#allocation2 + $0x1ff8] sm:$0xff]  ;;  %v2077_v46 = vrot.slane %v2076_v43, 4  ;;  %v1970_v50 = vrot.slane %v1969_v63, 1 }
 0x16a   :  { %v2114_v1 = vrot.slane %v2113_v38, 4  ;;  %v2151_v25 = vrot.slane %v2150_v12, 4  ;;  %v2187_v4 = vadd.f32 %v2186_v30, %v1045_v34  ;;  %v2005_v11 = vrot.slane %v2004_v10, 2 }
 0x16b   :  { %v2041_v29 = vadd.f32 %v2040_v16, %v2039_v42  ;;  %v2223_v27 = vadd.f32 %v2222_v14, %v1044_v13  ;;  %v2078_v19 = vadd.f32 %v2077_v46, %v2076_v43  ;;  %v2264_v0 = vsel %vm2263_vm0, %v2410_v57, %v2404_v48 }
 0x16c   :  { %v2115_v51 = vadd.f32 %v2114_v1, %v2113_v38  ;;  %v2152_v37 = vadd.f32 %v2151_v25, %v2150_v12  ;;  %v2188_v3 = vrot.slane %v2187_v4, 4  ;;  %v2006_v20 = vadd.f32 %v2005_v11, %v2004_v10 }
 0x16d   :  { %v2042_v21 = vrot.slane %v2041_v29, 2  ;;  %v2224_v8 = vadd.f32 %v2223_v27, %v1046_v62  ;;  %v2079_v40 = vrot.slane %v2078_v19, 2  ;;  %v1971_v42 = vadd.f32 %v1970_v50, %v1969_v63  ;;  %v2555_v27 = vld [vmem:[#allocation10_spill] sm:$0xff] }
 0x16e   :  { %v2116_v41 = vrot.slane %v2115_v51, 2  ;;  %v2153_v22 = vrot.slane %v2152_v37, 2  ;;  %v2189_v60 = vadd.f32 %v2188_v3, %v2187_v4  ;;  %v2007_v45 = vrot.slane %v2006_v20, 1  ;;  %v2551_v4 = vld [vmem:[#allocation8_spill] sm:$0xff] }
 0x16f   :  { %v2043_v7 = vadd.f32 %v2042_v21, %v2041_v29  ;;  %v2225_v52 = vrot.slane %v2224_v8, 4  ;;  %v2080_v26 = vadd.f32 %v2079_v40, %v2078_v19  ;;  %v2266_v16 = vsel %vm2265_vm1, %v2414_v59, %v2264_v0  ;;  %v2556_v3 = vld [vmem:[#allocation12_spill] sm:$0xff] }
 0x170   :  { %v2117_v5 = vadd.f32 %v2116_v41, %v2115_v51  ;;  %v2154_v24 = vadd.f32 %v2153_v22, %v2152_v37  ;;  %v2190_v55 = vrot.slane %v2189_v60, 2  ;;  %v2008_v36 = vadd.f32 %v2007_v45, %v2006_v20 }
 0x171   :  { %v2044_v47 = vrot.slane %v2043_v7, 1  ;;  %v2226_v32 = vadd.f32 %v2225_v52, %v2224_v8  ;;  %v2081_v44 = vrot.slane %v2080_v26, 1  ;;  %v2268_v48 = vsel %vm2267_vm2, %v2420_v17, %v2266_v16 }
 0x172   :  { %v2118_v34 = vrot.slane %v2117_v5, 1  ;;  %v2155_v33 = vrot.slane %v2154_v24, 1  ;;  %v2191_v15 = vadd.f32 %v2190_v55, %v2189_v60  ;;  %v2270_v63 = vsel %vm2269_vm3, %v2429_v2, %v2268_v48 }
 0x173   :  { %v2227_v13 = vrot.slane %v2226_v32, 2  ;;  %v2045_v43 = vadd.f32 %v2044_v47, %v2043_v7  ;;  %v2082_v38 = vadd.f32 %v2081_v44, %v2080_v26  ;;  %v2277_v62 = vsel %vm2263_vm0, %v2412_v58, %v2406_v49 }
 0x174   :  { %v2119_v12 = vadd.f32 %v2118_v34, %v2117_v5  ;;  %v2192_v30 = vrot.slane %v2191_v15, 1  ;;  %v2156_v14 = vadd.f32 %v2155_v33, %v2154_v24  ;;  %v2272_v59 = vsel %vm2271_vm4, %v2433_v6, %v2270_v63  ;;  %v2550_v6 = vld [vmem:[#allocation11_spill] sm:$0xff] }
 0x175   :  { %v2228_v61 = vadd.f32 %v2227_v13, %v2226_v32  ;;  %v2278_v46 = vsel %vm2265_vm1, %v2418_v9, %v2277_v62  ;;  %v2284_v17 = vsel %vm2263_vm0, %v2455_v35, %v2451_v39  ;;  %v2291_v1 = vsel %vm2263_vm0, %v2457_v56, %v2453_v31  ;;  %v2552_v35 = vld [vmem:[#allocation14_spill] sm:$0xff]  ;;  %v2553_v31 = vld [vmem:[#allocation13_spill] sm:$0xff] }
 0x176   :  { %v2193_v2 = vadd.f32 %v2192_v30, %v2191_v15  ;;  %v2274_v25 = vsel %vm2273_vm5, %v2437_v53, %v2272_v59  ;;  %v2279_v49 = vsel %vm2267_vm2, %v2426_v23, %v2278_v46  ;;  %v2285_v58 = vsel %vm2265_vm1, %v2459_v54, %v2284_v17  ;;  %v2554_v53 = vld [vmem:[#allocation9_spill] sm:$0xff] }
 0x177   :  { %v2229_v57 = vrot.slane %v2228_v61, 1  ;;  %v2276_v9 = vsel %vm2275_vm6, %v2550_v6, %v2274_v25  ;;  %v2280_v39 = vsel %vm2269_vm3, %v2551_v4, %v2279_v49  ;;  %v2286_v28 = vsel %vm2267_vm2, %v2552_v35, %v2285_v58 }
 0x178   :  { %v2292_v56 = vsel %vm2265_vm1, %v2553_v31, %v2291_v1  ;;  %v2281_v29 = vsel %vm2271_vm4, %v2554_v53, %v2280_v39  ;;  %v2287_v23 = vsel %vm2269_vm3, %v1971_v42, %v2286_v28  ;;  %2302 = vst [vmem:[#allocation5] sm:$0xff] %v2276_v9 }
 0x179   :  { %v2230_v10 = vadd.f32 %v2229_v57, %v2228_v61  ;;  %v2293_v54 = vsel %vm2267_vm2, %v2471_v18, %v2292_v56  ;;  %v2282_v19 = vsel %vm2273_vm5, %v2555_v27, %v2281_v29  ;;  %v2288_v51 = vsel %vm2271_vm4, %v2045_v43, %v2287_v23 }
 0x17a   :  { %v2294_v37 = vsel %vm2269_vm3, %v2008_v36, %v2293_v54  ;;  %v2283_v50 = vsel %vm2275_vm6, %v2556_v3, %v2282_v19  ;;  %v2289_v11 = vsel %vm2273_vm5, %v2119_v12, %v2288_v51 }
 0x17b   :  { %v2295_v21 = vsel %vm2271_vm4, %v2082_v38, %v2294_v37  ;;  %v2290_v8 = vsel %vm2275_vm6, %v2193_v2, %v2289_v11  ;;  %2303 = vst [vmem:[#allocation5 + $0x8] sm:$0xff] %v2283_v50 }
 0x17c   :  { %v2296_v18 = vsel %vm2273_vm5, %v2156_v14, %v2295_v21  ;;  %2304 = vst [vmem:[#allocation5 + $0x10] sm:$0xff] %v2290_v8 }
 0x17d   :  { %v2297_v40 = vsel %vm2275_vm6, %v2230_v10, %v2296_v18 }
 0x17e   :  { %2305 = vst [vmem:[#allocation5 + $0x18] sm:$0xff] %v2297_v40 }
 0x17f   :  { %2360 = shalt.err (!%p2357_p12)
}
 0x180   :  { %s2361_s24 = scalar_lea.hbm %s2541_s1, 512 }
 0x181   :  { %p2362_p13 = scmp.ne.s32.totalorder %s2541_s1, %s2361_s24  ;;  %p2365_p0 = scmp.lt.u32.totalorder %s2361_s24, %s2541_s1 }
 0x183   :  { %p2367_p1 = pnand %p2365_p0, %p2362_p13 }
 0x185   :  { %2370 = shalt.err (!%p2367_p1)
}
 0x186   :  { %2317 = dma.vmem_to_hbm [thread:$0]  %s2312_s20, 512, %s2541_s1, [#allocation4], %s2376_s16, %s2376_s16, %s2377_s17  }
 0x187   :  { %2373 = dma.done.wait [#allocation4], 512  }
 0x188   :  { %2374 = vsyncadd [#allocation4], 4294966784 }
 0x189   :  { %2321 = vsyncpa [#allocation3], 1 }
 0x18a   :  { %2322 = vsyncpa [#allocation4], 1 }

</bundles_post_ra>
